<compile_context>
chip_gen: v7x
topology: tpu7x:2x2x1
jax: 0.10.0
libtpu: 0.0.40
codegen_flags: <defaults>
</compile_context>

<pallas_src>
import functools

import jax
import jax.numpy as jnp
from jax import lax
from jax.experimental import pallas as pl
from jax.experimental.pallas import tpu as pltpu


def _round_up(x, m):
    return ((x + m - 1) // m) * m


def cbow_kernel(ctx_ref, emb_ref, wt_ref, b_ref,      # inputs
                logits_ref, lse_ref,                   # outputs
                comb_ref, m_ref, l_ref):               # scratch
    # ctx_ref   : VMEM (tB, C)  int32   context indices for this batch tile
    # emb_ref   : VMEM (V, D)           full embedding table (fetched once)
    # wt_ref    : VMEM (D, tV)          lane-dense streamed tile of W^T
    # b_ref     : VMEM (1, tV)  f32     streamed tile of Linear bias
    # logits_ref: VMEM (tB, tV) f32     raw logits tile (lane-dense output)
    # lse_ref   : VMEM (tB, 1)  f32     log-sum-exp per row (written last tile)
    # comb_ref  : VMEM (tB, D)  w-dtype mean context embedding (resident over j)
    # m_ref/l_ref: VMEM (tB, 1) f32     online-softmax running max / sum
    j = pl.program_id(1)
    n_j = pl.num_programs(1)
    tB, C = ctx_ref.shape
    V = emb_ref.shape[0]

    # ---- once per batch tile: gather + mean as a one-hot-counts matmul ----
    @pl.when(j == 0)
    def _init():
        vocab_iota = lax.broadcasted_iota(jnp.int32, (tB, V), 1)
        counts = jnp.zeros((tB, V), jnp.float32)
        for c in range(C):                                   # C is small & static
            counts = counts + (vocab_iota == ctx_ref[:, c:c + 1]).astype(jnp.float32)
        comb = jnp.dot(counts.astype(emb_ref.dtype), emb_ref[...],
                       preferred_element_type=jnp.float32) * (1.0 / C)
        comb_ref[...] = comb.astype(comb_ref.dtype)          # cast once, not per j
        m_ref[...] = jnp.full((tB, 1), -jnp.inf, jnp.float32)
        l_ref[...] = jnp.zeros((tB, 1), jnp.float32)

    # ---- linear tile: (tB, D) @ (D, tV) on the MXU (K sublanes, N lanes) ----
    logits = jnp.dot(comb_ref[...], wt_ref[...],
                     preferred_element_type=jnp.float32) + b_ref[...].astype(jnp.float32)
    logits_ref[...] = logits

    # ---- online logsumexp across the vocab tiles ----
    m_prev = m_ref[...]
    m_new = jnp.maximum(m_prev, jnp.max(logits, axis=-1, keepdims=True))
    l_ref[...] = (l_ref[...] * jnp.exp(m_prev - m_new)
                  + jnp.sum(jnp.exp(logits - m_new), axis=-1, keepdims=True))
    m_ref[...] = m_new

    @pl.when(j == n_j - 1)
    def _finalize():
        lse_ref[...] = m_ref[...] + jnp.log(l_ref[...])


def logprob_kernel(logits_ref, lse_ref, out_ref):
    # In-place (aliased) normalization epilogue: log_probs = logits - lse.
    out_ref[...] = logits_ref[...] - lse_ref[...]


def _vmem_estimate(bb, bv, V, D, C, emb_bytes, w_bytes):
    lane = 128

    def pad(n, m):
        return _round_up(max(int(n), 1), m)

    est = 0
    est += 2 * bb * pad(C, lane) * 4                 # contexts tile (dbl-buffered)
    est += 2 * pad(V, 8) * pad(D, lane) * emb_bytes  # resident emb table buffers
    est += 2 * pad(D, 8) * pad(bv, lane) * w_bytes   # W^T tile
    est += 2 * 8 * pad(bv, lane) * 4                 # bias tile
    est += 2 * bb * pad(bv, lane) * 4                # logits out tile
    est += 2 * bb * lane * 4                         # lse out tile
    est += bb * pad(D, lane) * w_bytes               # comb scratch
    est += 2 * bb * lane * 4                         # m / l scratch
    return est


@functools.partial(jax.jit, static_argnames=("block_b", "block_v"))
def _cbow_pallas(contexts, embedding_table, linear_weight, linear_bias,
                 *, block_b, block_v):
    Bp, C = contexts.shape
    V, D = embedding_table.shape

    w_t = linear_weight.T                       # (D, V): lane-dense (D, tV) tiles
    bias2d = linear_bias.reshape(1, V).astype(jnp.float32)

    grid = (Bp // block_b, V // block_v)
    est = _vmem_estimate(block_b, block_v, V, D, C,
                         jnp.dtype(embedding_table.dtype).itemsize,
                         jnp.dtype(linear_weight.dtype).itemsize)
    vmem_limit = int(min(max(2 * est, 32 * 1024 * 1024), 64 * 1024 * 1024))

    logits, lse = pl.pallas_call(
        cbow_kernel,
        out_shape=(jax.ShapeDtypeStruct((Bp, V), jnp.float32),
                   jax.ShapeDtypeStruct((Bp, 1), jnp.float32)),
        grid_spec=pltpu.PrefetchScalarGridSpec(
            num_scalar_prefetch=0,
            grid=grid,
            in_specs=[
                pl.BlockSpec((block_b, C), lambda i, j: (i, 0)),   # contexts
                pl.BlockSpec((V, D), lambda i, j: (0, 0)),         # emb table (once)
                pl.BlockSpec((D, block_v), lambda i, j: (0, j)),   # W^T tile
                pl.BlockSpec((1, block_v), lambda i, j: (0, j)),   # bias tile
            ],
            out_specs=(
                pl.BlockSpec((block_b, block_v), lambda i, j: (i, j)),  # logits
                pl.BlockSpec((block_b, 1), lambda i, j: (i, 0)),        # lse
            ),
            scratch_shapes=[
                pltpu.VMEM((block_b, D), linear_weight.dtype),   # combined embed
                pltpu.VMEM((block_b, 1), jnp.float32),           # running max
                pltpu.VMEM((block_b, 1), jnp.float32),           # running sum(exp)
            ],
        ),
        compiler_params=pltpu.CompilerParams(
            dimension_semantics=("parallel", "arbitrary"),
            vmem_limit_bytes=vmem_limit),
    )(contexts, embedding_table, w_t, bias2d)

    # Tiled normalization epilogue writing the log-probs in place of the raw
    # logits buffer (input_output_aliases) — no extra (B, V) HBM allocation.
    log_probs = pl.pallas_call(
        logprob_kernel,
        out_shape=jax.ShapeDtypeStruct((Bp, V), jnp.float32),
        grid_spec=pltpu.PrefetchScalarGridSpec(
            num_scalar_prefetch=0,
            grid=grid,
            in_specs=[
                pl.BlockSpec((block_b, block_v), lambda i, j: (i, j)),
                pl.BlockSpec((block_b, 1), lambda i, j: (i, 0)),
            ],
            out_specs=pl.BlockSpec((block_b, block_v), lambda i, j: (i, j)),
        ),
        input_output_aliases={0: 0},
        compiler_params=pltpu.CompilerParams(
            dimension_semantics=("parallel", "arbitrary")),
    )(logits, lse)
    return log_probs


def cbow_forward_batched(contexts, embedding_table, linear_weight, linear_bias,
                         *, block_b=128, block_v=256):
    """contexts: (B, C) int; embedding_table: (V, D); linear_weight: (V, D);
    linear_bias: (V,). Returns (B, V) f32 log-probs (rows normalized)."""
    B, C = contexts.shape
    V, D = embedding_table.shape
    assert linear_weight.shape == (V, D)
    assert linear_bias.shape == (V,)

    # Batch tile: a multiple of 8 sublanes, no larger than the (padded) batch.
    bb = min(block_b, _round_up(B, 8))
    bb = max(8, (bb // 8) * 8)
    B_pad = _round_up(B, bb)

    # Vocab tile: lane-dense multiple of 128 (or the whole vocab if small).
    if V <= block_v:
        bv = V
    else:
        assert V % block_v == 0, "vocab must be a multiple of block_v"
        bv = block_v
    assert bv == V or bv % 128 == 0

    ctx = contexts.astype(jnp.int32)
    if B_pad != B:
        ctx = jnp.concatenate([ctx, jnp.zeros((B_pad - B, C), jnp.int32)], axis=0)

    out = _cbow_pallas(ctx, embedding_table, linear_weight, linear_bias,
                       block_b=bb, block_v=bv)
    return out[:B]


def cbow_forward(context, embedding_table, linear_weight, linear_bias):
    """Module-equivalent single-example forward: (C,) -> (1, V) log-probs."""
    C = context.shape[0]
    return cbow_forward_batched(context.reshape(1, C), embedding_table,
                                linear_weight, linear_bias)


if __name__ == "__main__":
    VOCAB = 512    # 2 vocab tiles of block_v=256 -> exercises the online lse
    DIM = 32       # embedding_dim
    CTX = 8        # context window size
    BATCH = 256    # 2 batch tiles of block_b=128 -> 'parallel' axis has 2 steps

    key = jax.random.PRNGKey(0)
    k_emb, k_w, k_b, k_ctx, k_ctx1 = jax.random.split(key, 5)

    embedding_table = jax.random.normal(k_emb, (VOCAB, DIM), dtype=jnp.float32)
    bound = 1.0 / (DIM ** 0.5)
    linear_weight = jax.random.uniform(k_w, (VOCAB, DIM), jnp.float32, -bound, bound)
    linear_bias = jax.random.uniform(k_b, (VOCAB,), jnp.float32, -bound, bound)

    contexts = jax.random.randint(k_ctx, (BATCH, CTX), 0, VOCAB, dtype=jnp.int32)

    # ---- Pallas kernel: batched f32 ----
    log_probs = jax.block_until_ready(
        cbow_forward_batched(contexts, embedding_table, linear_weight, linear_bias))

    # ---- Pure-JAX reference (high precision) ----
    def reference(ctxs):
        embeds = embedding_table[ctxs]                       # (B, C, D)
        combined = jnp.mean(embeds, axis=1)                  # (B, D)
        out = jnp.einsum("bd,vd->bv", combined, linear_weight,
                         precision=jax.lax.Precision.HIGHEST) + linear_bias
        return jax.nn.log_softmax(out, axis=-1)

    ref = reference(contexts)
    assert log_probs.shape == (BATCH, VOCAB)
    assert jnp.allclose(log_probs, ref, atol=5e-3), "batched mismatch vs reference"
    # valid log-probabilities: logsumexp over vocab ~ 0
    row_lse = jnp.log(jnp.sum(jnp.exp(log_probs), axis=-1))
    assert jnp.allclose(row_lse, 0.0, atol=1e-3), "rows are not normalized"

    # ---- Module-equivalent single-context call: (C,) -> (1, V) ----
    context1 = jax.random.randint(k_ctx1, (CTX,), 0, VOCAB, dtype=jnp.int32)
    lp1 = jax.block_until_ready(
        cbow_forward(context1, embedding_table, linear_weight, linear_bias))
    ref1 = reference(context1.reshape(1, CTX))
    assert lp1.shape == (1, VOCAB)
    assert jnp.allclose(lp1, ref1, atol=5e-3), "single-context mismatch vs reference"

    # ---- bf16 weight streaming (f32 accumulation inside the kernel) ----
    lp_bf16 = jax.block_until_ready(
        cbow_forward_batched(contexts,
                             embedding_table.astype(jnp.bfloat16),
                             linear_weight.astype(jnp.bfloat16),
                             linear_bias))
    assert jnp.allclose(lp_bf16, log_probs, atol=5e-2), "bf16 path diverged"

    print("KERNEL_OK")
</pallas_src>

<mosaic_0001>
module attributes {stable_mosaic.version = 11 : i64} {
  func.func @logprob_kernel(%arg0: i32, %arg1: i32, %arg2: memref<128x256xf32, #tpu.memory_space<vmem>>, %arg3: memref<128x1xf32, #tpu.memory_space<vmem>>, %arg4: memref<128x256xf32, #tpu.memory_space<vmem>>) attributes {dimension_semantics = [#tpu.dimension_semantics<parallel>, #tpu.dimension_semantics<arbitrary>], iteration_bounds = array<i64: 2, 2>, scalar_prefetch = 0 : i64, scratch_operands = 0 : i64, tpu.core_type = #tpu.core_type<tc>, window_params = [{transform_indices = @transform_0, window_bounds = array<i64: 128, 256>}, {transform_indices = @transform_1, window_bounds = array<i64: 128, 1>}, {transform_indices = @transform_2, window_bounds = array<i64: 128, 256>}]} {
    %c0 = arith.constant 0 : index
    %c0_0 = arith.constant 0 : index
    %0 = vector.load %arg2[%c0, %c0_0] : memref<128x256xf32, #tpu.memory_space<vmem>>, vector<128x256xf32>
    %c0_1 = arith.constant 0 : index
    %c0_2 = arith.constant 0 : index
    %1 = vector.load %arg3[%c0_1, %c0_2] : memref<128x1xf32, #tpu.memory_space<vmem>>, vector<128x1xf32>
    %2 = vector.broadcast %1 : vector<128x1xf32> to vector<128x256xf32>
    %3 = arith.subf %0, %2 : vector<128x256xf32>
    %c0_3 = arith.constant 0 : index
    %c0_4 = arith.constant 0 : index
    %4 = vector.load %arg4[%c0_3, %c0_4] : memref<128x256xf32, #tpu.memory_space<vmem>>, vector<128x256xf32>
    tpu.vector_store %arg4[%c0_3, %c0_4], %3 {strides = array<i32>} : memref<128x256xf32, #tpu.memory_space<vmem>>, vector<128x256xf32>,
    return
  }
  func.func @transform_0(%arg0: i32, %arg1: i32) -> (i32, i32) {
    %c0_i32 = arith.constant 0 : i32
    return %arg0, %arg1 : i32, i32
  }
  func.func @transform_1(%arg0: i32, %arg1: i32) -> (i32, i32) {
    %c0_i32 = arith.constant 0 : i32
    %c0_i32_0 = arith.constant 0 : i32
    return %arg0, %c0_i32 : i32, i32
  }
  func.func @transform_2(%arg0: i32, %arg1: i32) -> (i32, i32) {
    %c0_i32 = arith.constant 0 : i32
    return %arg0, %arg1 : i32, i32
  }
}

module attributes {stable_mosaic.version = 11 : i64} {
  func.func @cbow_kernel(%arg0: i32, %arg1: i32, %arg2: memref<128x8xi32, #tpu.memory_space<vmem>>, %arg3: memref<512x32xf32, #tpu.memory_space<vmem>>, %arg4: memref<32x256xf32, #tpu.memory_space<vmem>>, %arg5: memref<1x256xf32, #tpu.memory_space<vmem>>, %arg6: memref<128x256xf32, #tpu.memory_space<vmem>>, %arg7: memref<128x1xf32, #tpu.memory_space<vmem>>, %arg8: memref<128x32xf32, #tpu.memory_space<vmem>>, %arg9: memref<128x1xf32, #tpu.memory_space<vmem>>, %arg10: memref<128x1xf32, #tpu.memory_space<vmem>>) attributes {dimension_semantics = [#tpu.dimension_semantics<parallel>, #tpu.dimension_semantics<arbitrary>], iteration_bounds = array<i64: 2, 2>, scalar_prefetch = 0 : i64, scratch_operands = 3 : i64, tpu.core_type = #tpu.core_type<tc>, window_params = [{transform_indices = @transform_0, window_bounds = array<i64: 128, 8>}, {pipeline_mode = #tpu.pipeline_mode<synchronous>, transform_indices = @transform_1, window_bounds = array<i64: 512, 32>}, {transform_indices = @transform_2, window_bounds = array<i64: 32, 256>}, {transform_indices = @transform_3, window_bounds = array<i64: 1, 256>}, {transform_indices = @transform_4, window_bounds = array<i64: 128, 256>}, {transform_indices = @transform_5, window_bounds = array<i64: 128, 1>}]} {
    %c0_i32 = arith.constant 0 : i32
    %0 = arith.cmpi eq, %arg1, %c0_i32 : i32
    %1 = arith.extui %0 : i1 to i32
    %c0_i32_0 = arith.constant 0 : i32
    %2 = arith.cmpi ne, %1, %c0_i32_0 : i32
    scf.if %2 {
      %29 = tpu.iota {dimensions = array<i32: 1>} : vector<128x512xi32>
      %cst_19 = arith.constant 0.000000e+00 : f32
      %30 = vector.broadcast %cst_19 : f32 to vector<128x512xf32>
      %c0_20 = arith.constant 0 : index
      %c0_21 = arith.constant 0 : index
      %31 = vector.load %arg2[%c0_20, %c0_21] : memref<128x8xi32, #tpu.memory_space<vmem>>, vector<128x1xi32>
      %32 = vector.broadcast %31 : vector<128x1xi32> to vector<128x512xi32>
      %33 = arith.cmpi eq, %29, %32 : vector<128x512xi32>
      %34 = arith.extui %33 : vector<128x512xi1> to vector<128x512xi32>
      %35 = arith.sitofp %34 : vector<128x512xi32> to vector<128x512xf32>
      %36 = arith.addf %30, %35 : vector<128x512xf32>
      %c0_22 = arith.constant 0 : index
      %c1 = arith.constant 1 : index
      %37 = vector.load %arg2[%c0_22, %c1] : memref<128x8xi32, #tpu.memory_space<vmem>>, vector<128x1xi32>
      %38 = vector.broadcast %37 : vector<128x1xi32> to vector<128x512xi32>
      %39 = arith.cmpi eq, %29, %38 : vector<128x512xi32>
      %40 = arith.extui %39 : vector<128x512xi1> to vector<128x512xi32>
      %41 = arith.sitofp %40 : vector<128x512xi32> to vector<128x512xf32>
      %42 = arith.addf %36, %41 : vector<128x512xf32>
      %c0_23 = arith.constant 0 : index
      %c2 = arith.constant 2 : index
      %43 = vector.load %arg2[%c0_23, %c2] : memref<128x8xi32, #tpu.memory_space<vmem>>, vector<128x1xi32>
      %44 = vector.broadcast %43 : vector<128x1xi32> to vector<128x512xi32>
      %45 = arith.cmpi eq, %29, %44 : vector<128x512xi32>
      %46 = arith.extui %45 : vector<128x512xi1> to vector<128x512xi32>
      %47 = arith.sitofp %46 : vector<128x512xi32> to vector<128x512xf32>
      %48 = arith.addf %42, %47 : vector<128x512xf32>
      %c0_24 = arith.constant 0 : index
      %c3 = arith.constant 3 : index
      %49 = vector.load %arg2[%c0_24, %c3] : memref<128x8xi32, #tpu.memory_space<vmem>>, vector<128x1xi32>
      %50 = vector.broadcast %49 : vector<128x1xi32> to vector<128x512xi32>
      %51 = arith.cmpi eq, %29, %50 : vector<128x512xi32>
      %52 = arith.extui %51 : vector<128x512xi1> to vector<128x512xi32>
      %53 = arith.sitofp %52 : vector<128x512xi32> to vector<128x512xf32>
      %54 = arith.addf %48, %53 : vector<128x512xf32>
      %c0_25 = arith.constant 0 : index
      %c4 = arith.constant 4 : index
      %55 = vector.load %arg2[%c0_25, %c4] : memref<128x8xi32, #tpu.memory_space<vmem>>, vector<128x1xi32>
      %56 = vector.broadcast %55 : vector<128x1xi32> to vector<128x512xi32>
      %57 = arith.cmpi eq, %29, %56 : vector<128x512xi32>
      %58 = arith.extui %57 : vector<128x512xi1> to vector<128x512xi32>
      %59 = arith.sitofp %58 : vector<128x512xi32> to vector<128x512xf32>
      %60 = arith.addf %54, %59 : vector<128x512xf32>
      %c0_26 = arith.constant 0 : index
      %c5 = arith.constant 5 : index
      %61 = vector.load %arg2[%c0_26, %c5] : memref<128x8xi32, #tpu.memory_space<vmem>>, vector<128x1xi32>
      %62 = vector.broadcast %61 : vector<128x1xi32> to vector<128x512xi32>
      %63 = arith.cmpi eq, %29, %62 : vector<128x512xi32>
      %64 = arith.extui %63 : vector<128x512xi1> to vector<128x512xi32>
      %65 = arith.sitofp %64 : vector<128x512xi32> to vector<128x512xf32>
      %66 = arith.addf %60, %65 : vector<128x512xf32>
      %c0_27 = arith.constant 0 : index
      %c6 = arith.constant 6 : index
      %67 = vector.load %arg2[%c0_27, %c6] : memref<128x8xi32, #tpu.memory_space<vmem>>, vector<128x1xi32>
      %68 = vector.broadcast %67 : vector<128x1xi32> to vector<128x512xi32>
      %69 = arith.cmpi eq, %29, %68 : vector<128x512xi32>
      %70 = arith.extui %69 : vector<128x512xi1> to vector<128x512xi32>
      %71 = arith.sitofp %70 : vector<128x512xi32> to vector<128x512xf32>
      %72 = arith.addf %66, %71 : vector<128x512xf32>
      %c0_28 = arith.constant 0 : index
      %c7 = arith.constant 7 : index
      %73 = vector.load %arg2[%c0_28, %c7] : memref<128x8xi32, #tpu.memory_space<vmem>>, vector<128x1xi32>
      %74 = vector.broadcast %73 : vector<128x1xi32> to vector<128x512xi32>
      %75 = arith.cmpi eq, %29, %74 : vector<128x512xi32>
      %76 = arith.extui %75 : vector<128x512xi1> to vector<128x512xi32>
      %77 = arith.sitofp %76 : vector<128x512xi32> to vector<128x512xf32>
      %78 = arith.addf %72, %77 : vector<128x512xf32>
      %c0_29 = arith.constant 0 : index
      %c0_30 = arith.constant 0 : index
      %79 = vector.load %arg3[%c0_29, %c0_30] : memref<512x32xf32, #tpu.memory_space<vmem>>, vector<512x32xf32>
      %cst_31 = arith.constant dense<0.000000e+00> : vector<128x32xf32>
      %80 = tpu.matmul %78, %79, %cst_31 {dimension_numbers = #tpu.dot_dimension_numbers<[1], [0], [0], [1], [0, 0, 1, 1], [], []>} : vector<128x512xf32>, vector<512x32xf32>, vector<128x32xf32> -> vector<128x32xf32>
      %cst_32 = arith.constant 1.250000e-01 : f32
      %81 = vector.broadcast %cst_32 : f32 to vector<128x32xf32>
      %82 = arith.mulf %80, %81 : vector<128x32xf32>
      %c0_33 = arith.constant 0 : index
      %c0_34 = arith.constant 0 : index
      %83 = vector.load %arg8[%c0_33, %c0_34] : memref<128x32xf32, #tpu.memory_space<vmem>>, vector<128x32xf32>
      tpu.vector_store %arg8[%c0_33, %c0_34], %82 {strides = array<i32>} : memref<128x32xf32, #tpu.memory_space<vmem>>, vector<128x32xf32>,
      %cst_35 = arith.constant 0xFF800000 : f32
      %84 = vector.broadcast %cst_35 : f32 to vector<128x1xf32>
      %c0_36 = arith.constant 0 : index
      %c0_37 = arith.constant 0 : index
      %85 = vector.load %arg9[%c0_36, %c0_37] : memref<128x1xf32, #tpu.memory_space<vmem>>, vector<128x1xf32>
      tpu.vector_store %arg9[%c0_36, %c0_37], %84 {strides = array<i32>} : memref<128x1xf32, #tpu.memory_space<vmem>>, vector<128x1xf32>,
      %cst_38 = arith.constant 0.000000e+00 : f32
      %86 = vector.broadcast %cst_38 : f32 to vector<128x1xf32>
      %c0_39 = arith.constant 0 : index
      %c0_40 = arith.constant 0 : index
      %87 = vector.load %arg10[%c0_39, %c0_40] : memref<128x1xf32, #tpu.memory_space<vmem>>, vector<128x1xf32>
      tpu.vector_store %arg10[%c0_39, %c0_40], %86 {strides = array<i32>} : memref<128x1xf32, #tpu.memory_space<vmem>>, vector<128x1xf32>,
    } else {
    }
    %c0 = arith.constant 0 : index
    %c0_1 = arith.constant 0 : index
    %3 = vector.load %arg8[%c0, %c0_1] : memref<128x32xf32, #tpu.memory_space<vmem>>, vector<128x32xf32>
    %c0_2 = arith.constant 0 : index
    %c0_3 = arith.constant 0 : index
    %4 = vector.load %arg4[%c0_2, %c0_3] : memref<32x256xf32, #tpu.memory_space<vmem>>, vector<32x256xf32>
    %cst = arith.constant dense<0.000000e+00> : vector<128x256xf32>
    %5 = tpu.matmul %3, %4, %cst {dimension_numbers = #tpu.dot_dimension_numbers<[1], [0], [0], [1], [0, 0, 1, 1], [], []>} : vector<128x32xf32>, vector<32x256xf32>, vector<128x256xf32> -> vector<128x256xf32>
    %c0_4 = arith.constant 0 : index
    %c0_5 = arith.constant 0 : index
    %6 = vector.load %arg5[%c0_4, %c0_5] : memref<1x256xf32, #tpu.memory_space<vmem>>, vector<1x256xf32>
    %7 = vector.broadcast %6 : vector<1x256xf32> to vector<128x256xf32>
    %8 = arith.addf %5, %7 : vector<128x256xf32>
    %c0_6 = arith.constant 0 : index
    %c0_7 = arith.constant 0 : index
    %9 = vector.load %arg6[%c0_6, %c0_7] : memref<128x256xf32, #tpu.memory_space<vmem>>, vector<128x256xf32>
    tpu.vector_store %arg6[%c0_6, %c0_7], %8 {strides = array<i32>} : memref<128x256xf32, #tpu.memory_space<vmem>>, vector<128x256xf32>,
    %c0_8 = arith.constant 0 : index
    %c0_9 = arith.constant 0 : index
    %10 = vector.load %arg9[%c0_8, %c0_9] : memref<128x1xf32, #tpu.memory_space<vmem>>, vector<128x1xf32>
    %cst_10 = arith.constant dense<0xFF800000> : vector<128xf32>
    %11 = vector.multi_reduction <maximumf>, %8, %cst_10 [1] : vector<128x256xf32> to vector<128xf32>
    %12 = vector.shape_cast %11 : vector<128xf32> to vector<128x1xf32>
    %13 = arith.maximumf %10, %12 : vector<128x1xf32>
    %c0_11 = arith.constant 0 : index
    %c0_12 = arith.constant 0 : index
    %14 = vector.load %arg10[%c0_11, %c0_12] : memref<128x1xf32, #tpu.memory_space<vmem>>, vector<128x1xf32>
    %15 = arith.subf %10, %13 : vector<128x1xf32>
    %16 = math.exp %15 : vector<128x1xf32>
    %17 = arith.mulf %14, %16 : vector<128x1xf32>
    %18 = vector.broadcast %13 : vector<128x1xf32> to vector<128x256xf32>
    %19 = arith.subf %8, %18 : vector<128x256xf32>
    %20 = math.exp %19 : vector<128x256xf32>
    %cst_13 = arith.constant dense<0.000000e+00> : vector<128xf32>
    %21 = vector.multi_reduction <add>, %20, %cst_13 [1] : vector<128x256xf32> to vector<128xf32>
    %22 = vector.shape_cast %21 : vector<128xf32> to vector<128x1xf32>
    %23 = arith.addf %17, %22 : vector<128x1xf32>
    %c0_14 = arith.constant 0 : index
    %c0_15 = arith.constant 0 : index
    %24 = vector.load %arg10[%c0_14, %c0_15] : memref<128x1xf32, #tpu.memory_space<vmem>>, vector<128x1xf32>
    tpu.vector_store %arg10[%c0_14, %c0_15], %23 {strides = array<i32>} : memref<128x1xf32, #tpu.memory_space<vmem>>, vector<128x1xf32>,
    %c0_16 = arith.constant 0 : index
    %c0_17 = arith.constant 0 : index
    %25 = vector.load %arg9[%c0_16, %c0_17] : memref<128x1xf32, #tpu.memory_space<vmem>>, vector<128x1xf32>
    tpu.vector_store %arg9[%c0_16, %c0_17], %13 {strides = array<i32>} : memref<128x1xf32, #tpu.memory_space<vmem>>, vector<128x1xf32>,
    %c1_i32 = arith.constant 1 : i32
    %26 = arith.cmpi eq, %arg1, %c1_i32 : i32
    %27 = arith.extui %26 : i1 to i32
    %c0_i32_18 = arith.constant 0 : i32
    %28 = arith.cmpi ne, %27, %c0_i32_18 : i32
    scf.if %28 {
      %c0_19 = arith.constant 0 : index
      %c0_20 = arith.constant 0 : index
      %29 = vector.load %arg9[%c0_19, %c0_20] : memref<128x1xf32, #tpu.memory_space<vmem>>, vector<128x1xf32>
      %c0_21 = arith.constant 0 : index
      %c0_22 = arith.constant 0 : index
      %30 = vector.load %arg10[%c0_21, %c0_22] : memref<128x1xf32, #tpu.memory_space<vmem>>, vector<128x1xf32>
      %31 = math.log %30 : vector<128x1xf32>
      %32 = arith.addf %29, %31 : vector<128x1xf32>
      %c0_23 = arith.constant 0 : index
      %c0_24 = arith.constant 0 : index
      %33 = vector.load %arg7[%c0_23, %c0_24] : memref<128x1xf32, #tpu.memory_space<vmem>>, vector<128x1xf32>
      tpu.vector_store %arg7[%c0_23, %c0_24], %32 {strides = array<i32>} : memref<128x1xf32, #tpu.memory_space<vmem>>, vector<128x1xf32>,
    } else {
    }
    return
  }
  func.func @transform_0(%arg0: i32, %arg1: i32) -> (i32, i32) {
    %c0_i32 = arith.constant 0 : i32
    %c0_i32_0 = arith.constant 0 : i32
    return %arg0, %c0_i32 : i32, i32
  }
  func.func @transform_1(%arg0: i32, %arg1: i32) -> (i32, i32) {
    %c0_i32 = arith.constant 0 : i32
    %c0_i32_0 = arith.constant 0 : i32
    %c0_i32_1 = arith.constant 0 : i32
    return %c0_i32, %c0_i32_0 : i32, i32
  }
  func.func @transform_2(%arg0: i32, %arg1: i32) -> (i32, i32) {
    %c0_i32 = arith.constant 0 : i32
    %c0_i32_0 = arith.constant 0 : i32
    return %c0_i32, %arg1 : i32, i32
  }
  func.func @transform_3(%arg0: i32, %arg1: i32) -> (i32, i32) {
    %c0_i32 = arith.constant 0 : i32
    %c0_i32_0 = arith.constant 0 : i32
    return %c0_i32, %arg1 : i32, i32
  }
  func.func @transform_4(%arg0: i32, %arg1: i32) -> (i32, i32) {
    %c0_i32 = arith.constant 0 : i32
    return %arg0, %arg1 : i32, i32
  }
  func.func @transform_5(%arg0: i32, %arg1: i32) -> (i32, i32) {
    %c0_i32 = arith.constant 0 : i32
    %c0_i32_0 = arith.constant 0 : i32
    return %arg0, %c0_i32 : i32, i32
  }
}

</mosaic_0001>

<bundles_post_ra>
// kernel: _cbow_pallas.3
= control target key start
LH: loop header
LB: loop body
LE: loop exit
PB: predicated region body
PF: predicated region fallthrough
CT: control target
= control target key end

     0   :  { %7 = vsyncpa [#allocation3], 0  ;;  %s1056_s0 = inlined_call_operand.hbm [shape: f32[256,512], index: 0, kind: input, shape index: {}, may-alias: {0,2}]   ;;  %s1057_s1 = inlined_call_operand.vmem [shape: f32[256,1], index: 1, kind: input, shape index: {}]   ;;  %s1058_s2 = inlined_call_operand.hbm [shape: f32[256,512], index: 2, kind: output, shape index: {}, may-alias: {0,2}]  }
   0x1   :  { %9 = vsyncpa [#allocation3 + $0x1], 0 }
   0x2   :  { %10 = vsyncpa [#allocation4], 0 }
   0x3   :  { %12 = vsyncpa [#allocation4 + $0x1], 0  ;;  %s782_s9 = smov 0   ;;  %s784_s10 = smov 0  }
   0x4   :  { %s786_s11 = smov 0   ;;  %s788_s12 = smov 0  }
   0x5   :  { %s790_s13 = smov 0   ;;  %s792_s14 = smov 0  }
   0x6   :  { %s794_s15 = smov 0   ;;  %s796_s16 = smov 0  }
   0x7 LB: > { %s518_s17 = sadd.s32 4294967295, %s756_s16   ;;  %s519_s18 = sadd.s32 4294967294, %s756_s16   ;;  %s756_s16 = sphi %s796_s16, %s18_s16   ;;  %s752_s15 = sphi %s794_s15, %s1074_s15   ;;  %s748_s14 = sphi %s792_s14, %s1073_s14   ;;  %s744_s13 = sphi %s790_s13, %s1072_s13   ;;  %s740_s12 = sphi %s788_s12, %s1071_s12   ;;  %s736_s11 = sphi %s786_s11, %s1070_s11   ;;  %s732_s10 = sphi %s784_s10, %s1069_s10   ;;  %s728_s9 = sphi %s782_s9, %s1068_s9  }
   0x8   : > { %s27_s19 = sadd.s32 1, %s748_s14  ;;  %s30_s20 = sadd.s32 1, %s752_s15 }
   0x9   : > { %p28_p0 = scmp.ge.s32.totalorder %s27_s19, 2  ;;  %s39_s21 = sadd.s32 1, %s736_s11 }
   0xa   : > { %p46_p1 = scmp.ne.s32.totalorder %s736_s11, %s732_s10  ;;  %p47_p2 = scmp.eq.s32.totalorder %s756_s16, 0 }
   0xb   : > { %s1076_s19 = smov (%p28_p0, %s27_s19), 0  ;;  %s1078_s20 = smov (!%p28_p0, %s30_s20), %s752_s15 }
   0xc   : > { %s35_s22 = ssub.s32 %s748_s14, %s1076_s19  ;;  %p835_p3 = por %p47_p2, %p46_p1 }
   0xd   : > { %p32_p4 = scmp.ge.s32.totalorder %s1078_s20, 2  ;;  %p52_p5 = scmp.ne.s32.totalorder %s732_s10, %s728_s9 }
   0xe   : > { %p53_p6 = scmp.eq.s32.totalorder %s518_s17, 0  ;;  %p104_p7 = scmp.eq.s32.totalorder %s518_s17, 3 }
   0xf   : > { %s1080_s20 = smov (%p32_p4, %s1078_s20), 0  ;;  %p110_p10 = scmp.eq.s32.totalorder %s519_s18, 3 }
  0x10   : > { %p843_p8 = por %p53_p6, %p52_p5  ;;  %p847_p9 = por %p104_p7, %p46_p1 }
  0x11   : > { %s34_s26 = ssub.s32 %s752_s15, %s1080_s20  ;;  %p853_p12 = por %p110_p10, %p52_p5 }
  0x12   : > { %s1062_s25 = scalar_select %p847_p9, 1, 0 }
  0x13   : > { %s36_s27 = sor.u32 %s35_s22, %s34_s26  ;;  %p553_p13 = scmp.lt.s32.totalorder %s756_s16, 4 }
  0x14   : > { %p37_p11 = scmp.eq.s32.totalorder %s36_s27, 0  ;;  %s130_s29 = sand.u32 1, %s736_s11  }
  0x15   : > { %s1063_s28 = scalar_select %p853_p12, 1, 0 }
  0x16   : > { %s860_s30 = scalar_select %p37_p11, %s736_s11, %s39_s21  }
  0x17   : > { %s522_s3 = sshll.u32 %s130_s29, 8  ;;  %s524_s4 = sshll.u32 %s748_s14, 1 }
  0x18   : > { %s539_s5 = sshll.u32 %s752_s15, 6  ;;  %s134_s6 = scalar_lea.vmem [#allocation2], %s522_s3 }
  0x19   : > { %s144_s7 = sshll.u32 %s134_s6, 4  ;;  %s141_s8 = sadd.s32 %s539_s5, %s524_s4  ;;  %s864_s7 = int_to_ptr.vmem [resolvable:$true] %s144_s7 }
  0x1a   : > { %s526_s17 = sshll.u32 %s141_s8, 7  ;;  %p868_p0 = pnand %p553_p13, %p835_p3 }
  0x1b   : > { %s875_s21 = scalar_lea.hbm %s1056_s0, %s526_s17  ;;  %s878_s27 = scalar_lea.sflag [#allocation3], %s130_s29 }
  0x1c   : > { %s628_s3 = scalar_lea.hbm %s875_s21, 4096  ;;  %p630_p3 = pneg %p868_p0 }
  0x1d   : > { %p629_p2 = scmp.ne.s32.totalorder %s875_s21, %s628_s3  ;;  %s633_s5 = scalar_lea.hbm %s1056_s0, 16384 }
  0x1e   : > { %p634_p6 = scmp.lt.u32.totalorder %s875_s21, %s1056_s0  ;;  %p635_p7 = scmp.lt.u32.totalorder %s633_s5, %s628_s3 }
  0x1f   : > { %p631_p4 = pnand %p630_p3, %p629_p2  ;;  %p637_p11 = scmp.lt.u32.totalorder %s628_s3, %s875_s21 }
  0x20   : > { %p636_p10 = por %p635_p7, %p634_p6 }
  0x21   : > { %p632_p5 = pneg %p631_p4 }
  0x22   : > { %p638_p13 = por %p637_p11, %p636_p10 }
  0x24   : > { %p639_p1 = pnand %p638_p13, %p632_p5 }
  0x26   : > { %642 = shalt.err (!%p639_p1)
}
  0x27   : > { %s643_s29 = scalar_lea.vmem %s864_s7, 4096  ;;  %s758_s17 = smov [#allocation2]  }
  0x28   : > { %p644_p2 = scmp.ne.s32.totalorder %s864_s7, %s643_s29  ;;  %s648_s22 = sshll.u32 %s758_s17, 4  ;;  %s649_s22 = int_to_ptr.vmem [resolvable:$false] %s648_s22 }
  0x29   : > { %s650_s26 = scalar_lea.vmem %s649_s22, 8192  ;;  %p651_p9 = scmp.lt.s32.totalorder %s864_s7, %s649_s22 }
  0x2a   : > { %p646_p4 = pnand %p644_p2, %p630_p3  ;;  %p652_p6 = scmp.lt.s32.totalorder %s650_s26, %s643_s29 }
  0x2c   : > { %p647_p12 = pneg %p646_p4  ;;  %p653_p7 = por %p652_p6, %p651_p9 }
  0x2e   : > { %p654_p10 = pnand %p653_p7, %p647_p12 }
  0x30   : > { %657 = shalt.err (!%p654_p10)
}
  0x31   : > { %s759_s3 = smov 512   ;;  %s760_s23 = smov 256  }
  0x32   : > { %s761_s4 = smov 16   ;;  %p161_p1 = scmp.lt.s32.totalorder %s756_s16, 5 }
  0x33   : > { %548 = dma.hbm_to_vmem [thread:$0]  (!%p868_p0), %s875_s21, 4096, %s864_s7, %s878_s27, %s759_s3, %s760_s23, %s761_s4  }
  0x34   : > { %p1065_p3 = scmp.ge.s32.totalorder %s756_s16, 1 }
  0x36   : > { %p162_p5 = pnand %p1065_p3, %p161_p1 }
  0x37   : > { %s910_s5 = sand.u32 (!%p162_p5), 1, %s732_s10  }
  0x38   : > { %165 = sbr.rel (%p162_p5) target bundleno = 246 (0xf6), region = 28  ;;  %s528_s6 = sshll.u32 (!%p162_p5), %s910_s5, 8 }
  0x39   : > { %s168_s8 = scalar_lea.sflag (!%p162_p5), [#allocation3], %s910_s5  ;;  %s916_s29 = scalar_lea.vmem (!%p162_p5), [#allocation2], %s528_s6 }
  0x3f   : > { %719 = dma.done.wait (%p843_p8), %s168_s8, 4096  }
  0x40   : > { %721 = vsyncadd (%p843_p8), %s168_s8, 4294963200  ;;  %s530_s7 = sshll.u32 %s744_s13, 4  ;;  %v762_v0 = vmov 0   ;;  %v211_v17 = vld [vmem:[%s916_s29 + $0x20] sm:$0xff]  ;;  %v212_v18 = vld [vmem:[%s916_s29 + $0x28] sm:$0xff]  ;;  %s936_s24 = scalar_lea.vmem [#allocation5], %s528_s6 }
  0x41   : > { %627 = vset.pattern.permute.xlu1 %v762_v0  ;;  %626 = vset.pattern.permute.xlu0 %v762_v0  ;;  %p200_p9 = scmp.lt.s32.totalorder %s530_s7, 31  ;;  %v207_v19 = vld [vmem:[%s916_s29] sm:$0xff]  ;;  %v208_v20 = vld [vmem:[%s916_s29 + $0x8] sm:$0xff]  ;;  %v213_v27 = vld [vmem:[%s916_s29 + $0x30] sm:$0xff]  ;;  %s534_s22 = sshll.u32 %s740_s12, 1 }
  0x42   : > { %v214_v28 = vld [vmem:[%s916_s29 + $0x38] sm:$0xff]  ;;  %v209_v29 = vld [vmem:[%s916_s29 + $0x10] sm:$0xff]  ;;  %v215_v39 = vld [vmem:[%s916_s29 + $0x40] sm:$0xff]  ;;  %s540_s26 = sshll.u32 %s744_s13, 6  ;;  %s416_s13 = sshll.u32 %s936_s24, 4  ;;  %s998_s13 = int_to_ptr.vmem [resolvable:$true] %s416_s13 }
  0x43   : > { %s1082_s7 = smov (!%p200_p9, %s530_s7), 31  ;;  %v210_v30 = vld [vmem:[%s916_s29 + $0x18] sm:$0xff]  ;;  %v217_v37 = vld [vmem:[%s916_s29 + $0x50] sm:$0xff]  ;;  %v216_v40 = vld [vmem:[%s916_s29 + $0x48] sm:$0xff]  ;;  %s413_s3 = sadd.s32 %s540_s26, %s534_s22 }
  0x44   : > { %s531_s18 = sshll.u32 %s1082_s7, 3  ;;  %v218_v38 = vld [vmem:[%s916_s29 + $0x58] sm:$0xff]  ;;  %v221_v47 = vld [vmem:[%s916_s29 + $0x70] sm:$0xff]  ;;  %v219_v49 = vld [vmem:[%s916_s29 + $0x60] sm:$0xff]  ;;  %s536_s12 = sshll.u32 %s413_s3, 7 }
  0x45   : > { %s203_s17 = scalar_lea.vmem %s1057_s1, %s531_s18  ;;  %v222_v48 = vld [vmem:[%s916_s29 + $0x78] sm:$0xff]  ;;  %v220_v50 = vld [vmem:[%s916_s29 + $0x68] sm:$0xff]  ;;  %v225_v57 = vld [vmem:[%s916_s29 + $0x90] sm:$0xff]  ;;  %s996_s6 = scalar_lea.hbm %s1058_s2, %s536_s12 }
  0x46   : > { %v241_v1 = vld [vmem:[%s203_s17 + $0x10] sm:$0xff]  ;;  %v239_v2 = vld [vmem:[%s203_s17] sm:$0xff]  ;;  %v242_v3 = vld [vmem:[%s203_s17 + $0x18] sm:$0xff]  ;;  %s400_s8 = scalar_lea.sflag [#allocation4], %s910_s5  ;;  %p1066_p12 = scmp.ne.s32.totalorder %s1062_s25, 0 }
  0x47   : > { %267 = vperm.xlu1 %627, %v241_v1   ;;  %257 = vperm.xlu0 %626, %v239_v2   ;;  %v240_v4 = vld [vmem:[%s203_s17 + $0x8] sm:$0xff]  ;;  %v243_v6 = vld [vmem:[%s203_s17 + $0x20] sm:$0xff]  ;;  %v246_v7 = vld [vmem:[%s203_s17 + $0x38] sm:$0xff]  ;;  %s763_s7 = smov [#allocation5]  }
  0x48   : > { %v244_v5 = vld [vmem:[%s203_s17 + $0x28] sm:$0xff]  ;;  %v245_v8 = vld [vmem:[%s203_s17 + $0x30] sm:$0xff]  ;;  %v247_v10 = vld [vmem:[%s203_s17 + $0x40] sm:$0xff]  ;;  %s662_s18 = sshll.u32 %s763_s7, 4  ;;  %s663_s18 = int_to_ptr.vmem [resolvable:$false] %s662_s18 }
  0x49   : > { %v248_v9 = vld [vmem:[%s203_s17 + $0x48] sm:$0xff]  ;;  %v250_v11 = vld [vmem:[%s203_s17 + $0x58] sm:$0xff]  ;;  %v249_v12 = vld [vmem:[%s203_s17 + $0x50] sm:$0xff]  ;;  %s664_s21 = scalar_lea.vmem %s663_s18, 8192  ;;  %p665_p13 = scmp.lt.s32.totalorder %s998_s13, %s663_s18 }
  0x4a   : > { %v252_v13 = vld [vmem:[%s203_s17 + $0x68] sm:$0xff]  ;;  %v251_v14 = vld [vmem:[%s203_s17 + $0x60] sm:$0xff]  ;;  %v254_v15 = vld [vmem:[%s203_s17 + $0x78] sm:$0xff] }
  0x4b   : > { %272 = vperm.xlu1 %627, %v242_v3   ;;  %262 = vperm.xlu0 %626, %v240_v4   ;;  %v253_v16 = vld [vmem:[%s203_s17 + $0x70] sm:$0xff]  ;;  %v226_v58 = vld [vmem:[%s916_s29 + $0x98] sm:$0xff]  ;;  %v223_v59 = vld [vmem:[%s916_s29 + $0x80] sm:$0xff] }
  0x4c   : > { %v224_v60 = vld [vmem:[%s916_s29 + $0x88] sm:$0xff]  ;;  %v229_v3 = vld [vmem:[%s916_s29 + $0xb0] sm:$0xff]  ;;  %v230_v4 = vld [vmem:[%s916_s29 + $0xb8] sm:$0xff] }
  0x4f   : > { %282 = vperm.xlu1 %627, %v244_v5   ;;  %277 = vperm.xlu0 %626, %v243_v6   ;;  %v227_v5 = vld [vmem:[%s916_s29 + $0xa0] sm:$0xff]  ;;  %v228_v6 = vld [vmem:[%s916_s29 + $0xa8] sm:$0xff] }
  0x53   : > { %292 = vperm.xlu1 %627, %v246_v7   ;;  %287 = vperm.xlu0 %626, %v245_v8  }
  0x57   : > { %302 = vperm.xlu1 %627, %v248_v9   ;;  %297 = vperm.xlu0 %626, %v247_v10  }
  0x5b   : > { %312 = vperm.xlu1 %627, %v250_v11   ;;  %307 = vperm.xlu0 %626, %v249_v12  }
  0x5f   : > { %322 = vperm.xlu1 %627, %v252_v13   ;;  %317 = vperm.xlu0 %626, %v251_v14   ;;  %v233_v13 = vld [vmem:[%s916_s29 + $0xd0] sm:$0xff]  ;;  %v234_v14 = vld [vmem:[%s916_s29 + $0xd8] sm:$0xff] }
  0x63   : > { %332 = vperm.xlu1 %627, %v254_v15   ;;  %327 = vperm.xlu0 %626, %v253_v16   ;;  %v231_v15 = vld [vmem:[%s916_s29 + $0xc0] sm:$0xff]  ;;  %v232_v16 = vld [vmem:[%s916_s29 + $0xc8] sm:$0xff] }
  0xc6   : > { %v268_v21 = vpop.permute.xlu1 %267  ;;  %v258_v22 = vpop.permute.xlu0 %257 }
  0xc7   : > { %v339_v23 = vsub.f32 %v211_v17, %v268_v21  ;;  %v340_v24 = vsub.f32 %v212_v18, %v268_v21  ;;  %v335_v25 = vsub.f32 %v207_v19, %v258_v22  ;;  %v336_v26 = vsub.f32 %v208_v20, %v258_v22 }
  0xc9   : > { %371 = vst [vmem:[%s936_s24 + $0x20] sm:$0xff] %v339_v23  ;;  %372 = vst [vmem:[%s936_s24 + $0x28] sm:$0xff] %v340_v24  ;;  %v237_v23 = vld [vmem:[%s916_s29 + $0xf0] sm:$0xff]  ;;  %v238_v24 = vld [vmem:[%s916_s29 + $0xf8] sm:$0xff] }
  0xca   : > { %367 = vst [vmem:[%s936_s24] sm:$0xff] %v335_v25  ;;  %368 = vst [vmem:[%s936_s24 + $0x8] sm:$0xff] %v336_v26  ;;  %v273_v31 = vpop.permute.xlu1 %272  ;;  %v263_v32 = vpop.permute.xlu0 %262  ;;  %v235_v25 = vld [vmem:[%s916_s29 + $0xe0] sm:$0xff]  ;;  %v236_v26 = vld [vmem:[%s916_s29 + $0xe8] sm:$0xff]  ;;  %s658_s29 = scalar_lea.vmem %s998_s13, 4096 }
  0xcb   : > { %v341_v33 = vsub.f32 %v213_v27, %v273_v31  ;;  %v342_v34 = vsub.f32 %v214_v28, %v273_v31  ;;  %v337_v35 = vsub.f32 %v209_v29, %v263_v32  ;;  %v338_v36 = vsub.f32 %v210_v30, %v263_v32  ;;  %p659_p8 = scmp.ne.s32.totalorder %s998_s13, %s658_s29  ;;  %p666_p2 = scmp.lt.s32.totalorder %s664_s21, %s658_s29 }
  0xcd   : > { %373 = vst [vmem:[%s936_s24 + $0x30] sm:$0xff] %v341_v33  ;;  %374 = vst [vmem:[%s936_s24 + $0x38] sm:$0xff] %v342_v34  ;;  %p660_p0 = pnand %p659_p8, %p1066_p12  ;;  %p667_p4 = por %p666_p2, %p665_p13 }
  0xce   : > { %369 = vst [vmem:[%s936_s24 + $0x10] sm:$0xff] %v337_v35  ;;  %370 = vst [vmem:[%s936_s24 + $0x18] sm:$0xff] %v338_v36  ;;  %v283_v41 = vpop.permute.xlu1 %282  ;;  %v278_v42 = vpop.permute.xlu0 %277 }
  0xcf   : > { %v345_v43 = vsub.f32 %v217_v37, %v283_v41  ;;  %v346_v44 = vsub.f32 %v218_v38, %v283_v41  ;;  %v343_v45 = vsub.f32 %v215_v39, %v278_v42  ;;  %v344_v46 = vsub.f32 %v216_v40, %v278_v42  ;;  %p661_p11 = pneg %p660_p0 }
  0xd1   : > { %377 = vst [vmem:[%s936_s24 + $0x50] sm:$0xff] %v345_v43  ;;  %378 = vst [vmem:[%s936_s24 + $0x58] sm:$0xff] %v346_v44  ;;  %p668_p6 = pnand %p667_p4, %p661_p11 }
  0xd2   : > { %375 = vst [vmem:[%s936_s24 + $0x40] sm:$0xff] %v343_v45  ;;  %376 = vst [vmem:[%s936_s24 + $0x48] sm:$0xff] %v344_v46  ;;  %v293_v51 = vpop.permute.xlu1 %292  ;;  %v288_v52 = vpop.permute.xlu0 %287 }
  0xd3   : > { %v349_v53 = vsub.f32 %v221_v47, %v293_v51  ;;  %v350_v54 = vsub.f32 %v222_v48, %v293_v51  ;;  %v347_v55 = vsub.f32 %v219_v49, %v288_v52  ;;  %v348_v56 = vsub.f32 %v220_v50, %v288_v52 }
  0xd5   : > { %381 = vst [vmem:[%s936_s24 + $0x70] sm:$0xff] %v349_v53  ;;  %382 = vst [vmem:[%s936_s24 + $0x78] sm:$0xff] %v350_v54 }
  0xd6   : > { %379 = vst [vmem:[%s936_s24 + $0x60] sm:$0xff] %v347_v55  ;;  %380 = vst [vmem:[%s936_s24 + $0x68] sm:$0xff] %v348_v56  ;;  %v303_v61 = vpop.permute.xlu1 %302  ;;  %v298_v62 = vpop.permute.xlu0 %297 }
  0xd7   : > { %v353_v63 = vsub.f32 %v225_v57, %v303_v61  ;;  %v354_v0 = vsub.f32 %v226_v58, %v303_v61  ;;  %v351_v1 = vsub.f32 %v223_v59, %v298_v62  ;;  %v352_v2 = vsub.f32 %v224_v60, %v298_v62 }
  0xd9   : > { %385 = vst [vmem:[%s936_s24 + $0x90] sm:$0xff] %v353_v63  ;;  %386 = vst [vmem:[%s936_s24 + $0x98] sm:$0xff] %v354_v0 }
  0xda   : > { %383 = vst [vmem:[%s936_s24 + $0x80] sm:$0xff] %v351_v1  ;;  %384 = vst [vmem:[%s936_s24 + $0x88] sm:$0xff] %v352_v2  ;;  %v313_v7 = vpop.permute.xlu1 %312  ;;  %v308_v8 = vpop.permute.xlu0 %307 }
  0xdb   : > { %v357_v9 = vsub.f32 %v229_v3, %v313_v7  ;;  %v358_v10 = vsub.f32 %v230_v4, %v313_v7  ;;  %v355_v11 = vsub.f32 %v227_v5, %v308_v8  ;;  %v356_v12 = vsub.f32 %v228_v6, %v308_v8 }
  0xdd   : > { %389 = vst [vmem:[%s936_s24 + $0xb0] sm:$0xff] %v357_v9  ;;  %390 = vst [vmem:[%s936_s24 + $0xb8] sm:$0xff] %v358_v10 }
  0xde   : > { %387 = vst [vmem:[%s936_s24 + $0xa0] sm:$0xff] %v355_v11  ;;  %388 = vst [vmem:[%s936_s24 + $0xa8] sm:$0xff] %v356_v12  ;;  %v323_v17 = vpop.permute.xlu1 %322  ;;  %v318_v18 = vpop.permute.xlu0 %317 }
  0xdf   : > { %v361_v19 = vsub.f32 %v233_v13, %v323_v17  ;;  %v362_v20 = vsub.f32 %v234_v14, %v323_v17  ;;  %v359_v21 = vsub.f32 %v231_v15, %v318_v18  ;;  %v360_v22 = vsub.f32 %v232_v16, %v318_v18 }
  0xe1   : > { %393 = vst [vmem:[%s936_s24 + $0xd0] sm:$0xff] %v361_v19  ;;  %394 = vst [vmem:[%s936_s24 + $0xd8] sm:$0xff] %v362_v20 }
  0xe2   : > { %391 = vst [vmem:[%s936_s24 + $0xc0] sm:$0xff] %v359_v21  ;;  %392 = vst [vmem:[%s936_s24 + $0xc8] sm:$0xff] %v360_v22  ;;  %v333_v27 = vpop.permute.xlu1 %332  ;;  %v328_v28 = vpop.permute.xlu0 %327 }
  0xe3   : > { %v365_v29 = vsub.f32 %v237_v23, %v333_v27  ;;  %v366_v30 = vsub.f32 %v238_v24, %v333_v27  ;;  %v363_v31 = vsub.f32 %v235_v25, %v328_v28  ;;  %v364_v32 = vsub.f32 %v236_v26, %v328_v28 }
  0xe5   : > { %397 = vst [vmem:[%s936_s24 + $0xf0] sm:$0xff] %v365_v29  ;;  %398 = vst [vmem:[%s936_s24 + $0xf8] sm:$0xff] %v366_v30 }
  0xe6   : > { %395 = vst [vmem:[%s936_s24 + $0xe0] sm:$0xff] %v363_v31  ;;  %396 = vst [vmem:[%s936_s24 + $0xe8] sm:$0xff] %v364_v32 }
  0xe7   : > { %671 = shalt.err (!%p668_p6)
}
  0xe8   : > { %s672_s27 = scalar_lea.hbm %s996_s6, 4096  ;;  %s676_s22 = scalar_lea.hbm %s1058_s2, 16384 }
  0xe9   : > { %p673_p7 = scmp.ne.s32.totalorder %s996_s6, %s672_s27  ;;  %p677_p3 = scmp.lt.u32.totalorder %s996_s6, %s1058_s2 }
  0xea   : > { %p678_p5 = scmp.lt.u32.totalorder %s676_s22, %s672_s27  ;;  %p680_p8 = scmp.lt.u32.totalorder %s672_s27, %s996_s6 }
  0xeb   : > { %p674_p10 = pnand %p673_p7, %p1066_p12 }
  0xec   : > { %p679_p9 = por %p678_p5, %p677_p3 }
  0xed   : > { %p675_p1 = pneg %p674_p10 }
  0xee   : > { %p681_p0 = por %p680_p8, %p679_p9 }
  0xf0   : > { %p682_p11 = pnand %p681_p0, %p675_p1 }
  0xf2   : > { %685 = shalt.err (!%p682_p11)
}
  0xf3   : > { %s764_s12 = smov 256   ;;  %s765_s23 = smov 512  }
  0xf4   : > { %s766_s4 = smov 16  }
  0xf5   : > { %543 = dma.vmem_to_hbm [thread:$0]  (%p1066_p12), %s998_s13, 4096, %s996_s6, %s400_s8, %s764_s12, %s765_s23, %s766_s4  }
  0xf6 PF: > { %p554_p13 = scmp.ge.s32.totalorder %s756_s16, 2  ;;  %s431_s29 = sand.u32 1, %s728_s9  }
  0xf7   : > { %p1067_p2 = scmp.ne.s32.totalorder %s1063_s28, 0  ;;  %s432_s7 = scalar_lea.sflag [#allocation4], %s431_s29 }
  0xf9   : > { %p550_p4 = pnand %p554_p13, %p1067_p2 }
  0xfb   : > { %723 = dma.done.wait (!%p550_p4), %s432_s7, 4096  }
  0xfc   : > { %725 = vsyncadd (!%p550_p4), %s432_s7, 4294963200  ;;  %s18_s16 = sadd.s32 1, %s756_s16   ;;  %s1068_s9 = smov %s732_s10 }
  0xfd   : > { %p15_p6 = scmp.ge.s32.totalorder %s18_s16, 6   ;;  %s1069_s10 = smov %s736_s11 }
  0xfe   : > { %s1070_s11 = smov %s860_s30  ;;  %s1071_s12 = smov %s748_s14 }
  0xff   : > { %s1072_s13 = smov %s752_s15  ;;  %s1073_s14 = smov %s1076_s19 }
 0x100   : > { %s1074_s15 = smov %s1080_s20  ;;  %17 = sbr.rel (!%p15_p6) target bundleno = 7 (0x7), region = 76 }
 0x107   :  { %437 = vsyncpa [#allocation3], 1 }
 0x108   :  { %439 = vsyncpa [#allocation3 + $0x1], 1 }
 0x109   :  { %440 = vsyncpa [#allocation4], 1 }
 0x10a   :  { %442 = vsyncpa [#allocation4 + $0x1], 1 }

// kernel: _cbow_pallas.2
= control target key start
LH: loop header
LB: loop body
LE: loop exit
PB: predicated region body
PF: predicated region fallthrough
CT: control target
= control target key end

     0   :  { %s9768_s0 = inlined_call_operand.vmem [shape: s32[256,8], index: 0, kind: input, shape index: {}]   ;;  %s9769_s1 = inlined_call_operand.vmem [shape: f32[512,32], index: 1, kind: input, shape index: {}]   ;;  %s9770_s2 = inlined_call_operand.vmem [shape: f32[32,512], index: 2, kind: input, shape index: {}]   ;;  %s9771_s3 = inlined_call_operand.vmem [shape: f32[1,512], index: 3, kind: input, shape index: {}]   ;;  %s9772_s4 = inlined_call_operand.hbm [shape: f32[256,512], index: 4, kind: output, shape index: {0}]   ;;  %s9773_s5 = inlined_call_operand.vmem [shape: f32[256,1], index: 5, kind: output, shape index: {1}]  }
   0x1   :  { %9811 = sst [smem:[#allocation97_spill]] %s9770_s2 }
   0x2   :  { %11 = vsyncpa [#allocation7], 0 }
   0x3   :  { %13 = vsyncpa [#allocation7 + $0x1], 0  ;;  %s5434_s18 = smov 0   ;;  %s5436_s19 = smov 0  }
   0x4   :  { %s5438_s20 = smov 0   ;;  %s5440_s21 = smov 0  }
   0x5   :  { %s5442_s22 = smov 0   ;;  %s5444_s23 = smov 0  }
   0x6   :  { %s5446_s24 = smov 0   ;;  %s5448_s25 = smov 0  }
   0x7   :  { %s5450_s26 = smov 0   ;;  %s5452_s27 = smov 0  }
   0x8 LB: > { %9812 = sst [smem:[#allocation9_spill]] %s5366_s22  ;;  %s4171_s28 = sadd.s32 4294967295, %s5386_s27   ;;  %s5386_s27 = sphi %s5452_s27, %s19_s27   ;;  %s5382_s26 = sphi %s5450_s26, %s10081_s26   ;;  %s5378_s25 = sphi %s5448_s25, %s10080_s25   ;;  %s5374_s24 = sphi %s5446_s24, %s10079_s24   ;;  %s5370_s23 = sphi %s5444_s23, %s10078_s23   ;;  %s5366_s22 = sphi %s5442_s22, %s10077_s22   ;;  %s5362_s21 = sphi %s5440_s21, %s10076_s21   ;;  %s5358_s20 = sphi %s5438_s20, %s10084_s20   ;;  %s5354_s19 = sphi %s5436_s19, %s10083_s19   ;;  %s5350_s18 = sphi %s5434_s18, %s10082_s18  }
   0x9   : > { %9813 = sst [smem:[#allocation10_spill]] %s5378_s25  ;;  %s4172_s29 = sadd.s32 4294967294, %s5386_s27  }
   0xa   : > { %9814 = sst [smem:[#allocation11_spill]] %s5382_s26  ;;  %s28_s30 = sadd.s32 1, %s5378_s25 }
   0xb   : > { %s31_s6 = sadd.s32 1, %s5382_s26  ;;  %p29_p0 = scmp.ge.s32.totalorder %s28_s30, 2 }
   0xc   : > { %s85_s7 = sadd.s32 1, %s5366_s22  ;;  %p92_p1 = scmp.ne.s32.totalorder %s5366_s22, %s5362_s21 }
   0xd   : > { %p93_p2 = scmp.eq.s32.totalorder %s5386_s27, 0  ;;  %s10086_s30 = smov (%p29_p0, %s28_s30), 0 }
   0xe   : > { %9815 = sst [smem:[#allocation12_spill]] %s10086_s30  ;;  %s10088_s6 = smov (!%p29_p0, %s31_s6), %s5382_s26 }
   0xf   : > { %s82_s8 = ssub.s32 %s5378_s25, %s10086_s30  ;;  %p5497_p3 = por %p93_p2, %p92_p1 }
  0x10   : > { %p33_p4 = scmp.ge.s32.totalorder %s10088_s6, 2  ;;  %p83_p5 = scmp.eq.s32.totalorder %s82_s8, 0 }
  0x11   : > { %s139_s10 = sadd.s32 1, %s5358_s20  ;;  %p149_p6 = scmp.ne.s32.totalorder %s5358_s20, %s5354_s19 }
  0x12   : > { %s10090_s6 = smov (%p33_p4, %s10088_s6), 0  ;;  %p150_p7 = scmp.eq.s32.totalorder %s4171_s28, 3 }
  0x13   : > { %9817 = sst [smem:[#allocation13_spill]] %s10090_s6  ;;  %s134_s12 = ssub.s32 %s5382_s26, %s10090_s6 }
  0x14   : > { %s5507_s11 = scalar_select %p83_p5, %s5366_s22, %s85_s7  }
  0x15   : > { %s136_s13 = sor.u32 %s134_s12, %s82_s8  ;;  %p155_p8 = scmp.ne.s32.totalorder %s5354_s19, %s5350_s18 }
  0x16   : > { %9818 = sst [smem:[#allocation14_spill]] %s5507_s11  ;;  %p137_p9 = scmp.eq.s32.totalorder %s136_s13, 0 }
  0x17   : > { %p5513_p10 = por %p150_p7, %p149_p6  ;;  %p156_p11 = scmp.eq.s32.totalorder %s4172_s29, 3 }
  0x18   : > { %s5518_s15 = scalar_select %p137_p9, %s5358_s20, %s139_s10  }
  0x19   : > { %p5520_p12 = por %p156_p11, %p155_p8  ;;  %p4174_p13 = scmp.ge.s32.totalorder %s5386_s27, 4 }
  0x1b   : > { %201 = sbr.rel (%p4174_p13) target bundleno = 48 (0x30), region = 20 }
  0x22   : > { %213 = sbr.rel (!%p5497_p3) target bundleno = 48 (0x30), region = 28  ;;  %s215_s17 = sand.u32 (%p5497_p3), 1, %s5366_s22  }
  0x23   : > { %s4723_s28 = sshll.u32 (%p5497_p3), %s5378_s25, 4  ;;  %s4175_s7 = sshll.u32 (%p5497_p3), %s215_s17, 6 }
  0x24   : > { %s9821_s2 = sld [smem:[#allocation97_spill]] (%p5497_p3)  ;;  %s217_s10 = scalar_lea.vmem (%p5497_p3), [#allocation5], %s4175_s7 }
  0x2a   : > { %s220_s29 = scalar_lea.vmem %s9821_s2, %s4723_s28 }
  0x2b   : > { %v233_v0 = vld [vmem:[%s220_s29] sm:$0xff]  ;;  %v235_v1 = vld [vmem:[%s220_s29 + $0x8] sm:$0xff] }
  0x2c   : > { %v237_v2 = vld [vmem:[%s220_s29 + $0x20] sm:$0xff]  ;;  %234 = vst [vmem:[%s217_s10] sm:$0xff] %v233_v0  ;;  %236 = vst [vmem:[%s217_s10 + $0x8] sm:$0xff] %v235_v1  ;;  %v239_v3 = vld [vmem:[%s220_s29 + $0x28] sm:$0xff] }
  0x2d   : > { %238 = vst [vmem:[%s217_s10 + $0x10] sm:$0xff] %v237_v2  ;;  %v241_v4 = vld [vmem:[%s220_s29 + $0x40] sm:$0xff]  ;;  %v243_v5 = vld [vmem:[%s220_s29 + $0x48] sm:$0xff]  ;;  %240 = vst [vmem:[%s217_s10 + $0x18] sm:$0xff] %v239_v3 }
  0x2e   : > { %242 = vst [vmem:[%s217_s10 + $0x20] sm:$0xff] %v241_v4  ;;  %244 = vst [vmem:[%s217_s10 + $0x28] sm:$0xff] %v243_v5  ;;  %v245_v6 = vld [vmem:[%s220_s29 + $0x60] sm:$0xff]  ;;  %v247_v7 = vld [vmem:[%s220_s29 + $0x68] sm:$0xff] }
  0x2f   : > { %246 = vst [vmem:[%s217_s10 + $0x30] sm:$0xff] %v245_v6  ;;  %248 = vst [vmem:[%s217_s10 + $0x38] sm:$0xff] %v247_v7 }
  0x30 PF: > { %p4178_p0 = scmp.ge.s32.totalorder %s5386_s27, 1  ;;  %p261_p1 = scmp.lt.s32.totalorder %s5386_s27, 5 }
  0x32   : > { %p262_p2 = pnand %p4178_p0, %p261_p1 }
  0x34   : > { %265 = sbr.rel (%p262_p2) target bundleno = 1574 (0x626), region = 55 }
  0x3b   : > { %s268_s9 = sand.u32 1, %s5362_s21   ;;  %s9775_s13 = sand.u32 1, %s5354_s19  }
  0x3c   : > { %s4179_s17 = sshll.u32 %s268_s9, 6  ;;  %s4180_s28 = sshll.u32 %s9775_s13, 8 }
  0x3d   : > { %s4181_s7 = sshll.u32 %s5374_s24, 4  ;;  %s5540_s8 = sshll.u32 %s5370_s23, 1 }
  0x3e   : > { %p310_p3 = scmp.lt.s32.totalorder %s4181_s7, 31  ;;  %p317_p4 = scmp.lt.s32.totalorder %s5540_s8, 3 }
  0x3f   : > { %s5560_s11 = scalar_lea.vmem [#allocation5], %s4179_s17  ;;  %s5562_s22 = scalar_lea.vmem [#allocation6], %s4180_s28 }
  0x40   : > { %s10092_s7 = smov (!%p310_p3, %s4181_s7), 31  ;;  %p4186_p5 = scmp.ne.s32.totalorder %s5370_s23, 0 }
  0x41   : > { %s5544_s12 = scalar_select %p317_p4, %s5540_s8, 3 }
  0x42   : > { %s4182_s29 = sshll.u32 %s10092_s7, 3  ;;  %332 = sbr.rel (%p4186_p5) target bundleno = 812 (0x32c), region = 63 }
  0x43   : > { %s5549_s21 = scalar_lea.vmem %s9768_s0, %s4182_s29  ;;  %s319_s13 = scalar_lea.vmem %s9771_s3, %s5544_s12 }
  0x44   : > { %s5558_s25 = scalar_lea.vmem %s9773_s5, %s4182_s29 }
  0x49   : > { %v5566_v8 = vld [vmem:[%s5549_s21 + $0x10] sm:$0xff]  ;;  %v5569_v9 = vld [vmem:[%s5549_s21] sm:$0xff]  ;;  %v5388_v10 = vmov 0   ;;  %v5574_v11 = vld [vmem:[%s5549_s21 + $0x18] sm:$0xff]  ;;  %v5389_v25 = vmov 1   ;;  %v9784_v26 = vmov 2  }
  0x4a   : > { %5064 = vset.pattern.permute.xlu1 %v5388_v10  ;;  %5063 = vset.pattern.permute.xlu0 %v5388_v10  ;;  %v5577_v12 = vld [vmem:[%s5549_s21 + $0x8] sm:$0xff]  ;;  %v5585_v14 = vld [vmem:[%s5549_s21 + $0x20] sm:$0xff]  ;;  %v5590_v15 = vld [vmem:[%s5549_s21 + $0x38] sm:$0xff]  ;;  %v9780_v27 = vmov 5   ;;  %v9788_v28 = vmov 3   ;;  %v9782_v29 = vmov 6  }
  0x4b   : > { %361 = vperm.xlu1 %5064, %v5566_v8   ;;  %355 = vperm.xlu0 %5063, %v5569_v9   ;;  %v5582_v13 = vld [vmem:[%s5549_s21 + $0x28] sm:$0xff]  ;;  %v5593_v16 = vld [vmem:[%s5549_s21 + $0x30] sm:$0xff]  ;;  %v5601_v18 = vld [vmem:[%s5549_s21 + $0x40] sm:$0xff]  ;;  %v9786_v30 = vmov 7   ;;  %v9781_v48 = vmov 4  }
  0x4c   : > { %v5598_v17 = vld [vmem:[%s5549_s21 + $0x48] sm:$0xff]  ;;  %v5606_v19 = vld [vmem:[%s5549_s21 + $0x58] sm:$0xff]  ;;  %v5609_v20 = vld [vmem:[%s5549_s21 + $0x50] sm:$0xff] }
  0x4d   : > { %v5614_v21 = vld [vmem:[%s5549_s21 + $0x68] sm:$0xff]  ;;  %v5617_v22 = vld [vmem:[%s5549_s21 + $0x60] sm:$0xff]  ;;  %v353_v23 = vld [vmem:[%s5549_s21 + $0x78] sm:$0xff] }
  0x4e   : > { %v5623_v24 = vld [vmem:[%s5549_s21 + $0x70] sm:$0xff]  ;;  %v2802_v31 = vld [vmem:[%s9769_s1 + $0x80] sm:$0xff]  ;;  %v2803_v32 = vld [vmem:[%s9769_s1 + $0x88] sm:$0xff] }
  0x4f   : > { %364 = vperm.xlu1 %5064, %v5574_v11   ;;  %358 = vperm.xlu0 %5063, %v5577_v12   ;;  %v2834_v33 = vld [vmem:[%s9769_s1 + $0x180] sm:$0xff]  ;;  %v4885_v34 = vpack.c.bf16 %v2803_v32, %v2802_v31  ;;  %v2835_v35 = vld [vmem:[%s9769_s1 + $0x188] sm:$0xff]  ;;  %v2804_v42 = vld [vmem:[%s9769_s1 + $0x90] sm:$0xff] }
  0x50   : > { %v4917_v36 = vpack.c.bf16 %v2835_v35, %v2834_v33  ;;  %v2786_v37 = vld [vmem:[%s9769_s1] sm:$0xff]  ;;  %v2787_v38 = vld [vmem:[%s9769_s1 + $0x8] sm:$0xff]  ;;  %v2805_v43 = vld [vmem:[%s9769_s1 + $0x98] sm:$0xff] }
  0x51   : > { %v2818_v39 = vld [vmem:[%s9769_s1 + $0x100] sm:$0xff]  ;;  %4886 = vmatprep.subr.bf16.mxu0 %v4885_v34  ;;  %v4887_v40 = vpack.c.bf16 %v2787_v38, %v2786_v37  ;;  %v2819_v41 = vld [vmem:[%s9769_s1 + $0x108] sm:$0xff]  ;;  %v4889_v45 = vpack.c.bf16 %v2805_v43, %v2804_v42  ;;  %v2836_v46 = vld [vmem:[%s9769_s1 + $0x190] sm:$0xff] }
  0x52   : > { %4918 = vmatprep.subr.bf16.mxu1 %v4917_v36  ;;  %v4919_v44 = vpack.c.bf16 %v2819_v41, %v2818_v39  ;;  %v2837_v47 = vld [vmem:[%s9769_s1 + $0x198] sm:$0xff]  ;;  %v2788_v50 = vld [vmem:[%s9769_s1 + $0x10] sm:$0xff]  ;;  %v2806_v54 = vld [vmem:[%s9769_s1 + $0xa0] sm:$0xff] }
  0x53   : > { %370 = vperm.xlu1 %5064, %v5582_v13   ;;  %367 = vperm.xlu0 %5063, %v5585_v14   ;;  %v4921_v49 = vpack.c.bf16 %v2837_v47, %v2836_v46  ;;  %v2789_v51 = vld [vmem:[%s9769_s1 + $0x18] sm:$0xff]  ;;  %v2820_v52 = vld [vmem:[%s9769_s1 + $0x110] sm:$0xff]  ;;  %v2807_v55 = vld [vmem:[%s9769_s1 + $0xa8] sm:$0xff] }
  0x54   : > { %4888 = vmatpush3.bf16.msra.mxu0 %v4887_v40  ;;  %v2821_v53 = vld [vmem:[%s9769_s1 + $0x118] sm:$0xff]  ;;  %4920 = vmatpush3.bf16.msra.mxu1 %v4919_v44  ;;  %v4891_v56 = vpack.c.bf16 %v2789_v51, %v2788_v50  ;;  %v2838_v58 = vld [vmem:[%s9769_s1 + $0x1a0] sm:$0xff]  ;;  %v2839_v59 = vld [vmem:[%s9769_s1 + $0x1a8] sm:$0xff]  ;;  %v4893_v60 = vpack.c.bf16 %v2807_v55, %v2806_v54 }
  0x55   : > { %4890 = vmatprep.subr.bf16.mxu0 %v4889_v45  ;;  %v4923_v57 = vpack.c.bf16 %v2821_v53, %v2820_v52  ;;  %4922 = vmatprep.subr.bf16.mxu1 %v4921_v49  ;;  %v4925_v61 = vpack.c.bf16 %v2839_v59, %v2838_v58  ;;  %v2790_v62 = vld [vmem:[%s9769_s1 + $0x20] sm:$0xff]  ;;  %v2791_v63 = vld [vmem:[%s9769_s1 + $0x28] sm:$0xff]  ;;  %v2808_v3 = vld [vmem:[%s9769_s1 + $0xb0] sm:$0xff] }
  0x56   : > { %v2822_v0 = vld [vmem:[%s9769_s1 + $0x120] sm:$0xff]  ;;  %v2823_v1 = vld [vmem:[%s9769_s1 + $0x128] sm:$0xff]  ;;  %v4895_v2 = vpack.c.bf16 %v2791_v63, %v2790_v62  ;;  %v2809_v4 = vld [vmem:[%s9769_s1 + $0xb8] sm:$0xff] }
  0x57   : > { %376 = vperm.xlu1 %5064, %v5590_v15   ;;  %373 = vperm.xlu0 %5063, %v5593_v16   ;;  %v2840_v5 = vld [vmem:[%s9769_s1 + $0x1b0] sm:$0xff]  ;;  %v4927_v6 = vpack.c.bf16 %v2823_v1, %v2822_v0  ;;  %v4897_v7 = vpack.c.bf16 %v2809_v4, %v2808_v3  ;;  %v2825_v32 = vld [vmem:[%s9769_s1 + $0x138] sm:$0xff]  ;;  %v2810_v34 = vld [vmem:[%s9769_s1 + $0xc0] sm:$0xff] }
  0x58   : > { %4892 = vmatpush3.bf16.msra.mxu0 %v4891_v56  ;;  %4924 = vmatpush3.bf16.msra.mxu1 %v4923_v57  ;;  %v2792_v10 = vld [vmem:[%s9769_s1 + $0x30] sm:$0xff]  ;;  %v2811_v35 = vld [vmem:[%s9769_s1 + $0xc8] sm:$0xff]  ;;  %v2842_v36 = vld [vmem:[%s9769_s1 + $0x1c0] sm:$0xff] }
  0x59   : > { %4894 = vmatprep.subr.bf16.mxu0 %v4893_v60  ;;  %4926 = vmatprep.subr.bf16.mxu1 %v4925_v61  ;;  %v2824_v31 = vld [vmem:[%s9769_s1 + $0x130] sm:$0xff]  ;;  %v2794_v38 = vld [vmem:[%s9769_s1 + $0x40] sm:$0xff]  ;;  %v2795_v39 = vld [vmem:[%s9769_s1 + $0x48] sm:$0xff]  ;;  %v4901_v40 = vpack.c.bf16 %v2811_v35, %v2810_v34 }
  0x5a   : > { %v4931_v37 = vpack.c.bf16 %v2825_v32, %v2824_v31  ;;  %v2826_v42 = vld [vmem:[%s9769_s1 + $0x140] sm:$0xff]  ;;  %v2827_v43 = vld [vmem:[%s9769_s1 + $0x148] sm:$0xff]  ;;  %v2812_v44 = vld [vmem:[%s9769_s1 + $0xd0] sm:$0xff]  ;;  %v4903_v46 = vpack.c.bf16 %v2795_v39, %v2794_v38 }
  0x5b   : > { %382 = vperm.xlu1 %5064, %v5598_v17   ;;  %379 = vperm.xlu0 %5063, %v5601_v18   ;;  %v2813_v45 = vld [vmem:[%s9769_s1 + $0xd8] sm:$0xff]  ;;  %v2844_v47 = vld [vmem:[%s9769_s1 + $0x1d0] sm:$0xff]  ;;  %v4935_v50 = vpack.c.bf16 %v2827_v43, %v2826_v42  ;;  %v2814_v56 = vld [vmem:[%s9769_s1 + $0xe0] sm:$0xff] }
  0x5c   : > { %4896 = vmatpush3.bf16.msra.mxu0 %v4895_v2  ;;  %4928 = vmatpush3.bf16.msra.mxu1 %v4927_v6  ;;  %v2845_v49 = vld [vmem:[%s9769_s1 + $0x1d8] sm:$0xff]  ;;  %v2796_v51 = vld [vmem:[%s9769_s1 + $0x50] sm:$0xff]  ;;  %v4905_v54 = vpack.c.bf16 %v2813_v45, %v2812_v44  ;;  %v2815_v57 = vld [vmem:[%s9769_s1 + $0xe8] sm:$0xff] }
  0x5d   : > { %4898 = vmatprep.subr.bf16.mxu0 %v4897_v7  ;;  %v2797_v52 = vld [vmem:[%s9769_s1 + $0x58] sm:$0xff]  ;;  %v2828_v53 = vld [vmem:[%s9769_s1 + $0x150] sm:$0xff]  ;;  %v4937_v58 = vpack.c.bf16 %v2845_v49, %v2844_v47  ;;  %v2846_v59 = vld [vmem:[%s9769_s1 + $0x1e0] sm:$0xff]  ;;  %v4909_v63 = vpack.c.bf16 %v2815_v57, %v2814_v56 }
  0x5e   : > { %v2829_v55 = vld [vmem:[%s9769_s1 + $0x158] sm:$0xff]  ;;  %v2847_v60 = vld [vmem:[%s9769_s1 + $0x1e8] sm:$0xff]  ;;  %v4907_v61 = vpack.c.bf16 %v2797_v52, %v2796_v51  ;;  %v2798_v0 = vld [vmem:[%s9769_s1 + $0x60] sm:$0xff] }
  0x5f   : > { %388 = vperm.xlu1 %5064, %v5606_v19   ;;  %385 = vperm.xlu0 %5063, %v5609_v20   ;;  %v4939_v62 = vpack.c.bf16 %v2829_v55, %v2828_v53  ;;  %v2799_v1 = vld [vmem:[%s9769_s1 + $0x68] sm:$0xff]  ;;  %v2830_v2 = vld [vmem:[%s9769_s1 + $0x160] sm:$0xff]  ;;  %v4941_v3 = vpack.c.bf16 %v2847_v60, %v2846_v59  ;;  %v2817_v6 = vld [vmem:[%s9769_s1 + $0xf8] sm:$0xff] }
  0x60   : > { %v2831_v4 = vld [vmem:[%s9769_s1 + $0x168] sm:$0xff]  ;;  %v2849_v7 = vld [vmem:[%s9769_s1 + $0x1f8] sm:$0xff]  ;;  %v2800_v31 = vld [vmem:[%s9769_s1 + $0x70] sm:$0xff] }
  0x61   : > { %v2801_v32 = vld [vmem:[%s9769_s1 + $0x78] sm:$0xff]  ;;  %v2832_v35 = vld [vmem:[%s9769_s1 + $0x170] sm:$0xff] }
  0x63   : > { %394 = vperm.xlu1 %5064, %v5614_v21   ;;  %391 = vperm.xlu0 %5063, %v5617_v22  }
  0x67   : > { %400 = vperm.xlu1 %5064, %v353_v23   ;;  %397 = vperm.xlu0 %5063, %v5623_v24  }
  0x6b   : > { %5066 = vset.pattern.permute.xlu1 %v5389_v25  ;;  %5065 = vset.pattern.permute.xlu0 %v5389_v25 }
  0x6c   : > { %662 = vperm.xlu1 %5066, %v5577_v12   ;;  %659 = vperm.xlu0 %5065, %v5569_v9  }
  0x70   : > { %665 = vperm.xlu1 %5066, %v5566_v8   ;;  %668 = vperm.xlu0 %5065, %v5574_v11  }
  0x74   : > { %671 = vperm.xlu1 %5066, %v5585_v14   ;;  %674 = vperm.xlu0 %5065, %v5582_v13  }
  0x78   : > { %677 = vperm.xlu1 %5066, %v5593_v16   ;;  %680 = vperm.xlu0 %5065, %v5590_v15  }
  0x7c   : > { %683 = vperm.xlu1 %5066, %v5601_v18   ;;  %686 = vperm.xlu0 %5065, %v5598_v17  }
  0x80   : > { %689 = vperm.xlu1 %5066, %v5609_v20   ;;  %692 = vperm.xlu0 %5065, %v5606_v19  }
  0x84   : > { %695 = vperm.xlu1 %5066, %v5617_v22   ;;  %698 = vperm.xlu0 %5065, %v5614_v21  }
  0x88   : > { %701 = vperm.xlu1 %5066, %v5623_v24   ;;  %704 = vperm.xlu0 %5065, %v353_v23   ;;  %v2793_v23 = vld [vmem:[%s9769_s1 + $0x38] sm:$0xff] }
  0x89   : > { %v4899_v33 = vpack.c.bf16 %v2793_v23, %v2792_v10  ;;  %v4943_v10 = vpack.c.bf16 %v2831_v4, %v2830_v2 }
  0x8b   : > { %4900 = vmatpush3.bf16.msra.mxu0 %v4899_v33 }
  0x8c   : > { %5067 = vset.pattern.permute.xlu1 %v9784_v26  ;;  %5068 = vset.pattern.permute.xlu0 %v9784_v26 }
  0x8d   : > { %963 = vperm.xlu1 %5067, %v5569_v9   ;;  %966 = vperm.xlu0 %5068, %v5577_v12  }
  0x8e   : > { %4902 = vmatprep.subr.bf16.mxu0 %v4901_v40  ;;  %v333_v40 = vlaneseq }
  0x8f   : > { %4904 = vmatpush3.bf16.msra.mxu0 %v4903_v46 }
  0x90   : > { %4906 = vmatprep.subr.bf16.mxu0 %v4905_v54  ;;  %v5892_v43 = vand.u32 127, %v333_v40  ;;  %v9791_v54 = vmov 0.0  }
  0x91   : > { %969 = vperm.xlu1 %5067, %v5566_v8   ;;  %975 = vperm.xlu0 %5068, %v5585_v14  }
  0x92   : > { %v5902_v46 = vadd.s32 128, %v5892_v43  ;;  %v5905_v47 = vadd.s32 256, %v5892_v43  ;;  %v5908_v49 = vadd.s32 384, %v5892_v43 }
  0x93   : > { %4908 = vmatpush3.bf16.msra.mxu0 %v4907_v61 }
  0x94   : > { %4910 = vmatprep.subr.bf16.mxu0 %v4909_v63 }
  0x95   : > { %972 = vperm.xlu1 %5067, %v5574_v11   ;;  %981 = vperm.xlu0 %5068, %v5593_v16  }
  0x99   : > { %978 = vperm.xlu1 %5067, %v5582_v13   ;;  %5076 = vset.pattern.permute.xlu0 %v9780_v27 }
  0x9a   : > { %1881 = vperm.xlu0 %5076, %v5566_v8  }
  0x9d   : > { %5069 = vset.pattern.permute.xlu1 %v9788_v28 }
  0x9e   : > { %1267 = vperm.xlu1 %5069, %v5569_v9   ;;  %5079 = vset.pattern.permute.xlu0 %v9782_v29 }
  0x9f   : > { %2185 = vperm.xlu0 %5079, %v5566_v8  }
  0xa2   : > { %1270 = vperm.xlu1 %5069, %v5577_v12  }
  0xa3   : > { %5082 = vset.pattern.permute.xlu0 %v9786_v30 }
  0xa4   : > { %2489 = vperm.xlu0 %5082, %v5566_v8  }
  0xa6   : > { %5070 = vset.pattern.permute.xlu1 %v9780_v27 }
  0xa7   : > { %1875 = vperm.xlu1 %5070, %v5569_v9  }
  0xa8   : > { %5083 = vset.pattern.permute.xlu0 %v9788_v28 }
  0xa9   : > { %1273 = vperm.xlu0 %5083, %v5566_v8  }
  0xab   : > { %5071 = vset.pattern.permute.xlu1 %v9782_v29 }
  0xac   : > { %2179 = vperm.xlu1 %5071, %v5569_v9  }
  0xad   : > { %1282 = vperm.xlu0 %5083, %v5582_v13  }
  0xb0   : > { %5072 = vset.pattern.permute.xlu1 %v9780_v27 }
  0xb1   : > { %1878 = vperm.xlu1 %5072, %v5577_v12   ;;  %5086 = vset.pattern.permute.xlu0 %v9781_v48 }
  0xb2   : > { %1571 = vperm.xlu0 %5086, %v5569_v9  }
  0xb5   : > { %5073 = vset.pattern.permute.xlu1 %v9786_v30 }
  0xb6   : > { %2483 = vperm.xlu1 %5073, %v5569_v9   ;;  %1574 = vperm.xlu0 %5086, %v5577_v12   ;;  %v2841_v9 = vld [vmem:[%s9769_s1 + $0x1b8] sm:$0xff] }
  0xb7   : > { %v4929_v25 = vpack.c.bf16 %v2841_v9, %v2840_v5  ;;  %v2816_v5 = vld [vmem:[%s9769_s1 + $0xf0] sm:$0xff]  ;;  %v4911_v9 = vpack.c.bf16 %v2799_v1, %v2798_v0 }
  0xb8   : > { %v4913_v23 = vpack.c.bf16 %v2817_v6, %v2816_v5 }
  0xb9   : > { %4930 = vmatprep.subr.bf16.mxu1 %v4929_v25  ;;  %4912 = vmatpush3.bf16.msra.mxu0 %v4911_v9 }
  0xba   : > { %5074 = vset.pattern.permute.xlu1 %v9782_v29  ;;  %1577 = vperm.xlu0 %5086, %v5566_v8   ;;  %v2843_v8 = vld [vmem:[%s9769_s1 + $0x1c8] sm:$0xff] }
  0xbb   : > { %2182 = vperm.xlu1 %5074, %v5577_v12   ;;  %v4933_v41 = vpack.c.bf16 %v2843_v8, %v2842_v36  ;;  %4932 = vmatpush3.bf16.msra.mxu1 %v4931_v37  ;;  %v2833_v36 = vld [vmem:[%s9769_s1 + $0x178] sm:$0xff]  ;;  %v4915_v37 = vpack.c.bf16 %v2801_v32, %v2800_v31 }
  0xbc   : > { %4914 = vmatprep.subr.bf16.mxu0 %v4913_v23  ;;  %v4947_v8 = vpack.c.bf16 %v2833_v36, %v2832_v35 }
  0xbd   : > { %4934 = vmatprep.subr.bf16.mxu1 %v4933_v41  ;;  %4916 = vmatpush3.bf16.msra.mxu0 %v4915_v37 }
  0xbe   : > { %1586 = vperm.xlu0 %5086, %v5582_v13  }
  0xbf   : > { %5075 = vset.pattern.permute.xlu1 %v9788_v28  ;;  %4936 = vmatpush3.bf16.msra.mxu1 %v4935_v50 }
  0xc0   : > { %1276 = vperm.xlu1 %5075, %v5574_v11   ;;  %4938 = vmatprep.subr.bf16.mxu1 %v4937_v58 }
  0xc2   : > { %1589 = vperm.xlu0 %5086, %v5593_v16  }
  0xc3   : > { %4940 = vmatpush3.bf16.msra.mxu1 %v4939_v62 }
  0xc4   : > { %5077 = vset.pattern.permute.xlu1 %v9786_v30  ;;  %4942 = vmatprep.subr.bf16.mxu1 %v4941_v3 }
  0xc5   : > { %2486 = vperm.xlu1 %5077, %v5577_v12   ;;  %v2848_v12 = vld [vmem:[%s9769_s1 + $0x1f0] sm:$0xff] }
  0xc6   : > { %1592 = vperm.xlu0 %5086, %v5590_v15   ;;  %v4945_v25 = vpack.c.bf16 %v2849_v7, %v2848_v12 }
  0xc7   : > { %4944 = vmatpush3.bf16.msra.mxu1 %v4943_v10 }
  0xc8   : > { %4946 = vmatprep.subr.bf16.mxu1 %v4945_v25 }
  0xc9   : > { %5078 = vset.pattern.permute.xlu1 %v9781_v48 }
  0xca   : > { %v362_v33 = vpop.permute.xlu1 %361  ;;  %1580 = vperm.xlu1 %5078, %v5574_v11   ;;  %1595 = vperm.xlu0 %5086, %v5601_v18   ;;  %v5872_v34 = vpop.permute.xlu0 %355 }
  0xcb   : > { %4948 = vmatpush3.bf16.msra.mxu1 %v4947_v8  ;;  %vm410_vm0 = vcmp.eq.s32.totalorder %v5892_v43, %v362_v33  ;;  %vm411_vm1 = vcmp.eq.s32.totalorder %v5902_v46, %v362_v33  ;;  %vm412_vm2 = vcmp.eq.s32.totalorder %v5905_v47, %v362_v33  ;;  %vm413_vm3 = vcmp.eq.s32.totalorder %v5908_v49, %v362_v33 }
  0xcc   : > { %vm402_vm4 = vcmp.eq.s32.totalorder %v5892_v43, %v5872_v34  ;;  %v5929_v55 = vsel %vm410_vm0, 1.0, %v9791_v54  ;;  %vm403_vm5 = vcmp.eq.s32.totalorder %v5902_v46, %v5872_v34  ;;  %vm404_vm6 = vcmp.eq.s32.totalorder %v5905_v47, %v5872_v34 }
  0xcd   : > { %vm405_vm7 = vcmp.eq.s32.totalorder %v5908_v49, %v5872_v34  ;;  %v5938_v56 = vsel %vm411_vm1, 1.0, %v9791_v54  ;;  %v5941_v57 = vsel %vm412_vm2, 1.0, %v9791_v54  ;;  %v5944_v58 = vsel %vm413_vm3, 1.0, %v9791_v54 }
  0xce   : > { %v5880_v38 = vpop.permute.xlu1 %364  ;;  %5080 = vset.pattern.permute.xlu1 %v9788_v28  ;;  %1598 = vperm.xlu0 %5086, %v5598_v17   ;;  %v359_v39 = vpop.permute.xlu0 %358  ;;  %v5948_v59 = vsel %vm402_vm4, 1.0, %v9791_v54  ;;  %v5960_v62 = vsel %vm403_vm5, 1.0, %v9791_v54  ;;  %v5963_v63 = vsel %vm404_vm6, 1.0, %v9791_v54  ;;  %v5966_v0 = vsel %vm405_vm7, 1.0, %v9791_v54 }
  0xcf   : > { %1279 = vperm.xlu1 %5080, %v5585_v14   ;;  %vm406_vm8 = vcmp.eq.s32.totalorder %v5892_v43, %v359_v39  ;;  %vm407_vm9 = vcmp.eq.s32.totalorder %v5902_v46, %v359_v39  ;;  %vm408_vm10 = vcmp.eq.s32.totalorder %v5905_v47, %v359_v39  ;;  %vm409_vm11 = vcmp.eq.s32.totalorder %v5908_v49, %v359_v39 }
  0xd0   : > { %vm414_vm12 = vcmp.eq.s32.totalorder %v5892_v43, %v5880_v38  ;;  %vm415_vm13 = vcmp.eq.s32.totalorder %v5902_v46, %v5880_v38  ;;  %vm416_vm14 = vcmp.eq.s32.totalorder %v5905_v47, %v5880_v38  ;;  %vm417_vm15 = vcmp.eq.s32.totalorder %v5908_v49, %v5880_v38 }
  0xd1   : > { %v5980_v1 = vsel %vm406_vm8, 1.0, %v9791_v54  ;;  %v5985_v2 = vsel %vm407_vm9, 1.0, %v9791_v54  ;;  %v5990_v3 = vsel %vm408_vm10, 1.0, %v9791_v54  ;;  %v5995_v4 = vsel %vm409_vm11, 1.0, %v9791_v54 }
  0xd2   : > { %v5885_v41 = vpop.permute.xlu1 %370  ;;  %1601 = vperm.xlu0 %5086, %v5609_v20   ;;  %v5888_v42 = vpop.permute.xlu0 %367  ;;  %9822 = vst [vmem:[#allocation15_spill] sm:$0xff] %v5980_v1  ;;  %9823 = vst [vmem:[#allocation16_spill] sm:$0xff] %v5985_v2  ;;  %v6014_v12 = vsel %vm414_vm12, 1.0, %v9791_v54  ;;  %v6023_v7 = vsel %vm415_vm13, 1.0, %v9791_v54  ;;  %v6029_v9 = vsel %vm416_vm14, 1.0, %v9791_v54  ;;  %v6035_v10 = vsel %vm417_vm15, 1.0, %v9791_v54 }
  0xd3   : > { %5081 = vset.pattern.permute.xlu1 %v9780_v27  ;;  %9824 = vst [vmem:[#allocation17_spill] sm:$0xff] %v5990_v3  ;;  %9825 = vst [vmem:[#allocation18_spill] sm:$0xff] %v5995_v4  ;;  %vm418_vm0 = vcmp.eq.s32.totalorder %v5892_v43, %v5888_v42  ;;  %vm419_vm1 = vcmp.eq.s32.totalorder %v5902_v46, %v5888_v42  ;;  %vm420_vm2 = vcmp.eq.s32.totalorder %v5905_v47, %v5888_v42 }
  0xd4   : > { %1884 = vperm.xlu1 %5081, %v5574_v11   ;;  %vm421_vm3 = vcmp.eq.s32.totalorder %v5908_v49, %v5888_v42  ;;  %vm422_vm4 = vcmp.eq.s32.totalorder %v5892_v43, %v5885_v41  ;;  %vm423_vm5 = vcmp.eq.s32.totalorder %v5902_v46, %v5885_v41  ;;  %vm424_vm6 = vcmp.eq.s32.totalorder %v5905_v47, %v5885_v41 }
  0xd5   : > { %vm425_vm7 = vcmp.eq.s32.totalorder %v5908_v49, %v5885_v41  ;;  %v6047_v23 = vsel %vm418_vm0, 1.0, %v9791_v54  ;;  %v6054_v25 = vsel %vm419_vm1, 1.0, %v9791_v54  ;;  %v6060_v31 = vsel %vm420_vm2, 1.0, %v9791_v54 }
  0xd6   : > { %v5894_v44 = vpop.permute.xlu1 %376  ;;  %1604 = vperm.xlu0 %5086, %v5606_v19   ;;  %v5897_v45 = vpop.permute.xlu0 %373  ;;  %9827 = vst [vmem:[#allocation20_spill] sm:$0xff] %v6054_v25  ;;  %9828 = vst [vmem:[#allocation21_spill] sm:$0xff] %v6060_v31  ;;  %v6066_v32 = vsel %vm421_vm3, 1.0, %v9791_v54  ;;  %v6095_v35 = vsel %vm423_vm5, 1.0, %v9791_v54  ;;  %v6101_v36 = vsel %vm424_vm6, 1.0, %v9791_v54  ;;  %v6114_v8 = vsel %vm425_vm7, 1.0, %v9791_v54 }
  0xd7   : > { %9829 = vst [vmem:[#allocation22_spill] sm:$0xff] %v6066_v32  ;;  %vm426_vm8 = vcmp.eq.s32.totalorder %v5892_v43, %v5897_v45  ;;  %vm430_vm9 = vcmp.eq.s32.totalorder %v5892_v43, %v5894_v44  ;;  %vm427_vm10 = vcmp.eq.s32.totalorder %v5902_v46, %v5897_v45  ;;  %vm428_vm11 = vcmp.eq.s32.totalorder %v5905_v47, %v5897_v45 }
  0xd8   : > { %5084 = vset.pattern.permute.xlu1 %v9781_v48  ;;  %vm429_vm12 = vcmp.eq.s32.totalorder %v5908_v49, %v5897_v45  ;;  %vm431_vm13 = vcmp.eq.s32.totalorder %v5902_v46, %v5894_v44  ;;  %vm432_vm14 = vcmp.eq.s32.totalorder %v5905_v47, %v5894_v44  ;;  %vm433_vm15 = vcmp.eq.s32.totalorder %v5908_v49, %v5894_v44 }
  0xd9   : > { %1583 = vperm.xlu1 %5084, %v5585_v14   ;;  %v6108_v37 = vsel %vm426_vm8, 1.0, %v9791_v54  ;;  %v6118_v38 = vsel %vm427_vm10, 1.0, %v9791_v54  ;;  %v6121_v39 = vsel %vm428_vm11, 1.0, %v9791_v54  ;;  %v6124_v40 = vsel %vm429_vm12, 1.0, %v9791_v54 }
  0xda   : > { %v5910_v50 = vpop.permute.xlu1 %382  ;;  %1607 = vperm.xlu0 %5086, %v5617_v22   ;;  %v5913_v51 = vpop.permute.xlu0 %379  ;;  %9830 = vst [vmem:[#allocation23_spill] sm:$0xff] %v6108_v37  ;;  %9831 = vst [vmem:[#allocation24_spill] sm:$0xff] %v6118_v38  ;;  %v6131_v41 = vsel %vm430_vm9, 1.0, %v9791_v54  ;;  %v6144_v42 = vsel %vm431_vm13, 1.0, %v9791_v54  ;;  %v9857_v37 = vmov 2  }
  0xdb   : > { %9832 = vst [vmem:[#allocation25_spill] sm:$0xff] %v6121_v39  ;;  %9833 = vst [vmem:[#allocation26_spill] sm:$0xff] %v6124_v40  ;;  %vm434_vm0 = vcmp.eq.s32.totalorder %v5892_v43, %v5913_v51  ;;  %vm435_vm1 = vcmp.eq.s32.totalorder %v5902_v46, %v5913_v51  ;;  %vm436_vm3 = vcmp.eq.s32.totalorder %v5905_v47, %v5913_v51 }
  0xdc   : > { %vm438_vm5 = vcmp.eq.s32.totalorder %v5892_v43, %v5910_v50  ;;  %vm439_vm6 = vcmp.eq.s32.totalorder %v5902_v46, %v5910_v50  ;;  %vm440_vm7 = vcmp.eq.s32.totalorder %v5905_v47, %v5910_v50  ;;  %vm441_vm8 = vcmp.eq.s32.totalorder %v5908_v49, %v5910_v50 }
  0xdd   : > { %5085 = vset.pattern.permute.xlu1 %v9782_v29  ;;  %v6189_v44 = vsel %vm435_vm1, 1.0, %v9791_v54 }
  0xde   : > { %v5920_v52 = vpop.permute.xlu1 %388  ;;  %2188 = vperm.xlu1 %5085, %v5574_v11   ;;  %1610 = vperm.xlu0 %5086, %v5614_v21   ;;  %v5924_v53 = vpop.permute.xlu0 %385  ;;  %9836 = vst [vmem:[#allocation29_spill] sm:$0xff] %v6189_v44 }
  0xdf   : > { %vm442_vm9 = vcmp.eq.s32.totalorder %v5892_v43, %v5924_v53  ;;  %vm443_vm10 = vcmp.eq.s32.totalorder %v5902_v46, %v5924_v53  ;;  %vm446_vm11 = vcmp.eq.s32.totalorder %v5892_v43, %v5920_v52  ;;  %vm447_vm12 = vcmp.eq.s32.totalorder %v5902_v46, %v5920_v52 }
  0xe0   : > { %vm444_vm13 = vcmp.eq.s32.totalorder %v5905_v47, %v5924_v53 }
  0xe2   : > { %v5953_v60 = vpop.permute.xlu1 %394  ;;  %5087 = vset.pattern.permute.xlu1 %v9780_v27  ;;  %1613 = vperm.xlu0 %5086, %v5623_v24   ;;  %v5957_v61 = vpop.permute.xlu0 %391 }
  0xe3   : > { %1887 = vperm.xlu1 %5087, %v5585_v14   ;;  %vm454_vm1 = vcmp.eq.s32.totalorder %v5892_v43, %v5953_v60 }
  0xe6   : > { %v6005_v5 = vpop.permute.xlu1 %400  ;;  %5125 = vset.pattern.permute.xlu0 %v9780_v27  ;;  %v6008_v6 = vpop.permute.xlu0 %397 }
  0xe7   : > { %9826 = vst [vmem:[#allocation19_spill] sm:$0xff] %v6005_v5  ;;  %5088 = vset.pattern.permute.xlu1 %v9786_v30  ;;  %1890 = vperm.xlu0 %5125, %v5582_v13   ;;  %v6172_v30 = vsel %vm433_vm15, 1.0, %v9791_v54  ;;  %v9839_v5 = vmov 3   ;;  %vm448_vm15 = vcmp.eq.s32.totalorder %v5905_v47, %v5920_v52 }
  0xe8   : > { %2492 = vperm.xlu1 %5088, %v5574_v11   ;;  %v6089_v11 = vsel %vm422_vm4, 1.0, %v9791_v54  ;;  %vm437_vm4 = vcmp.eq.s32.totalorder %v5908_v49, %v5913_v51 }
  0xe9   : > { %v6195_v28 = vsel %vm437_vm4, 1.0, %v9791_v54  ;;  %vm452_vm4 = vcmp.eq.s32.totalorder %v5905_v47, %v5957_v61 }
  0xea   : > { %9838 = vst [vmem:[#allocation31_spill] sm:$0xff] %v6195_v28  ;;  %v9840_v28 = vmov 0.0  }
  0xeb   : > { %v6081_v33 = vpop.permute.xlu1 %662  ;;  %v6083_v34 = vpop.permute.xlu0 %659  ;;  %1893 = vperm.xlu0 %5125, %v5593_v16   ;;  %v6225_v44 = vsel %vm439_vm6, 1.0, %v9840_v28  ;;  %v6254_v50 = vsel %vm443_vm10, 1.0, %v9840_v28  ;;  %v6257_v4 = vsel %vm444_vm13, 1.0, %v9840_v28  ;;  %v6266_v2 = vsel %vm446_vm11, 1.0, %v9840_v28 }
  0xec   : > { %5089 = vset.pattern.permute.xlu1 %v9782_v29  ;;  %vm708_vm2 = vcmp.eq.s32.totalorder %v5905_v47, %v6083_v34  ;;  %v6159_v29 = vsel %vm432_vm14, 1.0, %v9791_v54  ;;  %vm445_vm14 = vcmp.eq.s32.totalorder %v5908_v49, %v5924_v53  ;;  %9842 = vst [vmem:[#allocation33_spill] sm:$0xff] %v6254_v50  ;;  %9843 = vst [vmem:[#allocation34_spill] sm:$0xff] %v6257_v4  ;;  %v9845_v53 = vmov 7  }
  0xed   : > { %2191 = vperm.xlu1 %5089, %v5585_v14   ;;  %v4253_v45 = vsel %vm708_vm2, 1.0, %v9791_v54  ;;  %v6260_v3 = vsel %vm445_vm14, 1.0, %v9840_v28  ;;  %vm450_vm2 = vcmp.eq.s32.totalorder %v5892_v43, %v5957_v61  ;;  %vm456_vm6 = vcmp.eq.s32.totalorder %v5905_v47, %v5953_v60 }
  0xee   : > { %v6166_v26 = vadd.f32 %v4253_v45, %v5963_v63  ;;  %v6183_v63 = vsel %vm434_vm0, 1.0, %v9791_v54  ;;  %v6192_v45 = vsel %vm436_vm3, 1.0, %v9791_v54  ;;  %vm449_vm0 = vcmp.eq.s32.totalorder %v5908_v49, %v5920_v52  ;;  %9844 = vst [vmem:[#allocation35_spill] sm:$0xff] %v6260_v3 }
  0xef   : > { %v6151_v27 = vpop.permute.xlu1 %665  ;;  %v6153_v48 = vpop.permute.xlu0 %668  ;;  %1896 = vperm.xlu0 %5125, %v5590_v15   ;;  %9835 = vst [vmem:[#allocation28_spill] sm:$0xff] %v6183_v63  ;;  %9837 = vst [vmem:[#allocation30_spill] sm:$0xff] %v6192_v45  ;;  %v6219_v45 = vsel %vm438_vm5, 1.0, %v9840_v28  ;;  %v6237_v63 = vsel %vm441_vm8, 1.0, %v9840_v28  ;;  %vm451_vm3 = vcmp.eq.s32.totalorder %v5902_v46, %v5957_v61  ;;  %vm455_vm5 = vcmp.eq.s32.totalorder %v5902_v46, %v5953_v60 }
  0xf0   : > { %9834 = vst [vmem:[#allocation27_spill] sm:$0xff] %v6166_v26  ;;  %v6248_v26 = vsel %vm442_vm9, 1.0, %v9840_v28  ;;  %v6298_v50 = vsel %vm448_vm15, 1.0, %v9840_v28  ;;  %vm457_vm8 = vcmp.eq.s32.totalorder %v5908_v49, %v5953_v60  ;;  %vm458_vm9 = vcmp.eq.s32.totalorder %v5892_v43, %v6008_v6 }
  0xf1   : > { %5090 = vset.pattern.permute.xlu1 %v9839_v5  ;;  %9841 = vst [vmem:[#allocation32_spill] sm:$0xff] %v6248_v26  ;;  %v6272_v26 = vsel %vm447_vm12, 1.0, %v9840_v28  ;;  %9846 = vst [vmem:[#allocation36_spill] sm:$0xff] %v6298_v50  ;;  %vm459_vm10 = vcmp.eq.s32.totalorder %v5902_v46, %v6008_v6  ;;  %v6323_v1 = vsel %vm451_vm3, 1.0, %v9840_v28  ;;  %v6329_v40 = vsel %vm452_vm4, 1.0, %v9840_v28 }
  0xf2   : > { %1285 = vperm.xlu1 %5090, %v5593_v16   ;;  %v6231_v16 = vsel %vm440_vm7, 1.0, %v9840_v28  ;;  %vm453_vm7 = vcmp.eq.s32.totalorder %v5908_v49, %v5957_v61  ;;  %9849 = vst [vmem:[#allocation39_spill] sm:$0xff] %v6323_v1  ;;  %9850 = vst [vmem:[#allocation40_spill] sm:$0xff] %v6329_v40  ;;  %vm460_vm11 = vcmp.eq.s32.totalorder %v5905_v47, %v6008_v6  ;;  %v6344_v1 = vsel %vm454_vm1, 1.0, %v9840_v28 }
  0xf3   : > { %v6211_v51 = vpop.permute.xlu1 %671  ;;  %v6213_v54 = vpop.permute.xlu0 %674  ;;  %1899 = vperm.xlu0 %5125, %v5601_v18   ;;  %v6334_v52 = vsel %vm453_vm7, 1.0, %v9840_v28  ;;  %9852 = vst [vmem:[#allocation42_spill] sm:$0xff] %v6344_v1  ;;  %v6350_v61 = vsel %vm455_vm5, 1.0, %v9840_v28  ;;  %vm461_vm12 = vcmp.eq.s32.totalorder %v5908_v49, %v6008_v6  ;;  %v6361_v40 = vsel %vm458_vm9, 1.0, %v9840_v28 }
  0xf4   : > { %9851 = vst [vmem:[#allocation41_spill] sm:$0xff] %v6334_v52  ;;  %9853 = vst [vmem:[#allocation43_spill] sm:$0xff] %v6350_v61  ;;  %v6356_v52 = vsel %vm456_vm6, 1.0, %v9840_v28  ;;  %v6364_v38 = vsel %vm459_vm10, 1.0, %v9840_v28  ;;  %v6371_v61 = vsel %vm457_vm8, 1.0, %v9840_v28  ;;  %v6374_v1 = vsel %vm460_vm11, 1.0, %v9840_v28 }
  0xf5   : > { %9854 = vst [vmem:[#allocation44_spill] sm:$0xff] %v6356_v52  ;;  %9855 = vst [vmem:[#allocation45_spill] sm:$0xff] %v6361_v40  ;;  %vm710_vm13 = vcmp.eq.s32.totalorder %v5892_v43, %v6081_v33  ;;  %vm711_vm14 = vcmp.eq.s32.totalorder %v5902_v46, %v6081_v33  ;;  %vm706_vm15 = vcmp.eq.s32.totalorder %v5892_v43, %v6083_v34  ;;  %v6393_v60 = vsel %vm461_vm12, 1.0, %v9840_v28 }
  0xf6   : > { %5091 = vset.pattern.permute.xlu1 %v9845_v53  ;;  %9856 = vst [vmem:[#allocation46_spill] sm:$0xff] %v6364_v38  ;;  %9858 = vst [vmem:[#allocation47_spill] sm:$0xff] %v6371_v61  ;;  %vm709_vm1 = vcmp.eq.s32.totalorder %v5908_v49, %v6083_v34  ;;  %vm715_vm3 = vcmp.eq.s32.totalorder %v5902_v46, %v6151_v27  ;;  %vm712_vm4 = vcmp.eq.s32.totalorder %v5905_v47, %v6081_v33 }
  0xf7   : > { %v6283_v3 = vpop.permute.xlu1 %677  ;;  %v6285_v4 = vpop.permute.xlu0 %680  ;;  %2495 = vperm.xlu1 %5091, %v5585_v14   ;;  %1902 = vperm.xlu0 %5125, %v5598_v17   ;;  %v6311_v14 = vsel %vm449_vm0, 1.0, %v9840_v28  ;;  %v6317_v17 = vsel %vm450_vm2, 1.0, %v9840_v28  ;;  %9859 = vst [vmem:[#allocation48_spill] sm:$0xff] %v6374_v1  ;;  %vm707_vm0 = vcmp.eq.s32.totalorder %v5902_v46, %v6083_v34  ;;  %vm714_vm2 = vcmp.eq.s32.totalorder %v5892_v43, %v6151_v27 }
  0xf8   : > { %9847 = vst [vmem:[#allocation37_spill] sm:$0xff] %v6311_v14  ;;  %9848 = vst [vmem:[#allocation38_spill] sm:$0xff] %v6317_v17  ;;  %vm716_vm5 = vcmp.eq.s32.totalorder %v5905_v47, %v6151_v27  ;;  %vm717_vm6 = vcmp.eq.s32.totalorder %v5908_v49, %v6151_v27  ;;  %vm713_vm7 = vcmp.eq.s32.totalorder %v5908_v49, %v6081_v33  ;;  %v6417_v1 = vsel %vm711_vm14, 1.0, %v9840_v28 }
  0xf9   : > { %9860 = vst [vmem:[#allocation49_spill] sm:$0xff] %v6393_v60  ;;  %v6411_v60 = vsel %vm710_vm13, 1.0, %v9840_v28  ;;  %9862 = vst [vmem:[#allocation51_spill] sm:$0xff] %v6417_v1  ;;  %v4251_v27 = vsel %vm706_vm15, 1.0, %v9840_v28  ;;  %v4252_v38 = vsel %vm707_vm0, 1.0, %v9840_v28  ;;  %v4254_v40 = vsel %vm709_vm1, 1.0, %v9840_v28 }
  0xfa   : > { %9861 = vst [vmem:[#allocation50_spill] sm:$0xff] %v6411_v60  ;;  %v4259_v61 = vsel %vm714_vm2, 1.0, %v9840_v28  ;;  %v4260_v52 = vsel %vm715_vm3, 1.0, %v9840_v28  ;;  %v9863_v60 = vmov 6   ;;  %v4261_v14 = vsel %vm716_vm5, 1.0, %v9840_v28 }
  0xfb   : > { %v6336_v39 = vpop.permute.xlu1 %683  ;;  %v6338_v17 = vpop.permute.xlu0 %686  ;;  %5092 = vset.pattern.permute.xlu1 %v9857_v37  ;;  %1905 = vperm.xlu0 %5125, %v5609_v20   ;;  %v4262_v50 = vsel %vm717_vm6, 1.0, %v9840_v28  ;;  %vm718_vm8 = vcmp.eq.s32.totalorder %v5892_v43, %v6153_v48  ;;  %vm719_vm9 = vcmp.eq.s32.totalorder %v5902_v46, %v6153_v48  ;;  %v6440_v34 = vsel %vm712_vm4, 1.0, %v9840_v28 }
  0xfc   : > { %984 = vperm.xlu1 %5092, %v5590_v15   ;;  %9864 = vst [vmem:[#allocation52_spill] sm:$0xff] %v6440_v34  ;;  %v6443_v1 = vadd.f32 %v4251_v27, %v5948_v59  ;;  %vm720_vm10 = vcmp.eq.s32.totalorder %v5905_v47, %v6153_v48  ;;  %vm721_vm11 = vcmp.eq.s32.totalorder %v5908_v49, %v6153_v48 }
  0xfd   : > { %v6457_v25 = vadd.f32 %v4254_v40, %v5966_v0  ;;  %v6460_v34 = vadd.f32 %v4259_v61, %v5929_v55  ;;  %v6463_v59 = vadd.f32 %v4260_v52, %v5938_v56  ;;  %v6466_v27 = vadd.f32 %v4261_v14, %v5941_v57 }
  0xfe   : > { %9865 = vst [vmem:[#allocation53_spill] sm:$0xff] %v6443_v1  ;;  %v6469_v1 = vadd.f32 %v4262_v50, %v5944_v58  ;;  %v4264_v55 = vsel %vm719_vm9, 1.0, %v9840_v28  ;;  %v4265_v0 = vsel %vm720_vm10, 1.0, %v9840_v28  ;;  %v4266_v56 = vsel %vm721_vm11, 1.0, %v9840_v28 }
  0xff   : > { %v6401_v20 = vpop.permute.xlu1 %689  ;;  %v6403_v6 = vpop.permute.xlu0 %692  ;;  %1908 = vperm.xlu0 %5125, %v5606_v19   ;;  %v6454_v19 = vadd.f32 %v4252_v38, %v5960_v62  ;;  %v4263_v62 = vsel %vm718_vm8, 1.0, %v9840_v28  ;;  %vm722_vm12 = vcmp.eq.s32.totalorder %v5892_v43, %v6211_v51  ;;  %vm723_vm13 = vcmp.eq.s32.totalorder %v5902_v46, %v6211_v51 }
 0x100   : > { %5093 = vset.pattern.permute.xlu1 %v9863_v60  ;;  %v6490_v57 = vsel %vm713_vm7, 1.0, %v9840_v28  ;;  %vm724_vm14 = vcmp.eq.s32.totalorder %v5905_v47, %v6211_v51  ;;  %vm726_vm15 = vcmp.eq.s32.totalorder %v5892_v43, %v6213_v54  ;;  %vm727_vm0 = vcmp.eq.s32.totalorder %v5902_v46, %v6213_v54 }
 0x101   : > { %2194 = vperm.xlu1 %5093, %v5582_v13   ;;  %v6505_v33 = vadd.f32 %v4263_v62, %v6014_v12  ;;  %v6508_v38 = vadd.f32 %v4264_v55, %v6023_v7  ;;  %vm728_vm1 = vcmp.eq.s32.totalorder %v5905_v47, %v6213_v54  ;;  %vm729_vm2 = vcmp.eq.s32.totalorder %v5908_v49, %v6213_v54 }
 0x102   : > { %v6518_v40 = vadd.f32 %v4266_v56, %v6035_v10  ;;  %vm725_vm3 = vcmp.eq.s32.totalorder %v5908_v49, %v6211_v51  ;;  %v6532_v12 = vsel %vm723_vm13, 1.0, %v9840_v28  ;;  %v6538_v7 = vsel %vm724_vm14, 1.0, %v9840_v28 }
 0x103   : > { %v6449_v32 = vpop.permute.xlu1 %695  ;;  %v6451_v31 = vpop.permute.xlu0 %698  ;;  %1911 = vperm.xlu0 %5125, %v5617_v22   ;;  %v6526_v22 = vsel %vm722_vm12, 1.0, %v9840_v28  ;;  %v4272_v10 = vsel %vm727_vm0, 1.0, %v9840_v28  ;;  %v4273_v50 = vsel %vm728_vm1, 1.0, %v9840_v28  ;;  %v4274_v14 = vsel %vm729_vm2, 1.0, %v9840_v28 }
 0x104   : > { %vm730_vm4 = vcmp.eq.s32.totalorder %v5892_v43, %v6283_v3  ;;  %vm731_vm5 = vcmp.eq.s32.totalorder %v5902_v46, %v6283_v3  ;;  %v6556_v51 = vsel %vm725_vm3, 1.0, %v9840_v28  ;;  %vm732_vm6 = vcmp.eq.s32.totalorder %v5905_v47, %v6283_v3 }
 0x105   : > { %5094 = vset.pattern.permute.xlu1 %v9839_v5  ;;  %vm734_vm7 = vcmp.eq.s32.totalorder %v5892_v43, %v6285_v4  ;;  %vm735_vm8 = vcmp.eq.s32.totalorder %v5902_v46, %v6285_v4  ;;  %v6572_v61 = vadd.f32 %v4272_v10, %v6095_v35  ;;  %vm736_vm9 = vcmp.eq.s32.totalorder %v5905_v47, %v6285_v4 }
 0x106   : > { %1288 = vperm.xlu1 %5094, %v5590_v15   ;;  %v6515_v15 = vadd.f32 %v4265_v0, %v6029_v9  ;;  %v4271_v9 = vsel %vm726_vm15, 1.0, %v9840_v28  ;;  %vm737_vm10 = vcmp.eq.s32.totalorder %v5908_v49, %v6285_v4  ;;  %v6584_v55 = vadd.f32 %v4274_v14, %v6114_v8 }
 0x107   : > { %v6499_v48 = vpop.permute.xlu1 %701  ;;  %v6501_v58 = vpop.permute.xlu0 %704  ;;  %1914 = vperm.xlu0 %5125, %v5614_v21   ;;  %v6569_v52 = vadd.f32 %v4271_v9, %v6089_v11  ;;  %vm733_vm11 = vcmp.eq.s32.totalorder %v5908_v49, %v6283_v3  ;;  %v6592_v21 = vsel %vm730_vm4, 1.0, %v9840_v28  ;;  %v6598_v11 = vsel %vm731_vm5, 1.0, %v9840_v28 }
 0x108   : > { %9866 = vst [vmem:[#allocation54_spill] sm:$0xff] %v6501_v58  ;;  %v6604_v35 = vsel %vm732_vm6, 1.0, %v9840_v28  ;;  %v4280_v8 = vsel %vm735_vm8, 1.0, %v9840_v28  ;;  %v4281_v0 = vsel %vm736_vm9, 1.0, %v9840_v28  ;;  %v4282_v56 = vsel %vm737_vm10, 1.0, %v9840_v28  ;;  %v5135_v58 = vld [vmem:[%s5549_s21 + $0x70] sm:$0xff] }
 0x109   : > { %vm738_vm12 = vcmp.eq.s32.totalorder %v5892_v43, %v6336_v39  ;;  %vm739_vm13 = vcmp.eq.s32.totalorder %v5902_v46, %v6336_v39  ;;  %v6624_v9 = vsel %vm733_vm11, 1.0, %v9840_v28  ;;  %vm740_vm14 = vcmp.eq.s32.totalorder %v5905_v47, %v6336_v39 }
 0x10a   : > { %5095 = vset.pattern.permute.xlu1 %v9845_v53  ;;  %vm741_vm15 = vcmp.eq.s32.totalorder %v5908_v49, %v6336_v39  ;;  %vm742_vm0 = vcmp.eq.s32.totalorder %v5892_v43, %v6338_v17  ;;  %v6638_v10 = vadd.f32 %v4280_v8, %v6144_v42  ;;  %vm743_vm1 = vcmp.eq.s32.totalorder %v5902_v46, %v6338_v17 }
 0x10b   : > { %2498 = vperm.xlu1 %5095, %v5582_v13   ;;  %v6581_v13 = vadd.f32 %v4273_v50, %v6101_v36  ;;  %v4279_v36 = vsel %vm734_vm7, 1.0, %v9840_v28  ;;  %1917 = vperm.xlu0 %5125, %v5623_v24   ;;  %vm744_vm2 = vcmp.eq.s32.totalorder %v5905_v47, %v6338_v17  ;;  %v6645_v50 = vadd.f32 %v4281_v0, %v6159_v29  ;;  %v5134_v0 = vld [vmem:[%s5549_s21 + $0x30] sm:$0xff] }
 0x10c   : > { %v6565_v54 = vpop.permute.xlu1 %963  ;;  %v6578_v62 = vpop.permute.xlu0 %966  ;;  %v6635_v4 = vadd.f32 %v4279_v36, %v6131_v41  ;;  %9868 = vst [vmem:[#allocation56_spill] sm:$0xff] %v6638_v10  ;;  %v6648_v14 = vadd.f32 %v4282_v56, %v6172_v30  ;;  %vm745_vm3 = vcmp.eq.s32.totalorder %v5908_v49, %v6338_v17  ;;  %v6664_v29 = vsel %vm739_vm13, 1.0, %v9840_v28 }
 0x10d   : > { %9869 = vst [vmem:[#allocation57_spill] sm:$0xff] %v6645_v50  ;;  %9872 = vst [vmem:[#allocation60_spill] sm:$0xff] %v6664_v29  ;;  %v6667_v30 = vsel %vm740_vm14, 1.0, %v9840_v28  ;;  %v6670_v41 = vsel %vm741_vm15, 1.0, %v9840_v28  ;;  %v4287_v42 = vsel %vm742_vm0, 1.0, %v9840_v28  ;;  %v4288_v17 = vsel %vm743_vm1, 1.0, %v9840_v28 }
 0x10e   : > { %9867 = vst [vmem:[#allocation55_spill] sm:$0xff] %v6635_v4  ;;  %9870 = vst [vmem:[#allocation58_spill] sm:$0xff] %v6648_v14  ;;  %v4289_v8 = vsel %vm744_vm2, 1.0, %v9840_v28  ;;  %vm750_vm4 = vcmp.eq.s32.totalorder %v5892_v43, %v6403_v6  ;;  %vm751_vm5 = vcmp.eq.s32.totalorder %v5902_v46, %v6403_v6  ;;  %v4290_v39 = vsel %vm745_vm3, 1.0, %v9840_v28  ;;  %v9926_v50 = vld [vmem:[#allocation53_spill] sm:$0xff] }
 0x10f   : > { %5096 = vset.pattern.permute.xlu1 %v9857_v37  ;;  %9873 = vst [vmem:[#allocation61_spill] sm:$0xff] %v6667_v30  ;;  %9874 = vst [vmem:[#allocation62_spill] sm:$0xff] %v6670_v41  ;;  %vm746_vm6 = vcmp.eq.s32.totalorder %v5892_v43, %v6401_v20  ;;  %vm747_vm7 = vcmp.eq.s32.totalorder %v5902_v46, %v6401_v20  ;;  %vm748_vm8 = vcmp.eq.s32.totalorder %v5905_v47, %v6401_v20 }
 0x110   : > { %v6621_v3 = vpop.permute.xlu1 %969  ;;  %987 = vperm.xlu1 %5096, %v5601_v18   ;;  %v6654_v18 = vsel %vm738_vm12, 1.0, %v9840_v28  ;;  %v6658_v24 = vpop.permute.xlu0 %975  ;;  %5130 = vset.pattern.permute.xlu0 %v9863_v60  ;;  %v6692_v56 = vadd.f32 %v4287_v42, %v6219_v45  ;;  %vm749_vm9 = vcmp.eq.s32.totalorder %v5908_v49, %v6401_v20  ;;  %vm752_vm10 = vcmp.eq.s32.totalorder %v5905_v47, %v6403_v6 }
 0x111   : > { %9871 = vst [vmem:[#allocation59_spill] sm:$0xff] %v6654_v18  ;;  %vm753_vm11 = vcmp.eq.s32.totalorder %v5908_v49, %v6403_v6  ;;  %2221 = vperm.xlu0 %5130, %v5135_v58   ;;  %v6702_v14 = vadd.f32 %v4288_v17, %v6225_v44  ;;  %v6705_v41 = vadd.f32 %v4289_v8, %v6231_v16  ;;  %v4295_v45 = vsel %vm750_vm4, 1.0, %v9840_v28 }
 0x112   : > { %9875 = vst [vmem:[#allocation63_spill] sm:$0xff] %v6692_v56  ;;  %v4296_v42 = vsel %vm751_vm5, 1.0, %v9840_v28  ;;  %v6718_v58 = vadd.f32 %v4290_v39, %v6237_v63  ;;  %v6724_v44 = vsel %vm746_vm6, 1.0, %v9840_v28  ;;  %v6730_v16 = vsel %vm747_vm7, 1.0, %v9840_v28 }
 0x113   : > { %9876 = vst [vmem:[#allocation64_spill] sm:$0xff] %v6702_v14  ;;  %9877 = vst [vmem:[#allocation65_spill] sm:$0xff] %v6705_v41  ;;  %v6736_v6 = vsel %vm748_vm8, 1.0, %v9840_v28  ;;  %v6741_v17 = vsel %vm749_vm9, 1.0, %v9840_v28  ;;  %v4297_v8 = vsel %vm752_vm10, 1.0, %v9840_v28  ;;  %v4298_v39 = vsel %vm753_vm11, 1.0, %v9840_v28 }
 0x114   : > { %v6673_v36 = vpop.permute.xlu1 %972  ;;  %5097 = vset.pattern.permute.xlu1 %v9863_v60  ;;  %9878 = vst [vmem:[#allocation66_spill] sm:$0xff] %v6718_v58  ;;  %9879 = vst [vmem:[#allocation67_spill] sm:$0xff] %v6724_v44  ;;  %v6738_v63 = vpop.permute.xlu0 %981  ;;  %vm758_vm12 = vcmp.eq.s32.totalorder %v5892_v43, %v6451_v31  ;;  %v6752_v20 = vadd.f32 %v4296_v42, %v6272_v26  ;;  %vm754_vm13 = vcmp.eq.s32.totalorder %v5892_v43, %v6449_v32  ;;  %v5137_v26 = vld [vmem:[%s5549_s21 + $0x78] sm:$0xff]  ;;  %v9885_v42 = vld [vmem:[#allocation20_spill] sm:$0xff] }
 0x115   : > { %2197 = vperm.xlu1 %5097, %v5134_v0   ;;  %9880 = vst [vmem:[#allocation68_spill] sm:$0xff] %v6730_v16  ;;  %9881 = vst [vmem:[#allocation69_spill] sm:$0xff] %v6736_v6  ;;  %v6749_v16 = vadd.f32 %v4295_v45, %v6266_v2  ;;  %vm755_vm14 = vcmp.eq.s32.totalorder %v5902_v46, %v6449_v32  ;;  %vm756_vm15 = vcmp.eq.s32.totalorder %v5905_v47, %v6449_v32  ;;  %v9886_v44 = vld [vmem:[#allocation21_spill] sm:$0xff]  ;;  %v9887_v41 = vld [vmem:[#allocation22_spill] sm:$0xff] }
 0x116   : > { %9882 = vst [vmem:[#allocation70_spill] sm:$0xff] %v6741_v17  ;;  %9884 = vst [vmem:[#allocation72_spill] sm:$0xff] %v6752_v20  ;;  %v6759_v17 = vld [vmem:[%s5549_s21 + $0x40] sm:$0xff]  ;;  %vm757_vm0 = vcmp.eq.s32.totalorder %v5908_v49, %v6449_v32  ;;  %vm759_vm1 = vcmp.eq.s32.totalorder %v5902_v46, %v6451_v31  ;;  %vm760_vm2 = vcmp.eq.s32.totalorder %v5905_v47, %v6451_v31  ;;  %2224 = vperm.xlu0 %5130, %v5137_v26   ;;  %v9904_v32 = vld [vmem:[#allocation23_spill] sm:$0xff] }
 0x117   : > { %9883 = vst [vmem:[#allocation71_spill] sm:$0xff] %v6749_v16  ;;  %vm761_vm3 = vcmp.eq.s32.totalorder %v5908_v49, %v6451_v31  ;;  %v4303_v2 = vsel %vm758_vm12, 1.0, %v9840_v28  ;;  %v914_v45 = vadd.f32 %v6526_v22, %v6047_v23  ;;  %v915_v20 = vadd.f32 %v6532_v12, %v9885_v42  ;;  %v9906_v31 = vld [vmem:[#allocation25_spill] sm:$0xff] }
 0x118   : > { %v6715_v56 = vpop.permute.xlu1 %978  ;;  %v916_v58 = vadd.f32 %v6538_v7, %v9886_v44  ;;  %v917_v26 = vadd.f32 %v6556_v51, %v9887_v41  ;;  %vm1026_vm4 = vcmp.eq.s32.totalorder %v5892_v43, %v6658_v24  ;;  %vm1027_vm5 = vcmp.eq.s32.totalorder %v5902_v46, %v6658_v24  ;;  %v9890_v44 = vld [vmem:[#allocation36_spill] sm:$0xff] }
 0x119   : > { %5098 = vset.pattern.permute.xlu1 %v9839_v5  ;;  %v6778_v16 = vpop.permute.xlu0 %1881  ;;  %vm1028_vm6 = vcmp.eq.s32.totalorder %v5905_v47, %v6658_v24  ;;  %vm1029_vm7 = vcmp.eq.s32.totalorder %v5908_v49, %v6658_v24  ;;  %v4331_v23 = vsel %vm1026_vm4, 1.0, %v9840_v28  ;;  %v4332_v22 = vsel %vm1027_vm5, 1.0, %v9840_v28 }
 0x11a   : > { %1291 = vperm.xlu1 %5098, %v6759_v17   ;;  %v4333_v12 = vsel %vm1028_vm6, 1.0, %v9840_v28  ;;  %v4334_v7 = vsel %vm1029_vm7, 1.0, %v9840_v28  ;;  %v6799_v51 = vadd.f32 %v4331_v23, %v914_v45  ;;  %v6801_v41 = vadd.f32 %v4332_v22, %v915_v20  ;;  %5133 = vset.pattern.permute.xlu0 %v9845_v53  ;;  %v9894_v45 = vld [vmem:[#allocation37_spill] sm:$0xff]  ;;  %v9900_v22 = vld [vmem:[#allocation42_spill] sm:$0xff] }
 0x11b   : > { %v6805_v42 = vadd.f32 %v4297_v8, %v9890_v44  ;;  %v4304_v24 = vsel %vm759_vm1, 1.0, %v9840_v28  ;;  %v6811_v14 = vadd.f32 %v4333_v12, %v916_v58  ;;  %v6813_v30 = vadd.f32 %v4334_v7, %v917_v26  ;;  %v9902_v44 = vld [vmem:[#allocation43_spill] sm:$0xff] }
 0x11c   : > { %9888 = vst [vmem:[#allocation20_spill] sm:$0xff] %v6799_v51  ;;  %9889 = vst [vmem:[#allocation21_spill] sm:$0xff] %v6801_v41  ;;  %v6818_v20 = vadd.f32 %v4298_v39, %v9894_v45  ;;  %v6830_v8 = vsel %vm755_vm14, 1.0, %v9840_v28  ;;  %v6836_v58 = vsel %vm756_vm15, 1.0, %v9840_v28  ;;  %v6842_v39 = vsel %vm757_vm0, 1.0, %v9840_v28 }
 0x11d   : > { %v6780_v6 = vpop.permute.xlu1 %1267  ;;  %9891 = vst [vmem:[#allocation22_spill] sm:$0xff] %v6805_v42  ;;  %9892 = vst [vmem:[#allocation36_spill] sm:$0xff] %v6811_v14  ;;  %v4305_v26 = vsel %vm760_vm2, 1.0, %v9840_v28  ;;  %v4306_v23 = vsel %vm761_vm3, 1.0, %v9840_v28  ;;  %v6853_v12 = vadd.f32 %v4303_v2, %v9900_v22  ;;  %v6858_v45 = vadd.f32 %v4304_v24, %v9902_v44  ;;  %v9907_v22 = vld [vmem:[#allocation26_spill] sm:$0xff]  ;;  %v6876_v24 = vld [vmem:[%s5549_s21 + $0x48] sm:$0xff] }
 0x11e   : > { %5099 = vset.pattern.permute.xlu1 %v9845_v53  ;;  %9893 = vst [vmem:[#allocation73_spill] sm:$0xff] %v6813_v30  ;;  %9895 = vst [vmem:[#allocation37_spill] sm:$0xff] %v6818_v20  ;;  %v6855_v7 = vpop.permute.xlu0 %2185  ;;  %vm762_vm8 = vcmp.eq.s32.totalorder %v5892_v43, %v6499_v48  ;;  %v924_v2 = vadd.f32 %v6604_v35, %v9906_v31  ;;  %vm1034_vm9 = vcmp.eq.s32.totalorder %v5892_v43, %v6738_v63 }
 0x11f   : > { %2501 = vperm.xlu1 %5099, %v5134_v0   ;;  %v6824_v0 = vsel %vm754_vm13, 1.0, %v9840_v28  ;;  %9897 = vst [vmem:[#allocation75_spill] sm:$0xff] %v6830_v8  ;;  %9898 = vst [vmem:[#allocation76_spill] sm:$0xff] %v6836_v58  ;;  %v9905_v58 = vld [vmem:[#allocation24_spill] sm:$0xff]  ;;  %vm1035_vm10 = vcmp.eq.s32.totalorder %v5902_v46, %v6738_v63  ;;  %vm1036_vm11 = vcmp.eq.s32.totalorder %v5905_v47, %v6738_v63 }
 0x120   : > { %9896 = vst [vmem:[#allocation74_spill] sm:$0xff] %v6824_v0  ;;  %9899 = vst [vmem:[#allocation77_spill] sm:$0xff] %v6842_v39  ;;  %v922_v39 = vadd.f32 %v6592_v21, %v9904_v32  ;;  %v923_v8 = vadd.f32 %v6598_v11, %v9905_v58  ;;  %vm1037_vm12 = vcmp.eq.s32.totalorder %v5908_v49, %v6738_v63  ;;  %v4339_v21 = vsel %vm1034_vm9, 1.0, %v9840_v28  ;;  %v9914_v0 = vld [vmem:[#allocation47_spill] sm:$0xff] }
 0x121   : > { %v6815_v29 = vpop.permute.xlu1 %1270  ;;  %9901 = vst [vmem:[#allocation42_spill] sm:$0xff] %v6853_v12  ;;  %9903 = vst [vmem:[#allocation43_spill] sm:$0xff] %v6858_v45  ;;  %v925_v12 = vadd.f32 %v6624_v9, %v9907_v22  ;;  %v4340_v11 = vsel %vm1035_vm10, 1.0, %v9840_v28  ;;  %v4341_v9 = vsel %vm1036_vm11, 1.0, %v9840_v28  ;;  %v4342_v58 = vsel %vm1037_vm12, 1.0, %v9840_v28  ;;  %v9912_v22 = vld [vmem:[#allocation44_spill] sm:$0xff] }
 0x122   : > { %v6889_v44 = vadd.f32 %v4339_v21, %v922_v39  ;;  %v6891_v32 = vadd.f32 %v4340_v11, %v923_v8  ;;  %vm763_vm13 = vcmp.eq.s32.totalorder %v5902_v46, %v6499_v48  ;;  %vm764_vm14 = vcmp.eq.s32.totalorder %v5905_v47, %v6499_v48 }
 0x123   : > { %5100 = vset.pattern.permute.xlu1 %v9857_v37  ;;  %v6897_v63 = vadd.f32 %v4341_v9, %v924_v2  ;;  %v6899_v31 = vadd.f32 %v4342_v58, %v925_v12  ;;  %v6902_v45 = vadd.f32 %v4305_v26, %v9912_v22  ;;  %v6905_v20 = vadd.f32 %v4306_v23, %v9914_v0  ;;  %v6911_v8 = vpop.permute.xlu0 %2489  ;;  %v5139_v0 = vld [vmem:[%s5549_s21 + $0x38] sm:$0xff]  ;;  %v9921_v22 = vld [vmem:[#allocation50_spill] sm:$0xff] }
 0x124   : > { %990 = vperm.xlu1 %5100, %v6876_v24   ;;  %9908 = vst [vmem:[#allocation23_spill] sm:$0xff] %v6889_v44  ;;  %9909 = vst [vmem:[#allocation24_spill] sm:$0xff] %v6891_v32  ;;  %vm765_vm15 = vcmp.eq.s32.totalorder %v5908_v49, %v6499_v48  ;;  %vm1010_vm0 = vcmp.eq.s32.totalorder %v5892_v43, %v6565_v54  ;;  %vm1012_vm1 = vcmp.eq.s32.totalorder %v5905_v47, %v6565_v54  ;;  %v9920_v58 = vld [vmem:[#allocation15_spill] sm:$0xff] }
 0x125   : > { %9910 = vst [vmem:[#allocation25_spill] sm:$0xff] %v6897_v63  ;;  %9911 = vst [vmem:[#allocation26_spill] sm:$0xff] %v6899_v31  ;;  %vm1014_vm2 = vcmp.eq.s32.totalorder %v5892_v43, %v6578_v62  ;;  %vm1015_vm3 = vcmp.eq.s32.totalorder %v5902_v46, %v6578_v62  ;;  %vm1016_vm4 = vcmp.eq.s32.totalorder %v5905_v47, %v6578_v62  ;;  %v6927_v39 = vsel %vm762_vm8, 1.0, %v9840_v28 }
 0x126   : > { %v6885_v35 = vpop.permute.xlu1 %1875  ;;  %9913 = vst [vmem:[#allocation44_spill] sm:$0xff] %v6902_v45  ;;  %9915 = vst [vmem:[#allocation47_spill] sm:$0xff] %v6905_v20  ;;  %v6933_v26 = vsel %vm763_vm13, 1.0, %v9840_v28  ;;  %v6939_v23 = vsel %vm764_vm14, 1.0, %v9840_v28  ;;  %vm1017_vm5 = vcmp.eq.s32.totalorder %v5908_v49, %v6578_v62  ;;  %v6946_v2 = vsel %vm765_vm15, 1.0, %v9840_v28  ;;  %v9924_v20 = vld [vmem:[#allocation17_spill] sm:$0xff] }
 0x127   : > { %9916 = vst [vmem:[#allocation78_spill] sm:$0xff] %v6927_v39  ;;  %9917 = vst [vmem:[#allocation79_spill] sm:$0xff] %v6933_v26  ;;  %vm1011_vm6 = vcmp.eq.s32.totalorder %v5902_v46, %v6565_v54  ;;  %vm1013_vm7 = vcmp.eq.s32.totalorder %v5908_v49, %v6565_v54  ;;  %v4315_v48 = vsel %vm1010_vm0, 1.0, %v9840_v28  ;;  %v4317_v21 = vsel %vm1012_vm1, 1.0, %v9840_v28  ;;  %v9923_v26 = vld [vmem:[#allocation51_spill] sm:$0xff]  ;;  %v9925_v45 = vld [vmem:[#allocation52_spill] sm:$0xff] }
 0x128   : > { %5101 = vset.pattern.permute.xlu1 %v9863_v60  ;;  %9918 = vst [vmem:[#allocation80_spill] sm:$0xff] %v6939_v23  ;;  %9919 = vst [vmem:[#allocation81_spill] sm:$0xff] %v6946_v2  ;;  %v4319_v62 = vsel %vm1014_vm2, 1.0, %v9840_v28  ;;  %v4320_v11 = vsel %vm1015_vm3, 1.0, %v9840_v28  ;;  %v4321_v9 = vsel %vm1016_vm4, 1.0, %v9840_v28  ;;  %v902_v2 = vadd.f32 %v9921_v22, %v9920_v58  ;;  %v9922_v23 = vld [vmem:[#allocation16_spill] sm:$0xff] }
 0x129   : > { %2200 = vperm.xlu1 %5101, %v5139_v0   ;;  %v903_v39 = vadd.f32 %v9923_v26, %v9922_v23  ;;  %v904_v42 = vadd.f32 %v9925_v45, %v9924_v20  ;;  %v4322_v54 = vsel %vm1017_vm5, 1.0, %v9840_v28  ;;  %v6969_v18 = vsel %vm1011_vm6, 1.0, %v9840_v28  ;;  %v9927_v58 = vld [vmem:[#allocation18_spill] sm:$0xff]  ;;  %v6979_v26 = vpop.permute.xlu0 %1273  ;;  %v9928_v20 = vld [vmem:[#allocation27_spill] sm:$0xff] }
 0x12a   : > { %v6972_v10 = vsel %vm1013_vm7, 1.0, %v9840_v28  ;;  %v6975_v4 = vadd.f32 %v4315_v48, %v9926_v50  ;;  %v905_v22 = vadd.f32 %v6490_v57, %v9927_v58  ;;  %v6983_v45 = vadd.f32 %v4317_v21, %v9928_v20 }
 0x12b   : > { %v6943_v12 = vpop.permute.xlu1 %2179  ;;  %v6985_v23 = vadd.f32 %v4319_v62, %v902_v2  ;;  %v6987_v31 = vadd.f32 %v4320_v11, %v903_v39  ;;  %v6989_v63 = vadd.f32 %v4321_v9, %v904_v42  ;;  %vm1018_vm8 = vcmp.eq.s32.totalorder %v5892_v43, %v6621_v3 }
 0x12c   : > { %v6993_v50 = vadd.f32 %v4322_v54, %v905_v22  ;;  %vm1030_vm9 = vcmp.eq.s32.totalorder %v5892_v43, %v6715_v56  ;;  %vm1031_vm10 = vcmp.eq.s32.totalorder %v5902_v46, %v6715_v56  ;;  %vm1019_vm11 = vcmp.eq.s32.totalorder %v5902_v46, %v6621_v3 }
 0x12d   : > { %5102 = vset.pattern.permute.xlu1 %v9839_v5  ;;  %vm1020_vm12 = vcmp.eq.s32.totalorder %v5905_v47, %v6621_v3  ;;  %vm1032_vm13 = vcmp.eq.s32.totalorder %v5905_v47, %v6715_v56  ;;  %vm1033_vm14 = vcmp.eq.s32.totalorder %v5908_v49, %v6715_v56  ;;  %vm1022_vm15 = vcmp.eq.s32.totalorder %v5892_v43, %v6673_v36  ;;  %v1283_v62 = vpop.permute.xlu0 %1282 }
 0x12e   : > { %1294 = vperm.xlu1 %5102, %v6876_v24   ;;  %vm1023_vm0 = vcmp.eq.s32.totalorder %v5902_v46, %v6673_v36  ;;  %vm1024_vm1 = vcmp.eq.s32.totalorder %v5905_v47, %v6673_v36  ;;  %vm1025_vm2 = vcmp.eq.s32.totalorder %v5908_v49, %v6673_v36  ;;  %vm1021_vm3 = vcmp.eq.s32.totalorder %v5908_v49, %v6621_v3 }
 0x12f   : > { %v7021_v57 = vsel %vm1018_vm8, 1.0, %v9840_v28  ;;  %v4335_v56 = vsel %vm1030_vm9, 1.0, %v9840_v28  ;;  %v4336_v42 = vsel %vm1031_vm10, 1.0, %v9840_v28  ;;  %v7026_v39 = vsel %vm1019_vm11, 1.0, %v9840_v28 }
 0x130   : > { %v6991_v32 = vpop.permute.xlu1 %1878  ;;  %v7029_v2 = vsel %vm1020_vm12, 1.0, %v9840_v28  ;;  %v4337_v48 = vsel %vm1032_vm13, 1.0, %v9840_v28  ;;  %v4338_v21 = vsel %vm1033_vm14, 1.0, %v9840_v28  ;;  %v4327_v9 = vsel %vm1022_vm15, 1.0, %v9840_v28 }
 0x131   : > { %v4329_v54 = vsel %vm1024_vm1, 1.0, %v9840_v28  ;;  %v4330_v58 = vsel %vm1025_vm2, 1.0, %v9840_v28  ;;  %vm1930_vm4 = vcmp.eq.s32.totalorder %v5892_v43, %v6778_v16  ;;  %vm1931_vm5 = vcmp.eq.s32.totalorder %v5902_v46, %v6778_v16 }
 0x132   : > { %5103 = vset.pattern.permute.xlu1 %v9845_v53  ;;  %v1222_v22 = vadd.f32 %v4335_v56, %v6569_v52  ;;  %v1223_v20 = vadd.f32 %v4336_v42, %v6572_v61  ;;  %v1224_v44 = vadd.f32 %v4337_v48, %v6581_v13  ;;  %v1225_v30 = vadd.f32 %v4338_v21, %v6584_v55  ;;  %v7067_v56 = vld [vmem:[%s5549_s21 + $0x50] sm:$0xff] }
 0x133   : > { %2504 = vperm.xlu1 %5103, %v5139_v0   ;;  %v4328_v0 = vsel %vm1023_vm0, 1.0, %v9840_v28  ;;  %vm1334_vm6 = vcmp.eq.s32.totalorder %v5892_v43, %v1283_v62  ;;  %vm1335_vm7 = vcmp.eq.s32.totalorder %v5902_v46, %v1283_v62  ;;  %vm1336_vm8 = vcmp.eq.s32.totalorder %v5905_v47, %v1283_v62 }
 0x134   : > { %vm1337_vm9 = vcmp.eq.s32.totalorder %v5908_v49, %v1283_v62  ;;  %v4399_v36 = vsel %vm1334_vm6, 1.0, %v9840_v28  ;;  %v4400_v52 = vsel %vm1335_vm7, 1.0, %v9840_v28  ;;  %v4401_v61 = vsel %vm1336_vm8, 1.0, %v9840_v28 }
 0x135   : > { %v7033_v11 = vpop.permute.xlu1 %2483  ;;  %v4402_v13 = vsel %vm1337_vm9, 1.0, %v9840_v28  ;;  %v7072_v55 = vadd.f32 %v4399_v36, %v1222_v22  ;;  %v7074_v42 = vadd.f32 %v4400_v52, %v1223_v20  ;;  %vm1932_vm10 = vcmp.eq.s32.totalorder %v5905_v47, %v6778_v16 }
 0x136   : > { %vm1933_vm11 = vcmp.eq.s32.totalorder %v5908_v49, %v6778_v16  ;;  %v7082_v21 = vadd.f32 %v4401_v61, %v1224_v44  ;;  %v7084_v62 = vadd.f32 %v4402_v13, %v1225_v30  ;;  %v4326_v22 = vsel %vm1021_vm3, 1.0, %v9840_v28 }
 0x137   : > { %5104 = vset.pattern.permute.xlu1 %v9857_v37  ;;  %v7091_v20 = vadd.f32 %v4327_v9, %v6505_v33  ;;  %v7094_v36 = vadd.f32 %v4328_v0, %v6508_v38  ;;  %v7097_v52 = vadd.f32 %v4329_v54, %v6515_v15  ;;  %v7100_v14 = vadd.f32 %v4330_v58, %v6518_v40  ;;  %v7116_v38 = vpop.permute.xlu0 %1571 }
 0x138   : > { %993 = vperm.xlu1 %5104, %v7067_v56   ;;  %v7106_v30 = vsel %vm1930_vm4, 1.0, %v9840_v28  ;;  %v7112_v33 = vsel %vm1931_vm5, 1.0, %v9840_v28  ;;  %vm1314_vm12 = vcmp.eq.s32.totalorder %v5892_v43, %v6780_v6  ;;  %v7120_v15 = vsel %vm1932_vm10, 1.0, %v9840_v28 }
 0x139   : > { %9929 = vst [vmem:[#allocation15_spill] sm:$0xff] %v7097_v52  ;;  %9930 = vst [vmem:[#allocation50_spill] sm:$0xff] %v7100_v14  ;;  %v7123_v40 = vsel %vm1933_vm11, 1.0, %v9840_v28  ;;  %vm1316_vm13 = vcmp.eq.s32.totalorder %v5905_v47, %v6780_v6  ;;  %vm2234_vm14 = vcmp.eq.s32.totalorder %v5892_v43, %v6855_v7  ;;  %vm1315_vm15 = vcmp.eq.s32.totalorder %v5902_v46, %v6780_v6 }
 0x13a   : > { %v7076_v48 = vpop.permute.xlu1 %2182  ;;  %9931 = vst [vmem:[#allocation16_spill] sm:$0xff] %v7106_v30  ;;  %9932 = vst [vmem:[#allocation51_spill] sm:$0xff] %v7120_v15  ;;  %vm2235_vm0 = vcmp.eq.s32.totalorder %v5902_v46, %v6855_v7  ;;  %vm2237_vm1 = vcmp.eq.s32.totalorder %v5908_v49, %v6855_v7  ;;  %vm1318_vm2 = vcmp.eq.s32.totalorder %v5892_v43, %v6815_v29  ;;  %v4379_v16 = vsel %vm1314_vm12, 1.0, %v9840_v28 }
 0x13b   : > { %vm1317_vm3 = vcmp.eq.s32.totalorder %v5908_v49, %v6780_v6  ;;  %vm1319_vm4 = vcmp.eq.s32.totalorder %v5902_v46, %v6815_v29  ;;  %vm1320_vm5 = vcmp.eq.s32.totalorder %v5905_v47, %v6815_v29  ;;  %v4381_v44 = vsel %vm1316_vm13, 1.0, %v9840_v28  ;;  %v7177_v51 = vpop.permute.xlu0 %1574 }
 0x13c   : > { %5105 = vset.pattern.permute.xlu1 %v9863_v60  ;;  %v7149_v9 = vsel %vm2234_vm14, 1.0, %v9840_v28  ;;  %vm1322_vm6 = vcmp.eq.s32.totalorder %v5892_v43, %v6979_v26  ;;  %vm1323_vm7 = vcmp.eq.s32.totalorder %v5902_v46, %v6979_v26  ;;  %v7156_v0 = vsel %vm2235_vm0, 1.0, %v9840_v28 }
 0x13d   : > { %2203 = vperm.xlu1 %5105, %v6759_v17   ;;  %9933 = vst [vmem:[#allocation17_spill] sm:$0xff] %v7149_v9  ;;  %v7159_v54 = vsel %vm2237_vm1, 1.0, %v9840_v28  ;;  %v7162_v58 = vsel %vm1318_vm2, 1.0, %v9840_v28  ;;  %vm1324_vm8 = vcmp.eq.s32.totalorder %v5905_v47, %v6979_v26  ;;  %v7168_v61 = vsel %vm1319_vm4, 1.0, %v9840_v28 }
 0x13e   : > { %v7171_v13 = vsel %vm1320_vm5, 1.0, %v9840_v28  ;;  %v1210_v41 = vadd.f32 %v7021_v57, %v6460_v34  ;;  %vm1325_vm9 = vcmp.eq.s32.totalorder %v5908_v49, %v6979_v26  ;;  %vm1922_vm10 = vcmp.eq.s32.totalorder %v5892_v43, %v6885_v35 }
 0x13f   : > { %v7138_v3 = vpop.permute.xlu1 %1276  ;;  %v1211_v9 = vadd.f32 %v7026_v39, %v6463_v59  ;;  %v4387_v15 = vsel %vm1322_vm6, 1.0, %v9840_v28  ;;  %v4388_v30 = vsel %vm1323_vm7, 1.0, %v9840_v28  ;;  %vm1619_vm11 = vcmp.eq.s32.totalorder %v5902_v46, %v7116_v38 }
 0x140   : > { %v1212_v57 = vadd.f32 %v7029_v2, %v6466_v27  ;;  %v1213_v14 = vadd.f32 %v4326_v22, %v6469_v1  ;;  %v4389_v52 = vsel %vm1324_vm8, 1.0, %v9840_v28  ;;  %vm1618_vm12 = vcmp.eq.s32.totalorder %v5892_v43, %v7116_v38 }
 0x141   : > { %5106 = vset.pattern.permute.xlu1 %v9839_v5  ;;  %vm1924_vm13 = vcmp.eq.s32.totalorder %v5905_v47, %v6885_v35  ;;  %v4390_v59 = vsel %vm1325_vm9, 1.0, %v9840_v28  ;;  %vm1621_vm14 = vcmp.eq.s32.totalorder %v5908_v49, %v7116_v38  ;;  %v1203_v27 = vadd.f32 %v6969_v18, %v6454_v19 }
 0x142   : > { %1297 = vperm.xlu1 %5106, %v7067_v56   ;;  %v4380_v1 = vsel %vm1315_vm15, 1.0, %v9840_v28  ;;  %vm1321_vm0 = vcmp.eq.s32.totalorder %v5908_v49, %v6815_v29  ;;  %v7212_v26 = vadd.f32 %v4387_v15, %v1210_v41  ;;  %v7214_v39 = vadd.f32 %v4388_v30, %v1211_v9  ;;  %v7232_v9 = vpop.permute.xlu0 %1577 }
 0x143   : > { %vm1620_vm1 = vcmp.eq.s32.totalorder %v5905_v47, %v7116_v38  ;;  %v4444_v2 = vsel %vm1619_vm11, 1.0, %v9840_v28  ;;  %v4443_v19 = vsel %vm1618_vm12, 1.0, %v9840_v28  ;;  %v1507_v18 = vadd.f32 %v4380_v1, %v1203_v27 }
 0x144   : > { %v7188_v34 = vpop.permute.xlu1 %2486  ;;  %vm1923_vm15 = vcmp.eq.s32.totalorder %v5902_v46, %v6885_v35  ;;  %v1205_v22 = vadd.f32 %v6972_v10, %v6457_v25  ;;  %v1506_v41 = vadd.f32 %v4379_v16, %v6975_v4  ;;  %v1508_v30 = vadd.f32 %v4381_v44, %v6983_v45 }
 0x145   : > { %v4446_v15 = vsel %vm1621_vm14, 1.0, %v9840_v28  ;;  %v4382_v27 = vsel %vm1317_vm3, 1.0, %v9840_v28  ;;  %v1811_v25 = vadd.f32 %v4444_v2, %v1507_v18  ;;  %vm2227_vm2 = vcmp.eq.s32.totalorder %v5902_v46, %v6943_v12  ;;  %v7263_v18 = vld [vmem:[%s5549_s21 + $0x58] sm:$0xff] }
 0x146   : > { %5107 = vset.pattern.permute.xlu1 %v9845_v53  ;;  %v1509_v4 = vadd.f32 %v4382_v27, %v1205_v22  ;;  %vm1925_vm4 = vcmp.eq.s32.totalorder %v5908_v49, %v6885_v35  ;;  %v4445_v10 = vsel %vm1620_vm1, 1.0, %v9840_v28  ;;  %v4508_v6 = vsel %vm1923_vm15, 1.0, %v9840_v28 }
 0x147   : > { %2507 = vperm.xlu1 %5107, %v6759_v17   ;;  %v1810_v17 = vadd.f32 %v4443_v19, %v1506_v41  ;;  %vm2531_vm3 = vcmp.eq.s32.totalorder %v5902_v46, %v7033_v11  ;;  %v2115_v45 = vadd.f32 %v4508_v6, %v1811_v25  ;;  %vm2229_vm5 = vcmp.eq.s32.totalorder %v5908_v49, %v6943_v12 }
 0x148   : > { %v1813_v16 = vadd.f32 %v4446_v15, %v1509_v4  ;;  %vm2533_vm6 = vcmp.eq.s32.totalorder %v5908_v49, %v7033_v11  ;;  %v7256_v44 = vadd.f32 %v4389_v52, %v1212_v57  ;;  %v7258_v38 = vadd.f32 %v4390_v59, %v1213_v14  ;;  %v7271_v57 = vpop.permute.xlu0 %1586 }
 0x149   : > { %v7238_v1 = vpop.permute.xlu1 %1580  ;;  %v4572_v2 = vsel %vm2227_vm2, 1.0, %v9840_v28  ;;  %v4510_v19 = vsel %vm1925_vm4, 1.0, %v9840_v28  ;;  %v1812_v22 = vadd.f32 %v4445_v10, %v1508_v30  ;;  %v4636_v15 = vsel %vm2531_vm3, 1.0, %v9840_v28 }
 0x14a   : > { %v2419_v41 = vadd.f32 %v4572_v2, %v2115_v45  ;;  %v2117_v27 = vadd.f32 %v4510_v19, %v1813_v16  ;;  %v4574_v52 = vsel %vm2229_vm5, 1.0, %v9840_v28  ;;  %v4638_v14 = vsel %vm2533_vm6, 1.0, %v9840_v28 }
 0x14b   : > { %5108 = vset.pattern.permute.xlu1 %v9857_v37  ;;  %v4507_v59 = vsel %vm1922_vm10, 1.0, %v9840_v28  ;;  %vm2226_vm7 = vcmp.eq.s32.totalorder %v5892_v43, %v6943_v12  ;;  %vm2530_vm8 = vcmp.eq.s32.totalorder %v5892_v43, %v7033_v11  ;;  %v4509_v45 = vsel %vm1924_vm13, 1.0, %v9840_v28 }
 0x14c   : > { %996 = vperm.xlu1 %5108, %v7263_v18   ;;  %v2723_v30 = vadd.f32 %v4636_v15, %v2419_v41  ;;  %v2421_v4 = vadd.f32 %v4574_v52, %v2117_v27  ;;  %v2114_v10 = vadd.f32 %v4507_v59, %v1810_v17  ;;  %v4571_v6 = vsel %vm2226_vm7, 1.0, %v9840_v28  ;;  %v7318_v27 = vpop.permute.xlu0 %1589 }
 0x14d   : > { %vm2228_vm9 = vcmp.eq.s32.totalorder %v5905_v47, %v6943_v12  ;;  %vm2532_vm10 = vcmp.eq.s32.totalorder %v5905_v47, %v7033_v11  ;;  %v4386_v17 = vsel %vm1321_vm0, 1.0, %v9840_v28  ;;  %v2116_v19 = vadd.f32 %v4509_v45, %v1812_v22 }
 0x14e   : > { %v7267_v25 = vpop.permute.xlu1 %1279  ;;  %2914 = vmatprep.mubr.f32.mxu0 %v2723_v30  ;;  %v2725_v16 = vadd.f32 %v4638_v14, %v2421_v4  ;;  %v2418_v2 = vadd.f32 %v4571_v6, %v2114_v10  ;;  %vm1622_vm11 = vcmp.eq.s32.totalorder %v5892_v43, %v7177_v51  ;;  %vm1623_vm12 = vcmp.eq.s32.totalorder %v5902_v46, %v7177_v51 }
 0x14f   : > { %v4635_v35 = vsel %vm2530_vm8, 1.0, %v9840_v28  ;;  %v4573_v12 = vsel %vm2228_vm9, 1.0, %v9840_v28  ;;  %vm1624_vm13 = vcmp.eq.s32.totalorder %v5905_v47, %v7177_v51  ;;  %vm1625_vm14 = vcmp.eq.s32.totalorder %v5908_v49, %v7177_v51 }
 0x150   : > { %5109 = vset.pattern.permute.xlu1 %v9863_v60  ;;  %3059 = vmatprep.mubr.f32.mxu1 %v2725_v16  ;;  %v2722_v29 = vadd.f32 %v4635_v35, %v2418_v2  ;;  %v2420_v22 = vadd.f32 %v4573_v12, %v2116_v19  ;;  %vm1626_vm0 = vcmp.eq.s32.totalorder %v5892_v43, %v7232_v9  ;;  %v4637_v15 = vsel %vm2532_vm10, 1.0, %v9840_v28 }
 0x151   : > { %2206 = vperm.xlu1 %5109, %v6876_v24   ;;  %vm1627_vm1 = vcmp.eq.s32.totalorder %v5902_v46, %v7232_v9  ;;  %vm1628_vm15 = vcmp.eq.s32.totalorder %v5905_v47, %v7232_v9  ;;  %v1510_v52 = vadd.f32 %v7162_v58, %v6985_v23  ;;  %v1511_v14 = vadd.f32 %v7168_v61, %v6987_v31 }
 0x152   : > { %vm1629_vm2 = vcmp.eq.s32.totalorder %v5908_v49, %v7232_v9  ;;  %2915 = vmatmul.mubr.f32.vlgmr.msra.gmra.mrb[0].mxu0 %v2722_v29  ;;  %v2724_v59 = vadd.f32 %v4637_v15, %v2420_v22  ;;  %vm1926_vm4 = vcmp.eq.s32.totalorder %v5892_v43, %v6991_v32  ;;  %v1513_v30 = vadd.f32 %v4386_v17, %v6993_v50 }
 0x153   : > { %v7302_v41 = vpop.permute.xlu1 %1884  ;;  %v4447_v11 = vsel %vm1622_vm11, 1.0, %v9840_v28  ;;  %v4448_v31 = vsel %vm1623_vm12, 1.0, %v9840_v28  ;;  %v4450_v23 = vsel %vm1625_vm14, 1.0, %v9840_v28  ;;  %v4449_v50 = vsel %vm1624_vm13, 1.0, %v9840_v28 }
 0x154   : > { %v4451_v58 = vsel %vm1626_vm0, 1.0, %v9840_v28  ;;  %v4452_v61 = vsel %vm1627_vm1, 1.0, %v9840_v28  ;;  %v4453_v4 = vsel %vm1628_vm15, 1.0, %v9840_v28  ;;  %3060 = vmatmul.mubr.f32.vlgmr.msra.gmra.mrb[0].mxu1 %v2724_v59  ;;  %vm1927_vm3 = vcmp.eq.s32.totalorder %v5902_v46, %v6991_v32 }
 0x155   : > { %5110 = vset.pattern.permute.xlu1 %v9839_v5  ;;  %vm1928_vm5 = vcmp.eq.s32.totalorder %v5905_v47, %v6991_v32  ;;  %v1512_v10 = vadd.f32 %v7171_v13, %v6989_v63  ;;  %v4454_v6 = vsel %vm1629_vm2, 1.0, %v9840_v28  ;;  %vm1929_vm6 = vcmp.eq.s32.totalorder %v5908_v49, %v6991_v32  ;;  %v7380_v63 = vpop.permute.xlu0 %1592 }
 0x156   : > { %1300 = vperm.xlu1 %5110, %v7263_v18   ;;  %v1814_v45 = vadd.f32 %v4447_v11, %v1510_v52  ;;  %v1815_v17 = vadd.f32 %v4448_v31, %v1511_v14  ;;  %v1817_v16 = vadd.f32 %v4450_v23, %v1513_v30  ;;  %v7374_v19 = vadd.f32 %v4451_v58, %v7212_v26  ;;  %v7445_v58 = vld [vmem:[%s5549_s21 + $0x60] sm:$0xff] }
 0x157   : > { %v1816_v2 = vadd.f32 %v4449_v50, %v1512_v10  ;;  %v1819_v35 = vadd.f32 %v4452_v61, %v7214_v39  ;;  %v7378_v12 = vadd.f32 %v4453_v4, %v7256_v44  ;;  %vm2539_vm7 = vcmp.eq.s32.totalorder %v5902_v46, %v6911_v8 }
 0x158   : > { %v7359_v51 = vpop.permute.xlu1 %1583  ;;  %vm2541_vm8 = vcmp.eq.s32.totalorder %v5908_v49, %v6911_v8  ;;  %v1821_v13 = vadd.f32 %v4454_v6, %v7258_v38  ;;  %vm1638_vm9 = vcmp.eq.s32.totalorder %v5892_v43, %v7271_v57  ;;  %vm1639_vm10 = vcmp.eq.s32.totalorder %v5902_v46, %v7271_v57 }
 0x159   : > { %vm1640_vm11 = vcmp.eq.s32.totalorder %v5905_v47, %v7271_v57  ;;  %v4512_v26 = vsel %vm1927_vm3, 1.0, %v9840_v28  ;;  %vm2231_vm12 = vcmp.eq.s32.totalorder %v5902_v46, %v7076_v48  ;;  %vm2535_vm13 = vcmp.eq.s32.totalorder %v5902_v46, %v7188_v34  ;;  %v7433_v23 = vpop.permute.xlu0 %1595 }
 0x15a   : > { %5111 = vset.pattern.permute.xlu1 %v9845_v53  ;;  %v4514_v39 = vsel %vm1929_vm6, 1.0, %v9840_v28  ;;  %vm1641_vm14 = vcmp.eq.s32.totalorder %v5908_v49, %v7271_v57  ;;  %v2119_v44 = vadd.f32 %v4512_v26, %v1815_v17  ;;  %v4576_v38 = vsel %vm2231_vm12, 1.0, %v9840_v28 }
 0x15b   : > { %2510 = vperm.xlu1 %5111, %v6876_v24   ;;  %v2121_v29 = vadd.f32 %v4514_v39, %v1817_v16  ;;  %v4463_v22 = vsel %vm1638_vm9, 1.0, %v9840_v28  ;;  %v4640_v15 = vsel %vm2535_vm13, 1.0, %v9840_v28  ;;  %vm2233_vm0 = vcmp.eq.s32.totalorder %v5908_v49, %v7076_v48 }
 0x15c   : > { %vm2537_vm1 = vcmp.eq.s32.totalorder %v5908_v49, %v7188_v34  ;;  %v4464_v24 = vsel %vm1639_vm10, 1.0, %v9840_v28  ;;  %v2423_v52 = vadd.f32 %v4576_v38, %v2119_v44  ;;  %v4578_v14 = vsel %vm2233_vm0, 1.0, %v9840_v28 }
 0x15d   : > { %v7407_v9 = vpop.permute.xlu1 %2188  ;;  %v4642_v59 = vsel %vm2537_vm1, 1.0, %v9840_v28  ;;  %vm2236_vm15 = vcmp.eq.s32.totalorder %v5905_v47, %v6855_v7  ;;  %v4465_v30 = vsel %vm1640_vm11, 1.0, %v9840_v28  ;;  %v4466_v11 = vsel %vm1641_vm14, 1.0, %v9840_v28 }
 0x15e   : > { %vm1326_vm2 = vcmp.eq.s32.totalorder %v5892_v43, %v7138_v3  ;;  %v2425_v31 = vadd.f32 %v4578_v14, %v2121_v29  ;;  %vm1327_vm3 = vcmp.eq.s32.totalorder %v5902_v46, %v7138_v3  ;;  %vm1328_vm6 = vcmp.eq.s32.totalorder %v5905_v47, %v7138_v3 }
 0x15f   : > { %5112 = vset.pattern.permute.xlu1 %v9857_v37  ;;  %v2727_v50 = vadd.f32 %v4640_v15, %v2423_v52  ;;  %v4511_v57 = vsel %vm1926_vm4, 1.0, %v9840_v28  ;;  %vm2230_vm9 = vcmp.eq.s32.totalorder %v5892_v43, %v7076_v48  ;;  %vm2534_vm10 = vcmp.eq.s32.totalorder %v5892_v43, %v7188_v34  ;;  %v7483_v15 = vpop.permute.xlu0 %1598 }
 0x160   : > { %999 = vperm.xlu1 %5112, %v7445_v58   ;;  %v2729_v4 = vadd.f32 %v4642_v59, %v2425_v31  ;;  %v2118_v10 = vadd.f32 %v4511_v57, %v1814_v45  ;;  %vm2538_vm11 = vcmp.eq.s32.totalorder %v5892_v43, %v6911_v8  ;;  %vm2540_vm4 = vcmp.eq.s32.totalorder %v5905_v47, %v6911_v8 }
 0x161   : > { %2919 = vmatprep.mubr.f32.mxu0 %v2727_v50  ;;  %v4575_v6 = vsel %vm2230_vm9, 1.0, %v9840_v28  ;;  %v4639_v17 = vsel %vm2534_vm10, 1.0, %v9840_v28  ;;  %v4513_v45 = vsel %vm1928_vm5, 1.0, %v9840_v28  ;;  %vm2232_vm12 = vcmp.eq.s32.totalorder %v5905_v47, %v7076_v48 }
 0x162   : > { %v7448_v61 = vpop.permute.xlu1 %1887  ;;  %3064 = vmatprep.mubr.f32.mxu1 %v2729_v4  ;;  %v2422_v16 = vadd.f32 %v4575_v6, %v2118_v10  ;;  %v2120_v26 = vadd.f32 %v4513_v45, %v1816_v2  ;;  %v4577_v39 = vsel %vm2232_vm12, 1.0, %v9840_v28  ;;  %vm2536_vm13 = vcmp.eq.s32.totalorder %v5905_v47, %v7188_v34  ;;  %v9934_v4 = vld [vmem:[#allocation15_spill] sm:$0xff] }
 0x163   : > { %vm1329_vm14 = vcmp.eq.s32.totalorder %v5908_v49, %v7138_v3  ;;  %v4641_v44 = vsel %vm2536_vm13, 1.0, %v9840_v28  ;;  %v2123_v38 = vadd.f32 %v7112_v33, %v1819_v35  ;;  %v2125_v32 = vadd.f32 %v7123_v40, %v1821_v13  ;;  %v9937_v6 = vld [vmem:[#allocation51_spill] sm:$0xff] }
 0x164   : > { %5113 = vset.pattern.permute.xlu1 %v9863_v60  ;;  %v2726_v48 = vadd.f32 %v4639_v17, %v2422_v16  ;;  %v2424_v29 = vadd.f32 %v4577_v39, %v2120_v26  ;;  %v4644_v2 = vsel %vm2539_vm7, 1.0, %v9840_v28  ;;  %v4646_v34 = vsel %vm2541_vm8, 1.0, %v9840_v28  ;;  %v9938_v39 = vld [vmem:[#allocation17_spill] sm:$0xff] }
 0x165   : > { %2209 = vperm.xlu1 %5113, %v7067_v56   ;;  %v4391_v33 = vsel %vm1326_vm2, 1.0, %v9840_v28  ;;  %v4392_v40 = vsel %vm1327_vm3, 1.0, %v9840_v28  ;;  %v2427_v35 = vadd.f32 %v7156_v0, %v2123_v38  ;;  %v2429_v13 = vadd.f32 %v7159_v54, %v2125_v32 }
 0x166   : > { %v7499_v14 = vadd.f32 %v4463_v22, %v7072_v55  ;;  %v7502_v59 = vadd.f32 %v4464_v24, %v7074_v42  ;;  %v4393_v31 = vsel %vm1328_vm6, 1.0, %v9840_v28  ;;  %2920 = vmatmul.mubr.f32.gmra.mrb[2].mxu0 %v2726_v48  ;;  %v2728_v50 = vadd.f32 %v4641_v44, %v2424_v29 }
 0x167   : > { %v7496_v52 = vpop.permute.xlu1 %2492  ;;  %v4394_v0 = vsel %vm1329_vm14, 1.0, %v9840_v28  ;;  %vm1642_vm5 = vcmp.eq.s32.totalorder %v5892_v43, %v7318_v27  ;;  %v2731_v55 = vadd.f32 %v4644_v2, %v2427_v35  ;;  %v2733_v54 = vadd.f32 %v4646_v34, %v2429_v13 }
 0x168   : > { %v7515_v42 = vadd.f32 %v4465_v30, %v7082_v21  ;;  %v7518_v22 = vadd.f32 %v4466_v11, %v7084_v62  ;;  %v7521_v24 = vadd.f32 %v4391_v33, %v7091_v20  ;;  %v7524_v57 = vadd.f32 %v4392_v40, %v7094_v36  ;;  %3065 = vmatmul.mubr.f32.gmra.mrb[2].mxu1 %v2728_v50  ;;  %v9935_v21 = vld [vmem:[#allocation50_spill] sm:$0xff]  ;;  %v7550_v20 = vpop.permute.xlu0 %1601  ;;  %v9936_v30 = vld [vmem:[#allocation16_spill] sm:$0xff] }
 0x169   : > { %v4581_v3 = vsel %vm2236_vm15, 1.0, %v9840_v28  ;;  %v7531_v10 = vadd.f32 %v4393_v31, %v9934_v4  ;;  %vm1643_vm7 = vcmp.eq.s32.totalorder %v5902_v46, %v7318_v27  ;;  %vm1644_vm8 = vcmp.eq.s32.totalorder %v5905_v47, %v7318_v27  ;;  %2924 = vmatprep.mubr.f32.mxu0 %v2731_v55  ;;  %3069 = vmatprep.mubr.f32.mxu1 %v2733_v54 }
 0x16a   : > { %v7538_v62 = vadd.f32 %v4394_v0, %v9935_v21  ;;  %vm1645_vm0 = vcmp.eq.s32.totalorder %v5908_v49, %v7318_v27  ;;  %v7546_v7 = vsel %vm1642_vm5, 1.0, %v9840_v28  ;;  %vm1646_vm1 = vcmp.eq.s32.totalorder %v5892_v43, %v7380_v63  ;;  %5114 = vset.pattern.permute.xlu1 %v9839_v5  ;;  %v9939_v21 = vld [vmem:[#allocation20_spill] sm:$0xff] }
 0x16b   : > { %vm1647_vm15 = vcmp.eq.s32.totalorder %v5902_v46, %v7380_v63  ;;  %vm1648_vm2 = vcmp.eq.s32.totalorder %v5905_v47, %v7380_v63  ;;  %v2122_v11 = vadd.f32 %v9936_v30, %v7374_v19  ;;  %v2124_v17 = vadd.f32 %v9937_v6, %v7378_v12  ;;  %1303 = vperm.xlu1 %5114, %v7445_v58  }
 0x16c   : > { %v7553_v36 = vpop.permute.xlu1 %2191  ;;  %v7568_v45 = vsel %vm1643_vm7, 1.0, %v9840_v28  ;;  %v7574_v16 = vsel %vm1644_vm8, 1.0, %v9840_v28  ;;  %v4643_v19 = vsel %vm2538_vm11, 1.0, %v9840_v28  ;;  %v4645_v12 = vsel %vm2540_vm4, 1.0, %v9840_v28  ;;  %v7619_v34 = vpop.permute.xlu0 %1604 }
 0x16d   : > { %v7585_v26 = vsel %vm1645_vm0, 1.0, %v9840_v28  ;;  %vm1649_vm3 = vcmp.eq.s32.totalorder %v5908_v49, %v7380_v63  ;;  %v2426_v27 = vadd.f32 %v9938_v39, %v2122_v11  ;;  %v2428_v44 = vadd.f32 %v4581_v3, %v2124_v17  ;;  %v9940_v11 = vld [vmem:[#allocation21_spill] sm:$0xff]  ;;  %v9941_v17 = vld [vmem:[#allocation36_spill] sm:$0xff] }
 0x16e   : > { %v7594_v38 = vsel %vm1646_vm1, 1.0, %v9840_v28  ;;  %v7597_v32 = vsel %vm1647_vm15, 1.0, %v9840_v28  ;;  %v7600_v8 = vsel %vm1648_vm2, 1.0, %v9840_v28  ;;  %vm1630_vm6 = vcmp.eq.s32.totalorder %v5892_v43, %v7238_v1 }
 0x16f   : > { %vm1631_vm9 = vcmp.eq.s32.totalorder %v5902_v46, %v7238_v1  ;;  %vm1632_vm10 = vcmp.eq.s32.totalorder %v5905_v47, %v7238_v1  ;;  %v2730_v48 = vadd.f32 %v4643_v19, %v2426_v27  ;;  %v2732_v29 = vadd.f32 %v4645_v12, %v2428_v44  ;;  %5115 = vset.pattern.permute.xlu1 %v9845_v53  ;;  %v9942_v19 = vld [vmem:[#allocation73_spill] sm:$0xff] }
 0x170   : > { %vm1633_vm11 = vcmp.eq.s32.totalorder %v5908_v49, %v7238_v1  ;;  %vm1650_vm4 = vcmp.eq.s32.totalorder %v5892_v43, %v7433_v23  ;;  %vm1651_vm12 = vcmp.eq.s32.totalorder %v5902_v46, %v7433_v23  ;;  %vm1652_vm13 = vcmp.eq.s32.totalorder %v5905_v47, %v7433_v23  ;;  %2513 = vperm.xlu1 %5115, %v7067_v56   ;;  %v7698_v4 = vpop.permute.xlu0 %1607 }
 0x171   : > { %v7609_v2 = vpop.permute.xlu1 %1285  ;;  %v7626_v33 = vsel %vm1649_vm3, 1.0, %v9840_v28  ;;  %vm1653_vm14 = vcmp.eq.s32.totalorder %v5908_v49, %v7433_v23  ;;  %vm1330_vm5 = vcmp.eq.s32.totalorder %v5892_v43, %v7267_v25  ;;  %vm1331_vm7 = vcmp.eq.s32.totalorder %v5902_v46, %v7267_v25  ;;  %2925 = vmatmul.mubr.f32.gmra.mrb[4].mxu0 %v2730_v48  ;;  %3070 = vmatmul.mubr.f32.gmra.mrb[4].mxu1 %v2732_v29  ;;  %v7687_v23 = vld [vmem:[%s5549_s21 + $0x68] sm:$0xff] }
 0x172   : > { %v4455_v56 = vsel %vm1630_vm6, 1.0, %v9840_v28  ;;  %v4456_v63 = vsel %vm1631_vm9, 1.0, %v9840_v28  ;;  %vm1332_vm8 = vcmp.eq.s32.totalorder %v5905_v47, %v7267_v25  ;;  %vm1333_vm0 = vcmp.eq.s32.totalorder %v5908_v49, %v7267_v25 }
 0x173   : > { %v4457_v40 = vsel %vm1632_vm10, 1.0, %v9840_v28  ;;  %v4458_v35 = vsel %vm1633_vm11, 1.0, %v9840_v28  ;;  %v7658_v13 = vsel %vm1650_vm4, 1.0, %v9840_v28  ;;  %v7664_v25 = vsel %vm1651_vm12, 1.0, %v9840_v28 }
 0x174   : > { %v7670_v31 = vsel %vm1652_vm13, 1.0, %v9840_v28  ;;  %v7673_v1 = vsel %vm1653_vm14, 1.0, %v9840_v28  ;;  %v4395_v50 = vsel %vm1330_vm5, 1.0, %v9840_v28  ;;  %v4396_v0 = vsel %vm1331_vm7, 1.0, %v9840_v28  ;;  %5116 = vset.pattern.permute.xlu1 %v9857_v37 }
 0x175   : > { %v4397_v54 = vsel %vm1332_vm8, 1.0, %v9840_v28  ;;  %v4398_v3 = vsel %vm1333_vm0, 1.0, %v9840_v28  ;;  %vm1654_vm1 = vcmp.eq.s32.totalorder %v5892_v43, %v7483_v15  ;;  %vm1655_vm15 = vcmp.eq.s32.totalorder %v5902_v46, %v7483_v15  ;;  %1002 = vperm.xlu1 %5116, %v7687_v23  }
 0x176   : > { %v7678_v55 = vpop.permute.xlu1 %2495  ;;  %vm1656_vm2 = vcmp.eq.s32.totalorder %v5905_v47, %v7483_v15  ;;  %vm1657_vm3 = vcmp.eq.s32.totalorder %v5908_v49, %v7483_v15  ;;  %vm1658_vm6 = vcmp.eq.s32.totalorder %v5892_v43, %v7550_v20  ;;  %vm1659_vm9 = vcmp.eq.s32.totalorder %v5902_v46, %v7550_v20 }
 0x177   : > { %v1522_v30 = vadd.f32 %v4395_v50, %v9939_v21  ;;  %v1523_v6 = vadd.f32 %v4396_v0, %v9940_v11  ;;  %vm1660_vm10 = vcmp.eq.s32.totalorder %v5905_v47, %v7550_v20  ;;  %vm1661_vm11 = vcmp.eq.s32.totalorder %v5908_v49, %v7550_v20 }
 0x178   : > { %v1524_v15 = vadd.f32 %v4397_v54, %v9941_v17  ;;  %v1525_v12 = vadd.f32 %v4398_v3, %v9942_v19  ;;  %v7709_v39 = vsel %vm1654_vm1, 1.0, %v9840_v28  ;;  %v7712_v27 = vsel %vm1655_vm15, 1.0, %v9840_v28  ;;  %v7752_v19 = vpop.permute.xlu0 %1610 }
 0x179   : > { %v7715_v44 = vsel %vm1656_vm2, 1.0, %v9840_v28  ;;  %v7718_v48 = vsel %vm1657_vm3, 1.0, %v9840_v28  ;;  %v7721_v29 = vsel %vm1658_vm6, 1.0, %v9840_v28  ;;  %v7724_v20 = vsel %vm1659_vm9, 1.0, %v9840_v28  ;;  %5117 = vset.pattern.permute.xlu1 %v9863_v60  ;;  %9949 = vst [vmem:[#allocation16_spill] sm:$0xff] %v7752_v19 }
 0x17a   : > { %9943 = vst [vmem:[#allocation52_spill] sm:$0xff] %v7715_v44  ;;  %9944 = vst [vmem:[#allocation53_spill] sm:$0xff] %v7718_v48  ;;  %v7730_v0 = vsel %vm1660_vm10, 1.0, %v9840_v28  ;;  %v7733_v54 = vsel %vm1661_vm11, 1.0, %v9840_v28  ;;  %vm1934_vm4 = vcmp.eq.s32.totalorder %v5892_v43, %v7302_v41  ;;  %vm1935_vm12 = vcmp.eq.s32.totalorder %v5902_v46, %v7302_v41  ;;  %2212 = vperm.xlu1 %5117, %v7263_v18  }
 0x17b   : > { %9945 = vst [vmem:[#allocation18_spill] sm:$0xff] %v7721_v29  ;;  %9946 = vst [vmem:[#allocation27_spill] sm:$0xff] %v7724_v20  ;;  %v7727_v50 = vpop.permute.xlu1 %984  ;;  %v1822_v3 = vadd.f32 %v4455_v56, %v7521_v24  ;;  %v1823_v21 = vadd.f32 %v4456_v63, %v7524_v57  ;;  %vm1936_vm13 = vcmp.eq.s32.totalorder %v5905_v47, %v7302_v41  ;;  %v4519_v24 = vsel %vm1934_vm4, 1.0, %v9840_v28 }
 0x17c   : > { %9947 = vst [vmem:[#allocation15_spill] sm:$0xff] %v7730_v0  ;;  %9948 = vst [vmem:[#allocation50_spill] sm:$0xff] %v7733_v54  ;;  %vm1937_vm14 = vcmp.eq.s32.totalorder %v5908_v49, %v7302_v41  ;;  %v1824_v11 = vadd.f32 %v4457_v40, %v7531_v10  ;;  %v1825_v17 = vadd.f32 %v4458_v35, %v7538_v62  ;;  %v4520_v57 = vsel %vm1935_vm12, 1.0, %v9840_v28 }
 0x17d   : > { %vm1634_vm5 = vcmp.eq.s32.totalorder %v5892_v43, %v7359_v51  ;;  %vm1635_vm7 = vcmp.eq.s32.totalorder %v5902_v46, %v7359_v51  ;;  %vm1636_vm8 = vcmp.eq.s32.totalorder %v5905_v47, %v7359_v51  ;;  %vm1637_vm0 = vcmp.eq.s32.totalorder %v5908_v49, %v7359_v51 }
 0x17e   : > { %v4521_v41 = vsel %vm1936_vm13, 1.0, %v9840_v28  ;;  %v4522_v10 = vsel %vm1937_vm14, 1.0, %v9840_v28  ;;  %vm1662_vm1 = vcmp.eq.s32.totalorder %v5892_v43, %v7619_v34  ;;  %vm1663_vm15 = vcmp.eq.s32.totalorder %v5902_v46, %v7619_v34  ;;  %5118 = vset.pattern.permute.xlu1 %v9839_v5 }
 0x17f   : > { %vm1664_vm2 = vcmp.eq.s32.totalorder %v5905_v47, %v7619_v34  ;;  %vm1665_vm3 = vcmp.eq.s32.totalorder %v5908_v49, %v7619_v34  ;;  %v4459_v51 = vsel %vm1634_vm5, 1.0, %v9840_v28  ;;  %v4460_v56 = vsel %vm1635_vm7, 1.0, %v9840_v28  ;;  %1306 = vperm.xlu1 %5118, %v7687_v23  }
 0x180   : > { %v7767_v62 = vpop.permute.xlu1 %2194  ;;  %v2126_v63 = vadd.f32 %v4519_v24, %v1822_v3  ;;  %v2127_v40 = vadd.f32 %v4520_v57, %v1823_v21  ;;  %v4461_v35 = vsel %vm1636_vm8, 1.0, %v9840_v28  ;;  %v4462_v54 = vsel %vm1637_vm0, 1.0, %v9840_v28  ;;  %v7790_v24 = vpop.permute.xlu0 %1613 }
 0x181   : > { %v2128_v0 = vadd.f32 %v4521_v41, %v1824_v11  ;;  %v2129_v20 = vadd.f32 %v4522_v10, %v1825_v17  ;;  %v7779_v29 = vsel %vm1662_vm1, 1.0, %v9840_v28  ;;  %v7782_v19 = vsel %vm1663_vm15, 1.0, %v9840_v28  ;;  %9953 = vst [vmem:[#allocation21_spill] sm:$0xff] %v7790_v24  ;;  %v7838_v24 = vld [vmem:[%s5549_s21 + $0x70] sm:$0xff] }
 0x182   : > { %9950 = vst [vmem:[#allocation51_spill] sm:$0xff] %v7782_v19  ;;  %v7785_v34 = vsel %vm1664_vm2, 1.0, %v9840_v28  ;;  %v7788_v48 = vsel %vm1665_vm3, 1.0, %v9840_v28  ;;  %v1826_v3 = vadd.f32 %v4459_v51, %v1522_v30  ;;  %v1827_v21 = vadd.f32 %v4460_v56, %v1523_v6 }
 0x183   : > { %9951 = vst [vmem:[#allocation17_spill] sm:$0xff] %v7785_v34  ;;  %9952 = vst [vmem:[#allocation20_spill] sm:$0xff] %v7788_v48  ;;  %v1828_v57 = vadd.f32 %v4461_v35, %v1524_v15  ;;  %v1829_v44 = vadd.f32 %v4462_v54, %v1525_v12  ;;  %vm2239_vm6 = vcmp.eq.s32.totalorder %v5902_v46, %v7407_v9  ;;  %5119 = vset.pattern.permute.xlu1 %v9845_v53 }
 0x184   : > { %vm2241_vm9 = vcmp.eq.s32.totalorder %v5908_v49, %v7407_v9  ;;  %vm1666_vm10 = vcmp.eq.s32.totalorder %v5892_v43, %v7698_v4  ;;  %vm1667_vm11 = vcmp.eq.s32.totalorder %v5902_v46, %v7698_v4  ;;  %vm2238_vm4 = vcmp.eq.s32.totalorder %v5892_v43, %v7407_v9  ;;  %2516 = vperm.xlu1 %5119, %v7263_v18   ;;  %v1891_v17 = vpop.permute.xlu0 %1890 }
 0x185   : > { %v7797_v11 = vpop.permute.xlu1 %1288  ;;  %vm2240_vm12 = vcmp.eq.s32.totalorder %v5905_v47, %v7407_v9  ;;  %vm1938_vm13 = vcmp.eq.s32.totalorder %v5892_v43, %v7448_v61  ;;  %vm1939_vm14 = vcmp.eq.s32.totalorder %v5902_v46, %v7448_v61  ;;  %vm1940_vm5 = vcmp.eq.s32.totalorder %v5905_v47, %v7448_v61 }
 0x186   : > { %vm1941_vm7 = vcmp.eq.s32.totalorder %v5908_v49, %v7448_v61  ;;  %v4584_v30 = vsel %vm2239_vm6, 1.0, %v9840_v28  ;;  %v4586_v6 = vsel %vm2241_vm9, 1.0, %v9840_v28  ;;  %vm2543_vm8 = vcmp.eq.s32.totalorder %v5902_v46, %v7496_v52 }
 0x187   : > { %vm2545_vm0 = vcmp.eq.s32.totalorder %v5908_v49, %v7496_v52  ;;  %v4583_v18 = vsel %vm2238_vm4, 1.0, %v9840_v28  ;;  %v4585_v9 = vsel %vm2240_vm12, 1.0, %v9840_v28  ;;  %vm2542_vm1 = vcmp.eq.s32.totalorder %v5892_v43, %v7496_v52 }
 0x188   : > { %vm2544_vm15 = vcmp.eq.s32.totalorder %v5905_v47, %v7496_v52  ;;  %v4523_v61 = vsel %vm1938_vm13, 1.0, %v9840_v28  ;;  %v4524_v15 = vsel %vm1939_vm14, 1.0, %v9840_v28  ;;  %v4525_v12 = vsel %vm1940_vm5, 1.0, %v9840_v28  ;;  %5120 = vset.pattern.permute.xlu1 %v9857_v37 }
 0x189   : > { %v4526_v54 = vsel %vm1941_vm7, 1.0, %v9840_v28  ;;  %v2431_v10 = vadd.f32 %v4584_v30, %v2127_v40  ;;  %v4648_v51 = vsel %vm2543_vm8, 1.0, %v9840_v28  ;;  %v2433_v56 = vadd.f32 %v4586_v6, %v2129_v20  ;;  %1005 = vperm.xlu1 %5120, %v7838_v24  }
 0x18a   : > { %v7833_v41 = vpop.permute.xlu1 %2498  ;;  %v4650_v35 = vsel %vm2545_vm0, 1.0, %v9840_v28  ;;  %v2430_v48 = vadd.f32 %v4583_v18, %v2126_v63  ;;  %v4647_v34 = vsel %vm2542_vm1, 1.0, %v9840_v28  ;;  %v2432_v19 = vadd.f32 %v4585_v9, %v2128_v0 }
 0x18b   : > { %v4649_v40 = vsel %vm2544_vm15, 1.0, %v9840_v28  ;;  %vm1942_vm2 = vcmp.eq.s32.totalorder %v5892_v43, %v1891_v17  ;;  %vm1943_vm3 = vcmp.eq.s32.totalorder %v5902_v46, %v1891_v17  ;;  %v2735_v20 = vadd.f32 %v4648_v51, %v2431_v10 }
 0x18c   : > { %v2737_v30 = vadd.f32 %v4650_v35, %v2433_v56  ;;  %vm1944_vm6 = vcmp.eq.s32.totalorder %v5905_v47, %v1891_v17  ;;  %vm1945_vm9 = vcmp.eq.s32.totalorder %v5908_v49, %v1891_v17  ;;  %v2734_v63 = vadd.f32 %v4647_v34, %v2430_v48 }
 0x18d   : > { %v2736_v6 = vadd.f32 %v4649_v40, %v2432_v19  ;;  %v7857_v0 = vsel %vm1666_vm10, 1.0, %v9840_v28  ;;  %v7863_v52 = vsel %vm1667_vm11, 1.0, %v9840_v28  ;;  %v2130_v18 = vadd.f32 %v4523_v61, %v1826_v3  ;;  %2929 = vmatprep.mubr.f32.mxu0 %v2735_v20  ;;  %5121 = vset.pattern.permute.xlu1 %v9863_v60  ;;  %v9957_v40 = vld [vmem:[#allocation24_spill] sm:$0xff] }
 0x18e   : > { %9954 = vst [vmem:[#allocation36_spill] sm:$0xff] %v7857_v0  ;;  %9955 = vst [vmem:[#allocation73_spill] sm:$0xff] %v7863_v52  ;;  %v2131_v9 = vadd.f32 %v4524_v15, %v1827_v21  ;;  %3074 = vmatprep.mubr.f32.mxu1 %v2737_v30  ;;  %v2132_v48 = vadd.f32 %v4525_v12, %v1828_v57  ;;  %v2133_v19 = vadd.f32 %v4526_v54, %v1829_v44  ;;  %v9958_v30 = vld [vmem:[#allocation25_spill] sm:$0xff] }
 0x18f   : > { %v7865_v10 = vpop.permute.xlu1 %987  ;;  %v4527_v34 = vsel %vm1942_vm2, 1.0, %v9840_v28  ;;  %v4528_v51 = vsel %vm1943_vm3, 1.0, %v9840_v28  ;;  %2930 = vmatmul.mubr.f32.gmra.mrb[6].mxu0 %v2734_v63  ;;  %3075 = vmatmul.mubr.f32.gmra.mrb[6].mxu1 %v2736_v6  ;;  %v4529_v3 = vsel %vm1944_vm6, 1.0, %v9840_v28  ;;  %v4530_v21 = vsel %vm1945_vm9, 1.0, %v9840_v28  ;;  %v9959_v6 = vld [vmem:[#allocation26_spill] sm:$0xff] }
 0x190   : > { %vm1338_vm10 = vcmp.eq.s32.totalorder %v5892_v43, %v7609_v2  ;;  %vm1339_vm11 = vcmp.eq.s32.totalorder %v5902_v46, %v7609_v2  ;;  %vm1668_vm4 = vcmp.eq.s32.totalorder %v5905_v47, %v7698_v4  ;;  %vm2242_vm12 = vcmp.eq.s32.totalorder %v5892_v43, %v7553_v36  ;;  %2215 = vperm.xlu1 %5121, %v7445_v58  }
 0x191   : > { %vm2243_vm13 = vcmp.eq.s32.totalorder %v5902_v46, %v7553_v36  ;;  %vm1340_vm14 = vcmp.eq.s32.totalorder %v5905_v47, %v7609_v2  ;;  %vm1341_vm5 = vcmp.eq.s32.totalorder %v5908_v49, %v7609_v2  ;;  %vm1669_vm7 = vcmp.eq.s32.totalorder %v5908_v49, %v7698_v4  ;;  %v9956_v2 = vld [vmem:[#allocation23_spill] sm:$0xff] }
 0x192   : > { %v7898_v44 = vadd.f32 %v4527_v34, %v7499_v14  ;;  %v7901_v57 = vadd.f32 %v4528_v51, %v7502_v59  ;;  %vm2244_vm8 = vcmp.eq.s32.totalorder %v5905_v47, %v7553_v36  ;;  %vm2245_vm0 = vcmp.eq.s32.totalorder %v5908_v49, %v7553_v36  ;;  %v1894_v51 = vpop.permute.xlu0 %1893 }
 0x193   : > { %v7908_v61 = vadd.f32 %v4529_v3, %v7515_v42  ;;  %v7911_v15 = vadd.f32 %v4530_v21, %v7518_v22  ;;  %v4403_v14 = vsel %vm1338_vm10, 1.0, %v9840_v28  ;;  %v4404_v59 = vsel %vm1339_vm11, 1.0, %v9840_v28 }
 0x194   : > { %v7921_v12 = vpop.permute.xlu1 %2197  ;;  %v4587_v36 = vsel %vm2242_vm12, 1.0, %v9840_v28  ;;  %v4588_v42 = vsel %vm2243_vm13, 1.0, %v9840_v28  ;;  %v4405_v54 = vsel %vm1340_vm14, 1.0, %v9840_v28  ;;  %v4406_v22 = vsel %vm1341_vm5, 1.0, %v9840_v28  ;;  %5122 = vset.pattern.permute.xlu1 %v9839_v5 }
 0x195   : > { %v4589_v17 = vsel %vm2244_vm8, 1.0, %v9840_v28  ;;  %v4590_v56 = vsel %vm2245_vm0, 1.0, %v9840_v28  ;;  %vm2547_vm1 = vcmp.eq.s32.totalorder %v5902_v46, %v7678_v55  ;;  %vm1038_vm15 = vcmp.eq.s32.totalorder %v5892_v43, %v7727_v50  ;;  %1309 = vperm.xlu1 %5122, %v7838_v24  }
 0x196   : > { %v1530_v35 = vadd.f32 %v4403_v14, %v9956_v2  ;;  %v1531_v20 = vadd.f32 %v4404_v59, %v9957_v40  ;;  %vm2546_vm2 = vcmp.eq.s32.totalorder %v5892_v43, %v7678_v55  ;;  %vm2549_vm3 = vcmp.eq.s32.totalorder %v5908_v49, %v7678_v55 }
 0x197   : > { %v1532_v63 = vadd.f32 %v4405_v54, %v9958_v30  ;;  %v1533_v34 = vadd.f32 %v4406_v22, %v9959_v6  ;;  %vm2548_vm6 = vcmp.eq.s32.totalorder %v5905_v47, %v7678_v55  ;;  %vm1040_vm9 = vcmp.eq.s32.totalorder %v5905_v47, %v7727_v50 }
 0x198   : > { %v4343_v3 = vsel %vm1038_vm15, 1.0, %v9840_v28  ;;  %v2435_v21 = vadd.f32 %v4588_v42, %v2131_v9  ;;  %v4652_v14 = vsel %vm2547_vm1, 1.0, %v9840_v28  ;;  %v2437_v59 = vadd.f32 %v4590_v56, %v2133_v19 }
 0x199   : > { %v7949_v2 = vpop.permute.xlu1 %1291  ;;  %v4654_v40 = vsel %vm2549_vm3, 1.0, %v9840_v28  ;;  %v2434_v54 = vadd.f32 %v4587_v36, %v2130_v18  ;;  %v4651_v22 = vsel %vm2546_vm2, 1.0, %v9840_v28  ;;  %v2436_v30 = vadd.f32 %v4589_v17, %v2132_v48  ;;  %5123 = vset.pattern.permute.xlu1 %v9845_v53  ;;  %v9961_v48 = vld [vmem:[#allocation55_spill] sm:$0xff] }
 0x19a   : > { %v4345_v55 = vsel %vm1040_vm9, 1.0, %v9840_v28  ;;  %v2739_v6 = vadd.f32 %v4652_v14, %v2435_v21  ;;  %v2741_v52 = vadd.f32 %v4654_v40, %v2437_v59  ;;  %v4653_v0 = vsel %vm2548_vm6, 1.0, %v9840_v28  ;;  %2519 = vperm.xlu1 %5123, %v7445_v58  }
 0x19b   : > { %vm1946_vm10 = vcmp.eq.s32.totalorder %v5892_v43, %v1894_v51  ;;  %vm1947_vm11 = vcmp.eq.s32.totalorder %v5902_v46, %v1894_v51  ;;  %v2738_v9 = vadd.f32 %v4651_v22, %v2434_v54  ;;  %v2740_v19 = vadd.f32 %v4653_v0, %v2436_v30  ;;  %v9963_v0 = vld [vmem:[#allocation57_spill] sm:$0xff] }
 0x19c   : > { %v7963_v18 = vsel %vm1668_vm4, 1.0, %v9840_v28  ;;  %vm1948_vm12 = vcmp.eq.s32.totalorder %v5905_v47, %v1894_v51  ;;  %vm1039_vm13 = vcmp.eq.s32.totalorder %v5902_v46, %v7727_v50  ;;  %v1230_v36 = vadd.f32 %v4343_v3, %v9961_v48  ;;  %2934 = vmatprep.mubr.f32.mxu0 %v2739_v6  ;;  %3079 = vmatprep.mubr.f32.mxu1 %v2741_v52 }
 0x19d   : > { %9960 = vst [vmem:[#allocation23_spill] sm:$0xff] %v7963_v18  ;;  %v7973_v58 = vsel %vm1669_vm7, 1.0, %v9840_v28  ;;  %v1232_v42 = vadd.f32 %v4345_v55, %v9963_v0  ;;  %2935 = vmatmul.mubr.f32.gmra.mrb[8].mxu0 %v2738_v9  ;;  %3080 = vmatmul.mubr.f32.gmra.mrb[8].mxu1 %v2740_v19  ;;  %vm1342_vm4 = vcmp.eq.s32.totalorder %v5892_v43, %v7797_v11  ;;  %v4531_v21 = vsel %vm1946_vm10, 1.0, %v9840_v28  ;;  %v9967_v9 = vld [vmem:[#allocation29_spill] sm:$0xff]  ;;  %v9968_v19 = vld [vmem:[#allocation60_spill] sm:$0xff]  ;;  %v9969_v0 = vld [vmem:[#allocation30_spill] sm:$0xff] }
 0x19e   : > { %9962 = vst [vmem:[#allocation24_spill] sm:$0xff] %v7973_v58  ;;  %vm1344_vm14 = vcmp.eq.s32.totalorder %v5905_v47, %v7797_v11  ;;  %v7980_v17 = vpop.permute.xlu1 %2501  ;;  %v1834_v52 = vadd.f32 %v7546_v7, %v1530_v35  ;;  %v7984_v56 = vadd.f32 %v7568_v45, %v1531_v20  ;;  %v4407_v4 = vsel %vm1342_vm4, 1.0, %v9840_v28  ;;  %5124 = vset.pattern.permute.xlu1 %v9857_v37  ;;  %v8004_v45 = vld [vmem:[%s5549_s21 + $0x78] sm:$0xff] }
 0x19f   : > { %v4409_v3 = vsel %vm1344_vm14, 1.0, %v9840_v28  ;;  %vm1949_vm5 = vcmp.eq.s32.totalorder %v5908_v49, %v1894_v51  ;;  %v1534_v14 = vadd.f32 %v4407_v4, %v1230_v36  ;;  %vm1041_vm7 = vcmp.eq.s32.totalorder %v5908_v49, %v7727_v50  ;;  %1008 = vperm.xlu1 %5124, %v8004_v45   ;;  %v9966_v50 = vld [vmem:[#allocation59_spill] sm:$0xff] }
 0x1a0   : > { %v1536_v59 = vadd.f32 %v4409_v3, %v1232_v42  ;;  %v4344_v7 = vsel %vm1039_vm13, 1.0, %v9840_v28  ;;  %vm2246_vm8 = vcmp.eq.s32.totalorder %v5892_v43, %v7767_v62  ;;  %vm2247_vm0 = vcmp.eq.s32.totalorder %v5902_v46, %v7767_v62  ;;  %v9970_v42 = vld [vmem:[#allocation61_spill] sm:$0xff] }
 0x1a1   : > { %vm2248_vm1 = vcmp.eq.s32.totalorder %v5905_v47, %v7767_v62  ;;  %vm2249_vm15 = vcmp.eq.s32.totalorder %v5908_v49, %v7767_v62  ;;  %v8012_v37 = vadd.f32 %v7594_v38, %v1534_v14  ;;  %v8018_v20 = vadd.f32 %v7574_v16, %v1532_v63  ;;  %v9964_v63 = vld [vmem:[#allocation56_spill] sm:$0xff] }
 0x1a2   : > { %v8015_v35 = vadd.f32 %v7600_v8, %v1536_v59  ;;  %v8021_v40 = vadd.f32 %v7585_v26, %v1533_v34  ;;  %v8026_v54 = vsel %vm1947_vm11, 1.0, %v9840_v28  ;;  %v8031_v22 = vsel %vm1948_vm12, 1.0, %v9840_v28 }
 0x1a3   : > { %v8033_v38 = vpop.permute.xlu1 %990  ;;  %v8038_v16 = vsel %vm1949_vm5, 1.0, %v9840_v28  ;;  %v8040_v8 = vadd.f32 %v4531_v21, %v1834_v52  ;;  %v4346_v26 = vsel %vm1041_vm7, 1.0, %v9840_v28  ;;  %v8047_v34 = vadd.f32 %v4344_v7, %v9964_v63  ;;  %5126 = vset.pattern.permute.xlu1 %v9863_v60  ;;  %v9965_v60 = vld [vmem:[#allocation28_spill] sm:$0xff] }
 0x1a4   : > { %v4591_v30 = vsel %vm2246_vm8, 1.0, %v9840_v28  ;;  %v4592_v51 = vsel %vm2247_vm0, 1.0, %v9840_v28  ;;  %v4593_v55 = vsel %vm2248_vm1, 1.0, %v9840_v28  ;;  %v4594_v6 = vsel %vm2249_vm15, 1.0, %v9840_v28  ;;  %2218 = vperm.xlu1 %5126, %v7687_v23  }
 0x1a5   : > { %vm1343_vm2 = vcmp.eq.s32.totalorder %v5902_v46, %v7797_v11  ;;  %vm1345_vm3 = vcmp.eq.s32.totalorder %v5908_v49, %v7797_v11  ;;  %vm2550_vm6 = vcmp.eq.s32.totalorder %v5892_v43, %v7833_v41  ;;  %vm2551_vm9 = vcmp.eq.s32.totalorder %v5902_v46, %v7833_v41 }
 0x1a6   : > { %vm2552_vm10 = vcmp.eq.s32.totalorder %v5905_v47, %v7833_v41  ;;  %vm1042_vm11 = vcmp.eq.s32.totalorder %v5892_v43, %v7865_v10  ;;  %vm1043_vm12 = vcmp.eq.s32.totalorder %v5902_v46, %v7865_v10  ;;  %vm1044_vm13 = vcmp.eq.s32.totalorder %v5905_v47, %v7865_v10 }
 0x1a7   : > { %vm2553_vm4 = vcmp.eq.s32.totalorder %v5908_v49, %v7833_v41  ;;  %v930_v62 = vadd.f32 %v9966_v50, %v9965_v60  ;;  %v931_v48 = vadd.f32 %v9968_v19, %v9967_v9  ;;  %vm1045_vm14 = vcmp.eq.s32.totalorder %v5908_v49, %v7865_v10  ;;  %v9972_v9 = vld [vmem:[#allocation62_spill] sm:$0xff] }
 0x1a8   : > { %v8085_v36 = vpop.permute.xlu1 %2200  ;;  %v932_v52 = vadd.f32 %v9970_v42, %v9969_v0  ;;  %v4347_v4 = vsel %vm1042_vm11, 1.0, %v9840_v28  ;;  %v4348_v3 = vsel %vm1043_vm12, 1.0, %v9840_v28  ;;  %v4349_v21 = vsel %vm1044_vm13, 1.0, %v9840_v28  ;;  %5127 = vset.pattern.permute.xlu1 %v9839_v5 }
 0x1a9   : > { %v4350_v14 = vsel %vm1045_vm14, 1.0, %v9840_v28  ;;  %v2439_v59 = vadd.f32 %v4592_v51, %v7901_v57  ;;  %v4656_v10 = vsel %vm2551_vm9, 1.0, %v9840_v28  ;;  %v2441_v7 = vadd.f32 %v4594_v6, %v7911_v15  ;;  %1312 = vperm.xlu1 %5127, %v8004_v45   ;;  %v9971_v51 = vld [vmem:[#allocation31_spill] sm:$0xff] }
 0x1aa   : > { %v4658_v63 = vsel %vm2553_vm4, 1.0, %v9840_v28  ;;  %v2438_v60 = vadd.f32 %v4591_v30, %v7898_v44  ;;  %v4655_v50 = vsel %vm2550_vm6, 1.0, %v9840_v28  ;;  %v2440_v57 = vadd.f32 %v4593_v55, %v7908_v61  ;;  %v9973_v44 = vld [vmem:[#allocation58_spill] sm:$0xff] }
 0x1ab   : > { %v933_v19 = vadd.f32 %v9972_v9, %v9971_v51  ;;  %v2743_v0 = vadd.f32 %v4656_v10, %v2439_v59  ;;  %v2745_v15 = vadd.f32 %v4658_v63, %v2441_v7  ;;  %v4657_v5 = vsel %vm2552_vm10, 1.0, %v9840_v28 }
 0x1ac   : > { %v1233_v30 = vadd.f32 %v4346_v26, %v9973_v44  ;;  %v1234_v6 = vadd.f32 %v4347_v4, %v930_v62  ;;  %v2742_v42 = vadd.f32 %v4655_v50, %v2438_v60  ;;  %v2744_v58 = vadd.f32 %v4657_v5, %v2440_v57 }
 0x1ad   : > { %v8115_v18 = vpop.permute.xlu1 %1294  ;;  %v4408_v61 = vsel %vm1343_vm2, 1.0, %v9840_v28  ;;  %v1235_v55 = vadd.f32 %v4348_v3, %v931_v48  ;;  %v1236_v59 = vadd.f32 %v4349_v21, %v932_v52  ;;  %v1237_v10 = vadd.f32 %v4350_v14, %v933_v19  ;;  %2939 = vmatprep.mubr.f32.mxu0 %v2743_v0  ;;  %3084 = vmatprep.mubr.f32.mxu1 %v2745_v15  ;;  %v8140_v21 = vpop.permute.xlu0 %1896 }
 0x1ae   : > { %v4410_v41 = vsel %vm1345_vm3, 1.0, %v9840_v28  ;;  %2940 = vmatmul.mubr.f32.gmra.mrb[10].mxu0 %v2742_v42  ;;  %3085 = vmatmul.mubr.f32.gmra.mrb[10].mxu1 %v2744_v58  ;;  %vm1346_vm5 = vcmp.eq.s32.totalorder %v5892_v43, %v7949_v2  ;;  %vm1347_vm7 = vcmp.eq.s32.totalorder %v5902_v46, %v7949_v2  ;;  %vm1348_vm8 = vcmp.eq.s32.totalorder %v5905_v47, %v7949_v2 }
 0x1af   : > { %vm1349_vm0 = vcmp.eq.s32.totalorder %v5908_v49, %v7949_v2  ;;  %v4411_v26 = vsel %vm1346_vm5, 1.0, %v9840_v28  ;;  %v4412_v62 = vsel %vm1347_vm7, 1.0, %v9840_v28  ;;  %v4413_v11 = vsel %vm1348_vm8, 1.0, %v9840_v28  ;;  %5128 = vset.pattern.permute.xlu1 %v9845_v53 }
 0x1b0   : > { %v4414_v58 = vsel %vm1349_vm0, 1.0, %v9840_v28  ;;  %v1538_v48 = vadd.f32 %v4411_v26, %v1234_v6  ;;  %v1539_v52 = vadd.f32 %v4412_v62, %v1235_v55  ;;  %v1540_v4 = vadd.f32 %v4413_v11, %v1236_v59  ;;  %2522 = vperm.xlu1 %5128, %v7687_v23   ;;  %v9977_v62 = vld [vmem:[#allocation64_spill] sm:$0xff] }
 0x1b1   : > { %v1535_v3 = vadd.f32 %v4408_v61, %v8047_v34  ;;  %vm2250_vm1 = vcmp.eq.s32.totalorder %v5892_v43, %v7921_v12  ;;  %vm2251_vm15 = vcmp.eq.s32.totalorder %v5902_v46, %v7921_v12  ;;  %v1541_v2 = vadd.f32 %v4414_v58, %v1237_v10  ;;  %v9978_v58 = vld [vmem:[#allocation65_spill] sm:$0xff] }
 0x1b2   : > { %v8146_v14 = vpop.permute.xlu1 %2504  ;;  %vm2253_vm2 = vcmp.eq.s32.totalorder %v5908_v49, %v7921_v12  ;;  %v8151_v7 = vadd.f32 %v7658_v13, %v1538_v48  ;;  %v8154_v23 = vadd.f32 %v7664_v25, %v1539_v52  ;;  %v8157_v34 = vadd.f32 %v7670_v31, %v1540_v4  ;;  %v9979_v52 = vld [vmem:[#allocation66_spill] sm:$0xff] }
 0x1b3   : > { %v2139_v63 = vadd.f32 %v8026_v54, %v7984_v56  ;;  %v2140_v60 = vadd.f32 %v8031_v22, %v8018_v20  ;;  %v2141_v50 = vadd.f32 %v8038_v16, %v8021_v40  ;;  %v8166_v57 = vadd.f32 %v7673_v1, %v1541_v2 }
 0x1b4   : > { %v1537_v13 = vadd.f32 %v4410_v41, %v1233_v30  ;;  %vm1950_vm3 = vcmp.eq.s32.totalorder %v5892_v43, %v8140_v21  ;;  %vm1951_vm6 = vcmp.eq.s32.totalorder %v5902_v46, %v8140_v21  ;;  %vm2252_vm9 = vcmp.eq.s32.totalorder %v5905_v47, %v7921_v12 }
 0x1b5   : > { %v9974_v25 = vmov 4   ;;  %v8176_v31 = vadd.f32 %v7597_v32, %v1535_v3  ;;  %v4595_v1 = vsel %vm2250_vm1, 1.0, %v9840_v28  ;;  %v4596_v56 = vsel %vm2251_vm15, 1.0, %v9840_v28 }
 0x1b6   : > { %5129 = vset.pattern.permute.xlu1 %v9974_v25  ;;  %v4598_v20 = vsel %vm2253_vm2, 1.0, %v9840_v28  ;;  %vm1952_vm10 = vcmp.eq.s32.totalorder %v5905_v47, %v8140_v21  ;;  %vm2555_vm11 = vcmp.eq.s32.totalorder %v5902_v46, %v7980_v17  ;;  %vm1046_vm12 = vcmp.eq.s32.totalorder %v5892_v43, %v8033_v38 }
 0x1b7   : > { %1616 = vperm.xlu1 %5129, %v8004_v45   ;;  %vm1047_vm13 = vcmp.eq.s32.totalorder %v5902_v46, %v8033_v38  ;;  %vm1048_vm4 = vcmp.eq.s32.totalorder %v5905_v47, %v8033_v38  ;;  %v8201_v32 = vpop.permute.xlu1 %993  ;;  %v4597_v12 = vsel %vm2252_vm9, 1.0, %v9840_v28  ;;  %vm2554_vm14 = vcmp.eq.s32.totalorder %v5892_v43, %v7980_v17 }
 0x1b8   : > { %vm2557_vm5 = vcmp.eq.s32.totalorder %v5908_v49, %v7980_v17  ;;  %vm1049_vm7 = vcmp.eq.s32.totalorder %v5908_v49, %v8033_v38  ;;  %vm2556_vm8 = vcmp.eq.s32.totalorder %v5905_v47, %v7980_v17  ;;  %v4351_v40 = vsel %vm1046_vm12, 1.0, %v9840_v28 }
 0x1b9   : > { %v4352_v54 = vsel %vm1047_vm13, 1.0, %v9840_v28  ;;  %v4353_v22 = vsel %vm1048_vm4, 1.0, %v9840_v28  ;;  %v4354_v16 = vsel %vm1049_vm7, 1.0, %v9840_v28  ;;  %v2443_v51 = vadd.f32 %v4596_v56, %v2139_v63 }
 0x1ba   : > { %v4660_v9 = vsel %vm2555_vm11, 1.0, %v9840_v28  ;;  %v2445_v19 = vadd.f32 %v4598_v20, %v2141_v50  ;;  %v9975_v0 = vmov 5   ;;  %v4662_v15 = vsel %vm2557_vm5, 1.0, %v9840_v28 }
 0x1bb   : > { %5131 = vset.pattern.permute.xlu1 %v9975_v0  ;;  %v2442_v38 = vadd.f32 %v4595_v1, %v8040_v8  ;;  %v4659_v5 = vsel %vm2554_vm14, 1.0, %v9840_v28  ;;  %v2444_v44 = vadd.f32 %v4597_v12, %v2140_v60  ;;  %vm1953_vm0 = vcmp.eq.s32.totalorder %v5908_v49, %v8140_v21  ;;  %v9976_v8 = vld [vmem:[#allocation63_spill] sm:$0xff]  ;;  %v9980_v12 = vld [vmem:[#allocation52_spill] sm:$0xff]  ;;  %v9984_v0 = vld [vmem:[#allocation33_spill] sm:$0xff] }
 0x1bc   : > { %1920 = vperm.xlu1 %5131, %v8004_v45   ;;  %v2747_v30 = vadd.f32 %v4660_v9, %v2443_v51  ;;  %v2749_v6 = vadd.f32 %v4662_v15, %v2445_v19  ;;  %v4661_v42 = vsel %vm2556_vm8, 1.0, %v9840_v28  ;;  %v8228_v61 = vpop.permute.xlu1 %2203  ;;  %v1841_v55 = vadd.f32 %v7626_v33, %v1537_v13  ;;  %v9983_v9 = vld [vmem:[#allocation67_spill] sm:$0xff]  ;;  %v9985_v15 = vld [vmem:[#allocation68_spill] sm:$0xff] }
 0x1bd   : > { %v1238_v59 = vadd.f32 %v4351_v40, %v9976_v8  ;;  %v2746_v10 = vadd.f32 %v4659_v5, %v2442_v38  ;;  %v2748_v41 = vadd.f32 %v4661_v42, %v2444_v44  ;;  %v4535_v26 = vsel %vm1950_vm3, 1.0, %v9840_v28  ;;  %v9986_v5 = vld [vmem:[#allocation16_spill] sm:$0xff]  ;;  %v9987_v44 = vld [vmem:[#allocation34_spill] sm:$0xff] }
 0x1be   : > { %v1239_v11 = vadd.f32 %v4352_v54, %v9977_v62  ;;  %v1240_v48 = vadd.f32 %v4353_v22, %v9978_v58  ;;  %v1241_v17 = vadd.f32 %v4354_v16, %v9979_v52  ;;  %2944 = vmatprep.mubr.f32.mxu0 %v2747_v30  ;;  %3089 = vmatprep.mubr.f32.mxu1 %v2749_v6  ;;  %v4536_v33 = vsel %vm1951_vm6, 1.0, %v9840_v28  ;;  %v9981_v54 = vld [vmem:[#allocation53_spill] sm:$0xff]  ;;  %v9989_v52 = vld [vmem:[#allocation35_spill] sm:$0xff] }
 0x1bf   : > { %2945 = vmatmul.mubr.f32.gmra.mrb[12].mxu0 %v2746_v10  ;;  %3090 = vmatmul.mubr.f32.gmra.mrb[12].mxu1 %v2748_v41  ;;  %vm1350_vm1 = vcmp.eq.s32.totalorder %v5892_v43, %v8115_v18  ;;  %vm1351_vm15 = vcmp.eq.s32.totalorder %v5902_v46, %v8115_v18  ;;  %vm1352_vm2 = vcmp.eq.s32.totalorder %v5905_v47, %v8115_v18  ;;  %v4538_v1 = vsel %vm1953_vm0, 1.0, %v9840_v28  ;;  %v9988_v30 = vld [vmem:[#allocation69_spill] sm:$0xff] }
 0x1c0   : > { %vm1353_vm3 = vcmp.eq.s32.totalorder %v5908_v49, %v8115_v18  ;;  %v4415_v4 = vsel %vm1350_vm1, 1.0, %v9840_v28  ;;  %v4416_v3 = vsel %vm1351_vm15, 1.0, %v9840_v28  ;;  %v4417_v2 = vsel %vm1352_vm2, 1.0, %v9840_v28  ;;  %5132 = vset.pattern.permute.xlu1 %v9845_v53  ;;  %v8267_v53 = vpop.permute.xlu0 %1899 }
 0x1c1   : > { %v4418_v63 = vsel %vm1353_vm3, 1.0, %v9840_v28  ;;  %v1542_v60 = vadd.f32 %v4415_v4, %v1238_v59  ;;  %v1543_v50 = vadd.f32 %v4416_v3, %v1239_v11  ;;  %v1544_v13 = vadd.f32 %v4417_v2, %v1240_v48  ;;  %2525 = vperm.xlu1 %5132, %v7838_v24   ;;  %v8257_v25 = vpop.permute.xlu1 %1297 }
 0x1c2   : > { %v4537_v18 = vsel %vm1952_vm10, 1.0, %v9840_v28  ;;  %vm2254_vm6 = vcmp.eq.s32.totalorder %v5892_v43, %v8085_v36  ;;  %v1545_v56 = vadd.f32 %v4418_v63, %v1241_v17  ;;  %vm2255_vm9 = vcmp.eq.s32.totalorder %v5902_v46, %v8085_v36  ;;  %v9990_v17 = vld [vmem:[#allocation70_spill] sm:$0xff] }
 0x1c3   : > { %v8274_v24 = vadd.f32 %v7709_v39, %v1542_v60  ;;  %v8277_v20 = vadd.f32 %v7712_v27, %v1543_v50  ;;  %v8280_v40 = vadd.f32 %v9980_v12, %v1544_v13  ;;  %v2142_v21 = vadd.f32 %v4535_v26, %v8012_v37 }
 0x1c4   : > { %vm2256_vm10 = vcmp.eq.s32.totalorder %v5905_v47, %v8085_v36  ;;  %vm2257_vm11 = vcmp.eq.s32.totalorder %v5908_v49, %v8085_v36  ;;  %v8288_v22 = vadd.f32 %v9981_v54, %v1545_v56  ;;  %v2143_v39 = vadd.f32 %v4536_v33, %v8176_v31  ;;  %v9982_v36 = vld [vmem:[#allocation32_spill] sm:$0xff] }
 0x1c5   : > { %v2144_v16 = vadd.f32 %v4537_v18, %v8015_v35  ;;  %v2145_v27 = vadd.f32 %v4538_v1, %v1841_v55  ;;  %vm1954_vm12 = vcmp.eq.s32.totalorder %v5892_v43, %v8267_v53  ;;  %2528 = vperm.xlu1 %5132, %v8004_v45   ;;  %vm1955_vm13 = vcmp.eq.s32.totalorder %v5902_v46, %v8267_v53 }
 0x1c6   : > { %vm1956_vm4 = vcmp.eq.s32.totalorder %v5905_v47, %v8267_v53  ;;  %v4599_v37 = vsel %vm2254_vm6, 1.0, %v9840_v28  ;;  %v4600_v35 = vsel %vm2255_vm9, 1.0, %v9840_v28  ;;  %v8307_v31 = vpop.permute.xlu1 %2507  ;;  %v4601_v45 = vsel %vm2256_vm10, 1.0, %v9840_v28 }
 0x1c7   : > { %v4602_v51 = vsel %vm2257_vm11, 1.0, %v9840_v28  ;;  %vm2558_vm14 = vcmp.eq.s32.totalorder %v5892_v43, %v8146_v14  ;;  %vm2559_vm5 = vcmp.eq.s32.totalorder %v5902_v46, %v8146_v14  ;;  %vm1957_vm7 = vcmp.eq.s32.totalorder %v5908_v49, %v8267_v53  ;;  %v9993_v53 = vld [vmem:[#allocation15_spill] sm:$0xff] }
 0x1c8   : > { %vm2560_vm8 = vcmp.eq.s32.totalorder %v5905_v47, %v8146_v14  ;;  %vm1050_vm0 = vcmp.eq.s32.totalorder %v5892_v43, %v8201_v32  ;;  %vm1051_vm1 = vcmp.eq.s32.totalorder %v5902_v46, %v8201_v32  ;;  %vm1052_vm15 = vcmp.eq.s32.totalorder %v5905_v47, %v8201_v32 }
 0x1c9   : > { %vm2561_vm2 = vcmp.eq.s32.totalorder %v5908_v49, %v8146_v14  ;;  %v938_v19 = vadd.f32 %v9983_v9, %v9982_v36  ;;  %v939_v38 = vadd.f32 %v9985_v15, %v9984_v0  ;;  %vm1053_vm3 = vcmp.eq.s32.totalorder %v5908_v49, %v8201_v32  ;;  %v8388_v36 = vpop.permute.xlu0 %1902  ;;  %v9991_v9 = vld [vmem:[#allocation18_spill] sm:$0xff]  ;;  %v9992_v0 = vld [vmem:[#allocation27_spill] sm:$0xff] }
 0x1ca   : > { %vm1670_vm6 = vcmp.eq.s32.totalorder %v5892_v43, %v9986_v5  ;;  %v940_v6 = vadd.f32 %v9988_v30, %v9987_v44  ;;  %v4355_v42 = vsel %vm1050_vm0, 1.0, %v9840_v28  ;;  %v4356_v55 = vsel %vm1051_vm1, 1.0, %v9840_v28 }
 0x1cb   : > { %v4357_v8 = vsel %vm1052_vm15, 1.0, %v9840_v28  ;;  %v4358_v59 = vsel %vm1053_vm3, 1.0, %v9840_v28  ;;  %v2447_v10 = vadd.f32 %v4600_v35, %v2143_v39  ;;  %v4664_v32 = vsel %vm2559_vm5, 1.0, %v9840_v28  ;;  %v8345_v26 = vpop.permute.xlu1 %996 }
 0x1cc   : > { %v2449_v41 = vadd.f32 %v4602_v51, %v2145_v27  ;;  %v4666_v62 = vsel %vm2561_vm2, 1.0, %v9840_v28  ;;  %v2446_v11 = vadd.f32 %v4599_v37, %v2142_v21  ;;  %v4663_v58 = vsel %vm2558_vm14, 1.0, %v9840_v28 }
 0x1cd   : > { %v2448_v48 = vadd.f32 %v4601_v45, %v2144_v16  ;;  %v941_v33 = vadd.f32 %v9990_v17, %v9989_v52  ;;  %v2751_v4 = vadd.f32 %v4664_v32, %v2447_v10  ;;  %v4665_v2 = vsel %vm2560_vm8, 1.0, %v9840_v28 }
 0x1ce   : > { %v2753_v3 = vadd.f32 %v4666_v62, %v2449_v41  ;;  %v4539_v63 = vsel %vm1954_vm12, 1.0, %v9840_v28  ;;  %v1242_v60 = vadd.f32 %v4355_v42, %v938_v19  ;;  %v2750_v50 = vadd.f32 %v4663_v58, %v2446_v11  ;;  %v9994_v42 = vld [vmem:[#allocation50_spill] sm:$0xff] }
 0x1cf   : > { %v2752_v13 = vadd.f32 %v4665_v2, %v2448_v48  ;;  %v4540_v18 = vsel %vm1955_vm13, 1.0, %v9840_v28  ;;  %v1243_v1 = vadd.f32 %v4356_v55, %v939_v38  ;;  %v1244_v56 = vadd.f32 %v4357_v8, %v940_v6  ;;  %2949 = vmatprep.mubr.f32.mxu0 %v2751_v4 }
 0x1d0   : > { %v1245_v12 = vadd.f32 %v4358_v59, %v941_v33  ;;  %3094 = vmatprep.mubr.f32.mxu1 %v2753_v3  ;;  %v4541_v14 = vsel %vm1956_vm4, 1.0, %v9840_v28  ;;  %2950 = vmatmul.mubr.f32.gmra.mrb[14].mxu0 %v2750_v50  ;;  %vm1354_vm9 = vcmp.eq.s32.totalorder %v5892_v43, %v8257_v25  ;;  %vm1355_vm10 = vcmp.eq.s32.totalorder %v5902_v46, %v8257_v25  ;;  %v8376_v21 = vpop.permute.xlu1 %2206 }
 0x1d1   : > { %3095 = vmatmul.mubr.f32.gmra.mrb[14].mxu1 %v2752_v13  ;;  %vm1356_vm11 = vcmp.eq.s32.totalorder %v5905_v47, %v8257_v25  ;;  %vm1357_vm12 = vcmp.eq.s32.totalorder %v5908_v49, %v8257_v25  ;;  %v4419_v54 = vsel %vm1354_vm9, 1.0, %v9840_v28  ;;  %v4420_v39 = vsel %vm1355_vm10, 1.0, %v9840_v28 }
 0x1d2   : > { %v4421_v16 = vsel %vm1356_vm11, 1.0, %v9840_v28  ;;  %v4422_v27 = vsel %vm1357_vm12, 1.0, %v9840_v28  ;;  %v1546_v37 = vadd.f32 %v4419_v54, %v1242_v60  ;;  %v1547_v35 = vadd.f32 %v4420_v39, %v1243_v1  ;;  %v9995_v60 = vld [vmem:[#allocation71_spill] sm:$0xff]  ;;  %v9998_v39 = vld [vmem:[#allocation37_spill] sm:$0xff] }
 0x1d3   : > { %v1548_v45 = vadd.f32 %v4421_v16, %v1244_v56  ;;  %v4542_v51 = vsel %vm1957_vm7, 1.0, %v9840_v28  ;;  %vm2258_vm13 = vcmp.eq.s32.totalorder %v5892_v43, %v8228_v61  ;;  %vm2259_vm4 = vcmp.eq.s32.totalorder %v5902_v46, %v8228_v61  ;;  %v9996_v56 = vld [vmem:[#allocation72_spill] sm:$0xff] }
 0x1d4   : > { %v1549_v25 = vadd.f32 %v4422_v27, %v1245_v12  ;;  %vm2261_vm14 = vcmp.eq.s32.totalorder %v5908_v49, %v8228_v61  ;;  %v8397_v19 = vadd.f32 %v9991_v9, %v1546_v37  ;;  %v8400_v15 = vadd.f32 %v9992_v0, %v1547_v35 }
 0x1d5   : > { %v8403_v38 = vadd.f32 %v9993_v53, %v1548_v45  ;;  %v8409_v44 = vsel %vm1670_vm6, 1.0, %v9840_v28  ;;  %v2146_v30 = vadd.f32 %v4539_v63, %v8151_v7  ;;  %v2147_v6 = vadd.f32 %v4540_v18, %v8154_v23  ;;  %v1301_v10 = vpop.permute.xlu1 %1300 }
 0x1d6   : > { %v8414_v55 = vadd.f32 %v9994_v42, %v1549_v25  ;;  %v2148_v8 = vadd.f32 %v4541_v14, %v8157_v34  ;;  %v2149_v59 = vadd.f32 %v4542_v51, %v8166_v57  ;;  %vm1958_vm5 = vcmp.eq.s32.totalorder %v5892_v43, %v8388_v36  ;;  %v9997_v14 = vld [vmem:[#allocation22_spill] sm:$0xff] }
 0x1d7   : > { %vm2260_vm7 = vcmp.eq.s32.totalorder %v5905_v47, %v8228_v61  ;;  %vm1959_vm8 = vcmp.eq.s32.totalorder %v5902_v46, %v8388_v36  ;;  %v4603_v7 = vsel %vm2258_vm13, 1.0, %v9840_v28  ;;  %v4604_v23 = vsel %vm2259_vm4, 1.0, %v9840_v28 }
 0x1d8   : > { %v4606_v34 = vsel %vm2261_vm14, 1.0, %v9840_v28  ;;  %vm2563_vm0 = vcmp.eq.s32.totalorder %v5902_v46, %v8307_v31  ;;  %vm1054_vm1 = vcmp.eq.s32.totalorder %v5892_v43, %v8345_v26  ;;  %vm1055_vm15 = vcmp.eq.s32.totalorder %v5902_v46, %v8345_v26 }
 0x1d9   : > { %vm1056_vm2 = vcmp.eq.s32.totalorder %v5905_v47, %v8345_v26  ;;  %v4605_v57 = vsel %vm2260_vm7, 1.0, %v9840_v28  ;;  %vm2562_vm3 = vcmp.eq.s32.totalorder %v5892_v43, %v8307_v31  ;;  %vm2565_vm6 = vcmp.eq.s32.totalorder %v5908_v49, %v8307_v31 }
 0x1da   : > { %vm1057_vm9 = vcmp.eq.s32.totalorder %v5908_v49, %v8345_v26  ;;  %vm2564_vm10 = vcmp.eq.s32.totalorder %v5905_v47, %v8307_v31  ;;  %v4359_v61 = vsel %vm1054_vm1, 1.0, %v9840_v28  ;;  %v4360_v32 = vsel %vm1055_vm15, 1.0, %v9840_v28  ;;  %v8458_v52 = vpop.permute.xlu1 %2510 }
 0x1db   : > { %v4361_v41 = vsel %vm1056_vm2, 1.0, %v9840_v28  ;;  %v4362_v62 = vsel %vm1057_vm9, 1.0, %v9840_v28  ;;  %v2451_v11 = vadd.f32 %v4604_v23, %v2147_v6  ;;  %v4668_v58 = vsel %vm2563_vm0, 1.0, %v9840_v28  ;;  %v8498_v6 = vpop.permute.xlu0 %1905 }
 0x1dc   : > { %v2453_v48 = vadd.f32 %v4606_v34, %v2149_v59  ;;  %v4670_v17 = vsel %vm2565_vm6, 1.0, %v9840_v28  ;;  %v2450_v26 = vadd.f32 %v4603_v7, %v2146_v30  ;;  %v4667_v33 = vsel %vm2562_vm3, 1.0, %v9840_v28  ;;  %v9999_v59 = vld [vmem:[#allocation51_spill] sm:$0xff]  ;;  %v10000_v7 = vld [vmem:[#allocation17_spill] sm:$0xff]  ;;  %v10001_v34 = vld [vmem:[#allocation20_spill] sm:$0xff] }
 0x1dd   : > { %v2452_v4 = vadd.f32 %v4605_v57, %v2148_v8  ;;  %vm1960_vm11 = vcmp.eq.s32.totalorder %v5905_v47, %v8388_v36  ;;  %v2755_v3 = vadd.f32 %v4668_v58, %v2451_v11  ;;  %v4669_v63 = vsel %vm2564_vm10, 1.0, %v9840_v28  ;;  %v10004_v58 = vld [vmem:[#allocation39_spill] sm:$0xff] }
 0x1de   : > { %v2757_v2 = vadd.f32 %v4670_v17, %v2453_v48  ;;  %vm1961_vm12 = vcmp.eq.s32.totalorder %v5908_v49, %v8388_v36  ;;  %v1246_v50 = vadd.f32 %v4359_v61, %v9995_v60  ;;  %v2754_v13 = vadd.f32 %v4667_v33, %v2450_v26  ;;  %v10005_v48 = vld [vmem:[#allocation75_spill] sm:$0xff]  ;;  %v10006_v26 = vld [vmem:[#allocation40_spill] sm:$0xff] }
 0x1df   : > { %v2756_v18 = vadd.f32 %v4669_v63, %v2452_v4  ;;  %v4543_v1 = vsel %vm1958_vm5, 1.0, %v9840_v28  ;;  %v1247_v12 = vadd.f32 %v4360_v32, %v9996_v56  ;;  %v1248_v54 = vadd.f32 %v4361_v41, %v9997_v14  ;;  %2954 = vmatprep.mubr.f32.mxu0 %v2755_v3  ;;  %v1000_v27 = vpop.permute.xlu1 %999  ;;  %v10007_v33 = vld [vmem:[#allocation76_spill] sm:$0xff] }
 0x1e0   : > { %v1249_v16 = vadd.f32 %v4362_v62, %v9998_v39  ;;  %3099 = vmatprep.mubr.f32.mxu1 %v2757_v2  ;;  %v4544_v31 = vsel %vm1959_vm8, 1.0, %v9840_v28  ;;  %2955 = vmatmul.mubr.f32.gmra.mrb[16].mxu0 %v2754_v13  ;;  %vm1358_vm13 = vcmp.eq.s32.totalorder %v5892_v43, %v1301_v10  ;;  %vm1359_vm4 = vcmp.eq.s32.totalorder %v5902_v46, %v1301_v10  ;;  %v10003_v62 = vld [vmem:[#allocation74_spill] sm:$0xff]  ;;  %v10008_v39 = vld [vmem:[#allocation41_spill] sm:$0xff] }
 0x1e1   : > { %3100 = vmatmul.mubr.f32.gmra.mrb[16].mxu1 %v2756_v18  ;;  %vm1360_vm14 = vcmp.eq.s32.totalorder %v5905_v47, %v1301_v10  ;;  %vm1361_vm5 = vcmp.eq.s32.totalorder %v5908_v49, %v1301_v10  ;;  %v4423_v37 = vsel %vm1358_vm13, 1.0, %v9840_v28  ;;  %v4424_v35 = vsel %vm1359_vm4, 1.0, %v9840_v28 }
 0x1e2   : > { %v4425_v45 = vsel %vm1360_vm14, 1.0, %v9840_v28  ;;  %v4426_v51 = vsel %vm1361_vm5, 1.0, %v9840_v28  ;;  %v1550_v25 = vadd.f32 %v4423_v37, %v1246_v50  ;;  %v1551_v9 = vadd.f32 %v4424_v35, %v1247_v12 }
 0x1e3   : > { %v1552_v0 = vadd.f32 %v4425_v45, %v1248_v54  ;;  %v4545_v53 = vsel %vm1960_vm11, 1.0, %v9840_v28  ;;  %v4546_v30 = vsel %vm1961_vm12, 1.0, %v9840_v28  ;;  %vm2262_vm7 = vcmp.eq.s32.totalorder %v5892_v43, %v8376_v21 }
 0x1e4   : > { %v1553_v42 = vadd.f32 %v4426_v51, %v1249_v16  ;;  %vm2263_vm8 = vcmp.eq.s32.totalorder %v5902_v46, %v8376_v21  ;;  %v8505_v8 = vadd.f32 %v7779_v29, %v1550_v25  ;;  %v8508_v10 = vadd.f32 %v9999_v59, %v1551_v9  ;;  %v8526_v41 = vpop.permute.xlu1 %2209  ;;  %v10009_v16 = vld [vmem:[#allocation77_spill] sm:$0xff] }
 0x1e5   : > { %v8511_v23 = vadd.f32 %v10000_v7, %v1552_v0  ;;  %v2150_v36 = vadd.f32 %v4543_v1, %v8274_v24  ;;  %vm2264_vm0 = vcmp.eq.s32.totalorder %v5905_v47, %v8376_v21  ;;  %vm2265_vm1 = vcmp.eq.s32.totalorder %v5908_v49, %v8376_v21  ;;  %v10002_v21 = vld [vmem:[#allocation38_spill] sm:$0xff] }
 0x1e6   : > { %v8519_v57 = vadd.f32 %v10001_v34, %v1553_v42  ;;  %v2151_v29 = vadd.f32 %v4544_v31, %v8277_v20  ;;  %v2152_v61 = vadd.f32 %v4545_v53, %v8280_v40  ;;  %v2153_v32 = vadd.f32 %v4546_v30, %v8288_v22 }
 0x1e7   : > { %vm1962_vm15 = vcmp.eq.s32.totalorder %v5892_v43, %v8498_v6  ;;  %vm1963_vm2 = vcmp.eq.s32.totalorder %v5902_v46, %v8498_v6  ;;  %vm1964_vm3 = vcmp.eq.s32.totalorder %v5905_v47, %v8498_v6  ;;  %v4607_v24 = vsel %vm2262_vm7, 1.0, %v9840_v28 }
 0x1e8   : > { %v4608_v20 = vsel %vm2263_vm8, 1.0, %v9840_v28  ;;  %v4609_v40 = vsel %vm2264_vm0, 1.0, %v9840_v28  ;;  %v4610_v22 = vsel %vm2265_vm1, 1.0, %v9840_v28  ;;  %vm2566_vm6 = vcmp.eq.s32.totalorder %v5892_v43, %v8458_v52 }
 0x1e9   : > { %vm2567_vm9 = vcmp.eq.s32.totalorder %v5902_v46, %v8458_v52  ;;  %vm1965_vm10 = vcmp.eq.s32.totalorder %v5908_v49, %v8498_v6  ;;  %vm2568_vm11 = vcmp.eq.s32.totalorder %v5905_v47, %v8458_v52  ;;  %vm1058_vm12 = vcmp.eq.s32.totalorder %v5892_v43, %v1000_v27  ;;  %v10012_v6 = vld [vmem:[#allocation23_spill] sm:$0xff] }
 0x1ea   : > { %vm1059_vm13 = vcmp.eq.s32.totalorder %v5902_v46, %v1000_v27  ;;  %vm1060_vm4 = vcmp.eq.s32.totalorder %v5905_v47, %v1000_v27  ;;  %vm2569_vm14 = vcmp.eq.s32.totalorder %v5908_v49, %v8458_v52  ;;  %v946_v11 = vadd.f32 %v10003_v62, %v10002_v21  ;;  %v1304_v1 = vpop.permute.xlu1 %1303  ;;  %v10011_v62 = vld [vmem:[#allocation73_spill] sm:$0xff] }
 0x1eb   : > { %v947_v17 = vadd.f32 %v10005_v48, %v10004_v58  ;;  %vm1061_vm5 = vcmp.eq.s32.totalorder %v5908_v49, %v1000_v27  ;;  %vm1671_vm7 = vcmp.eq.s32.totalorder %v5902_v46, %v9986_v5  ;;  %vm1672_vm8 = vcmp.eq.s32.totalorder %v5905_v47, %v9986_v5 }
 0x1ec   : > { %v948_v4 = vadd.f32 %v10007_v33, %v10006_v26  ;;  %v4363_v3 = vsel %vm1058_vm12, 1.0, %v9840_v28  ;;  %v4364_v2 = vsel %vm1059_vm13, 1.0, %v9840_v28  ;;  %v4365_v63 = vsel %vm1060_vm4, 1.0, %v9840_v28  ;;  %v10013_v26 = vld [vmem:[#allocation21_spill] sm:$0xff]  ;;  %v8640_v33 = vpop.permute.xlu0 %1908 }
 0x1ed   : > { %v4366_v60 = vsel %vm1061_vm5, 1.0, %v9840_v28  ;;  %v2455_v50 = vadd.f32 %v4608_v20, %v2151_v29  ;;  %v4672_v13 = vsel %vm2567_vm9, 1.0, %v9840_v28  ;;  %v2457_v18 = vadd.f32 %v4610_v22, %v2153_v32  ;;  %v10010_v22 = vld [vmem:[#allocation36_spill] sm:$0xff] }
 0x1ee   : > { %v4674_v56 = vsel %vm2569_vm14, 1.0, %v9840_v28  ;;  %v2454_v12 = vadd.f32 %v4607_v24, %v2150_v36  ;;  %v4671_v14 = vsel %vm2566_vm6, 1.0, %v9840_v28  ;;  %v2456_v54 = vadd.f32 %v4609_v40, %v2152_v61 }
 0x1ef   : > { %v949_v31 = vadd.f32 %v10009_v16, %v10008_v39  ;;  %v2759_v27 = vadd.f32 %v4672_v13, %v2455_v50  ;;  %v2761_v37 = vadd.f32 %v4674_v56, %v2457_v18  ;;  %v4673_v35 = vsel %vm2568_vm11, 1.0, %v9840_v28  ;;  %v2514_v59 = vpop.permute.xlu1 %2513 }
 0x1f0   : > { %v4547_v45 = vsel %vm1962_vm15, 1.0, %v9840_v28  ;;  %v1250_v51 = vadd.f32 %v4363_v3, %v946_v11  ;;  %v2758_v25 = vadd.f32 %v4671_v14, %v2454_v12  ;;  %v2760_v9 = vadd.f32 %v4673_v35, %v2456_v54 }
 0x1f1   : > { %v4548_v0 = vsel %vm1963_vm2, 1.0, %v9840_v28  ;;  %v1251_v53 = vadd.f32 %v4364_v2, %v947_v17  ;;  %v1252_v30 = vadd.f32 %v4365_v63, %v948_v4  ;;  %v1253_v42 = vadd.f32 %v4366_v60, %v949_v31  ;;  %2959 = vmatprep.mubr.f32.mxu0 %v2759_v27  ;;  %3104 = vmatprep.mubr.f32.mxu1 %v2761_v37  ;;  %v10014_v4 = vld [vmem:[#allocation24_spill] sm:$0xff] }
 0x1f2   : > { %v4549_v52 = vsel %vm1964_vm3, 1.0, %v9840_v28  ;;  %2960 = vmatmul.mubr.f32.gmra.mrb[18].mxu0 %v2758_v25  ;;  %3105 = vmatmul.mubr.f32.gmra.mrb[18].mxu1 %v2760_v9  ;;  %vm1362_vm0 = vcmp.eq.s32.totalorder %v5892_v43, %v1304_v1  ;;  %vm1363_vm1 = vcmp.eq.s32.totalorder %v5902_v46, %v1304_v1  ;;  %vm1364_vm15 = vcmp.eq.s32.totalorder %v5905_v47, %v1304_v1  ;;  %v10015_v25 = vld [vmem:[#allocation42_spill] sm:$0xff] }
 0x1f3   : > { %vm1365_vm2 = vcmp.eq.s32.totalorder %v5908_v49, %v1304_v1  ;;  %v4427_v7 = vsel %vm1362_vm0, 1.0, %v9840_v28  ;;  %v4428_v36 = vsel %vm1363_vm1, 1.0, %v9840_v28  ;;  %v4429_v34 = vsel %vm1364_vm15, 1.0, %v9840_v28 }
 0x1f4   : > { %v4430_v29 = vsel %vm1365_vm2, 1.0, %v9840_v28  ;;  %v1554_v61 = vadd.f32 %v4427_v7, %v1250_v51  ;;  %v1555_v32 = vadd.f32 %v4428_v36, %v1251_v53  ;;  %v1556_v24 = vadd.f32 %v4429_v34, %v1252_v30  ;;  %v1003_v2 = vpop.permute.xlu1 %1002  ;;  %v10017_v7 = vld [vmem:[#allocation44_spill] sm:$0xff]  ;;  %v10018_v34 = vld [vmem:[#allocation47_spill] sm:$0xff] }
 0x1f5   : > { %v4550_v20 = vsel %vm1965_vm10, 1.0, %v9840_v28  ;;  %vm2266_vm3 = vcmp.eq.s32.totalorder %v5892_v43, %v8526_v41  ;;  %vm2267_vm6 = vcmp.eq.s32.totalorder %v5902_v46, %v8526_v41  ;;  %v1557_v40 = vadd.f32 %v4430_v29, %v1253_v42  ;;  %v10016_v42 = vld [vmem:[#allocation43_spill] sm:$0xff] }
 0x1f6   : > { %vm1673_vm9 = vcmp.eq.s32.totalorder %v5908_v49, %v9986_v5  ;;  %vm2269_vm11 = vcmp.eq.s32.totalorder %v5908_v49, %v8526_v41  ;;  %v8618_v21 = vadd.f32 %v10010_v22, %v1554_v61  ;;  %v8621_v11 = vadd.f32 %v10011_v62, %v1555_v32 }
 0x1f7   : > { %v8624_v58 = vadd.f32 %v10012_v6, %v1556_v24  ;;  %v8630_v48 = vsel %vm1671_vm7, 1.0, %v9840_v28  ;;  %v8636_v17 = vsel %vm1672_vm8, 1.0, %v9840_v28  ;;  %vm1674_vm10 = vcmp.eq.s32.totalorder %v5892_v43, %v10013_v26 }
 0x1f8   : > { %v8643_v3 = vadd.f32 %v10014_v4, %v1557_v40  ;;  %v2154_v63 = vadd.f32 %v4547_v45, %v8397_v19  ;;  %v2155_v60 = vadd.f32 %v4548_v0, %v8400_v15  ;;  %v2156_v50 = vadd.f32 %v4549_v52, %v8403_v38 }
 0x1f9   : > { %vm2268_vm12 = vcmp.eq.s32.totalorder %v5905_v47, %v8526_v41  ;;  %v2157_v13 = vadd.f32 %v4550_v20, %v8414_v55  ;;  %v4611_v18 = vsel %vm2266_vm3, 1.0, %v9840_v28  ;;  %v4612_v1 = vsel %vm2267_vm6, 1.0, %v9840_v28  ;;  %v8683_v56 = vpop.permute.xlu1 %2212 }
 0x1fa   : > { %v4614_v19 = vsel %vm2269_vm11, 1.0, %v9840_v28  ;;  %vm1675_vm13 = vcmp.eq.s32.totalorder %v5902_v46, %v10013_v26  ;;  %vm1966_vm4 = vcmp.eq.s32.totalorder %v5892_v43, %v8640_v33  ;;  %vm1967_vm14 = vcmp.eq.s32.totalorder %v5902_v46, %v8640_v33 }
 0x1fb   : > { %vm2571_vm5 = vcmp.eq.s32.totalorder %v5902_v46, %v2514_v59  ;;  %vm1062_vm7 = vcmp.eq.s32.totalorder %v5892_v43, %v1003_v2  ;;  %vm1063_vm8 = vcmp.eq.s32.totalorder %v5902_v46, %v1003_v2  ;;  %vm1064_vm0 = vcmp.eq.s32.totalorder %v5905_v47, %v1003_v2 }
 0x1fc   : > { %v4613_v15 = vsel %vm2268_vm12, 1.0, %v9840_v28  ;;  %vm2570_vm1 = vcmp.eq.s32.totalorder %v5892_v43, %v2514_v59  ;;  %vm2573_vm15 = vcmp.eq.s32.totalorder %v5908_v49, %v2514_v59  ;;  %vm1065_vm2 = vcmp.eq.s32.totalorder %v5908_v49, %v1003_v2 }
 0x1fd   : > { %vm1676_vm3 = vcmp.eq.s32.totalorder %v5905_v47, %v10013_v26  ;;  %vm2572_vm6 = vcmp.eq.s32.totalorder %v5905_v47, %v2514_v59  ;;  %v4367_v38 = vsel %vm1062_vm7, 1.0, %v9840_v28  ;;  %v4368_v55 = vsel %vm1063_vm8, 1.0, %v9840_v28 }
 0x1fe   : > { %v4369_v41 = vsel %vm1064_vm0, 1.0, %v9840_v28  ;;  %vm1677_vm11 = vcmp.eq.s32.totalorder %v5908_v49, %v10013_v26  ;;  %v4370_v12 = vsel %vm1065_vm2, 1.0, %v9840_v28  ;;  %v2459_v14 = vadd.f32 %v4612_v1, %v2155_v60  ;;  %v1307_v59 = vpop.permute.xlu1 %1306 }
 0x1ff   : > { %v4676_v54 = vsel %vm2571_vm5, 1.0, %v9840_v28  ;;  %v2461_v39 = vadd.f32 %v4614_v19, %v2157_v13  ;;  %v4678_v16 = vsel %vm2573_vm15, 1.0, %v9840_v28  ;;  %v2458_v31 = vadd.f32 %v4611_v18, %v2154_v63  ;;  %v1912_v63 = vpop.permute.xlu0 %1911 }
 0x200   : > { %v4675_v27 = vsel %vm2570_vm1, 1.0, %v9840_v28  ;;  %v2460_v37 = vadd.f32 %v4613_v15, %v2156_v50  ;;  %vm1968_vm12 = vcmp.eq.s32.totalorder %v5905_v47, %v8640_v33  ;;  %v2763_v35 = vadd.f32 %v4676_v54, %v2459_v14 }
 0x201   : > { %v2765_v45 = vadd.f32 %v4678_v16, %v2461_v39  ;;  %v4677_v51 = vsel %vm2572_vm6, 1.0, %v9840_v28  ;;  %vm1969_vm5 = vcmp.eq.s32.totalorder %v5908_v49, %v8640_v33  ;;  %v1254_v9 = vadd.f32 %v4367_v38, %v10015_v25 }
 0x202   : > { %v2762_v0 = vadd.f32 %v4675_v27, %v2458_v31  ;;  %v2764_v53 = vadd.f32 %v4677_v51, %v2460_v37  ;;  %v4498_v30 = vsel %vm1673_vm9, 1.0, %v9840_v28  ;;  %v1255_v52 = vadd.f32 %v4368_v55, %v10016_v42  ;;  %2964 = vmatprep.mubr.f32.mxu0 %v2763_v35 }
 0x203   : > { %v1256_v36 = vadd.f32 %v4369_v41, %v10017_v7  ;;  %v1257_v29 = vadd.f32 %v4370_v12, %v10018_v34  ;;  %3109 = vmatprep.mubr.f32.mxu1 %v2765_v45  ;;  %v8714_v61 = vsel %vm1674_vm10, 1.0, %v9840_v28  ;;  %vm1366_vm7 = vcmp.eq.s32.totalorder %v5892_v43, %v1307_v59  ;;  %v2517_v19 = vpop.permute.xlu1 %2516  ;;  %v10022_v7 = vld [vmem:[#allocation79_spill] sm:$0xff]  ;;  %v10023_v34 = vld [vmem:[#allocation48_spill] sm:$0xff] }
 0x204   : > { %2965 = vmatmul.mubr.f32.gmra.mrb[20].mxu0 %v2762_v0  ;;  %3110 = vmatmul.mubr.f32.gmra.mrb[20].mxu1 %v2764_v53  ;;  %vm1367_vm9 = vcmp.eq.s32.totalorder %v5902_v46, %v1307_v59  ;;  %vm1368_vm8 = vcmp.eq.s32.totalorder %v5905_v47, %v1307_v59  ;;  %vm1369_vm0 = vcmp.eq.s32.totalorder %v5908_v49, %v1307_v59  ;;  %v4431_v5 = vsel %vm1366_vm7, 1.0, %v9840_v28  ;;  %v10019_v0 = vld [vmem:[#allocation45_spill] sm:$0xff]  ;;  %v10020_v53 = vld [vmem:[#allocation78_spill] sm:$0xff] }
 0x205   : > { %v4432_v32 = vsel %vm1367_vm9, 1.0, %v9840_v28  ;;  %v4433_v24 = vsel %vm1368_vm8, 1.0, %v9840_v28  ;;  %v4434_v20 = vsel %vm1369_vm0, 1.0, %v9840_v28  ;;  %v1558_v40 = vadd.f32 %v4431_v5, %v1254_v9  ;;  %v10025_v5 = vld [vmem:[#allocation49_spill] sm:$0xff] }
 0x206   : > { %v1559_v22 = vadd.f32 %v4432_v32, %v1255_v52  ;;  %v1560_v62 = vadd.f32 %v4433_v24, %v1256_v36  ;;  %v8728_v6 = vsel %vm1675_vm13, 1.0, %v9840_v28  ;;  %v4551_v4 = vsel %vm1966_vm4, 1.0, %v9840_v28  ;;  %v10021_v52 = vld [vmem:[#allocation46_spill] sm:$0xff]  ;;  %v10026_v32 = vld [vmem:[#allocation81_spill] sm:$0xff] }
 0x207   : > { %v4552_v2 = vsel %vm1967_vm14, 1.0, %v9840_v28  ;;  %v1561_v60 = vadd.f32 %v4434_v20, %v1257_v29  ;;  %v4553_v50 = vsel %vm1968_vm12, 1.0, %v9840_v28  ;;  %v8743_v13 = vadd.f32 %v8409_v44, %v1558_v40  ;;  %v10024_v29 = vld [vmem:[#allocation80_spill] sm:$0xff] }
 0x208   : > { %v8746_v18 = vadd.f32 %v8630_v48, %v1559_v22  ;;  %v8749_v1 = vadd.f32 %v8636_v17, %v1560_v62  ;;  %v8755_v15 = vsel %vm1676_vm3, 1.0, %v9840_v28  ;;  %v4554_v38 = vsel %vm1969_vm5, 1.0, %v9840_v28  ;;  %v1006_v41 = vpop.permute.xlu1 %1005 }
 0x209   : > { %vm2271_vm10 = vcmp.eq.s32.totalorder %v5902_v46, %v8683_v56  ;;  %v8763_v44 = vadd.f32 %v4498_v30, %v1561_v60  ;;  %v8769_v48 = vsel %vm1677_vm11, 1.0, %v9840_v28  ;;  %v2158_v17 = vadd.f32 %v4551_v4, %v8505_v8 }
 0x20a   : > { %vm1970_vm13 = vcmp.eq.s32.totalorder %v5892_v43, %v1912_v63  ;;  %vm2273_vm4 = vcmp.eq.s32.totalorder %v5908_v49, %v8683_v56  ;;  %v2159_v33 = vadd.f32 %v4552_v2, %v8508_v10  ;;  %v2160_v55 = vadd.f32 %v4553_v50, %v8511_v23 }
 0x20b   : > { %vm2270_vm14 = vcmp.eq.s32.totalorder %v5892_v43, %v8683_v56  ;;  %vm2575_vm1 = vcmp.eq.s32.totalorder %v5902_v46, %v2517_v19  ;;  %v2161_v26 = vadd.f32 %v4554_v38, %v8519_v57  ;;  %vm1971_vm15 = vcmp.eq.s32.totalorder %v5902_v46, %v1912_v63 }
 0x20c   : > { %vm2272_vm2 = vcmp.eq.s32.totalorder %v5905_v47, %v8683_v56  ;;  %v4616_v8 = vsel %vm2271_vm10, 1.0, %v9840_v28  ;;  %vm1972_vm3 = vcmp.eq.s32.totalorder %v5905_v47, %v1912_v63  ;;  %vm1973_vm6 = vcmp.eq.s32.totalorder %v5908_v49, %v1912_v63  ;;  %v10027_v63 = vld [vmem:[#allocation54_spill] sm:$0xff] }
 0x20d   : > { %v4555_v10 = vsel %vm1970_vm13, 1.0, %v9840_v28  ;;  %v4618_v23 = vsel %vm2273_vm4, 1.0, %v9840_v28  ;;  %v4615_v12 = vsel %vm2270_vm14, 1.0, %v9840_v28  ;;  %vm2574_vm11 = vcmp.eq.s32.totalorder %v5892_v43, %v2517_v19 }
 0x20e   : > { %vm2577_vm12 = vcmp.eq.s32.totalorder %v5908_v49, %v2517_v19  ;;  %v4680_v57 = vsel %vm2575_vm1, 1.0, %v9840_v28  ;;  %v4556_v56 = vsel %vm1971_vm15, 1.0, %v9840_v28  ;;  %v4617_v14 = vsel %vm2272_vm2, 1.0, %v9840_v28 }
 0x20f   : > { %vm2576_vm5 = vcmp.eq.s32.totalorder %v5905_v47, %v2517_v19  ;;  %v2463_v54 = vadd.f32 %v4616_v8, %v2159_v33  ;;  %vm1066_vm7 = vcmp.eq.s32.totalorder %v5892_v43, %v1006_v41  ;;  %vm1067_vm9 = vcmp.eq.s32.totalorder %v5902_v46, %v1006_v41  ;;  %v2216_v40 = vpop.permute.xlu1 %2215 }
 0x210   : > { %vm1068_vm8 = vcmp.eq.s32.totalorder %v5905_v47, %v1006_v41  ;;  %v2465_v39 = vadd.f32 %v4618_v23, %v2161_v26  ;;  %v4682_v31 = vsel %vm2577_vm12, 1.0, %v9840_v28  ;;  %v2462_v27 = vadd.f32 %v4615_v12, %v2158_v17  ;;  %v10028_v17 = vld [vmem:[#allocation19_spill] sm:$0xff] }
 0x211   : > { %v2767_v16 = vadd.f32 %v4680_v57, %v2463_v54  ;;  %v4679_v37 = vsel %vm2574_vm11, 1.0, %v9840_v28  ;;  %vm1069_vm0 = vcmp.eq.s32.totalorder %v5908_v49, %v1006_v41  ;;  %v2464_v45 = vadd.f32 %v4617_v14, %v2160_v55 }
 0x212   : > { %v2769_v35 = vadd.f32 %v4682_v31, %v2465_v39  ;;  %v4681_v51 = vsel %vm2576_vm5, 1.0, %v9840_v28  ;;  %v4557_v25 = vsel %vm1972_vm3, 1.0, %v9840_v28  ;;  %v4558_v9 = vsel %vm1973_vm6, 1.0, %v9840_v28 }
 0x213   : > { %v954_v30 = vadd.f32 %v10020_v53, %v10019_v0  ;;  %2969 = vmatprep.mubr.f32.mxu0 %v2767_v16  ;;  %v2766_v42 = vadd.f32 %v4679_v37, %v2462_v27  ;;  %v955_v36 = vadd.f32 %v10022_v7, %v10021_v52  ;;  %v956_v59 = vadd.f32 %v10024_v29, %v10023_v34  ;;  %v1915_v16 = vpop.permute.xlu0 %1914 }
 0x214   : > { %v957_v24 = vadd.f32 %v10026_v32, %v10025_v5  ;;  %3114 = vmatprep.mubr.f32.mxu1 %v2769_v35  ;;  %v2768_v20 = vadd.f32 %v4681_v51, %v2464_v45  ;;  %v4371_v22 = vsel %vm1066_vm7, 1.0, %v9840_v28  ;;  %v4372_v62 = vsel %vm1067_vm9, 1.0, %v9840_v28 }
 0x215   : > { %v4373_v4 = vsel %vm1068_vm8, 1.0, %v9840_v28  ;;  %v4374_v2 = vsel %vm1069_vm0, 1.0, %v9840_v28  ;;  %2970 = vmatmul.mubr.f32.gmra.mrb[22].mxu0 %v2766_v42  ;;  %vm2274_vm10 = vcmp.eq.s32.totalorder %v5892_v43, %v2216_v40  ;;  %vm2275_vm13 = vcmp.eq.s32.totalorder %v5902_v46, %v2216_v40 }
 0x216   : > { %3115 = vmatmul.mubr.f32.gmra.mrb[22].mxu1 %v2768_v20  ;;  %vm2276_vm4 = vcmp.eq.s32.totalorder %v5905_v47, %v2216_v40  ;;  %vm2277_vm14 = vcmp.eq.s32.totalorder %v5908_v49, %v2216_v40  ;;  %vm766_vm1 = vcmp.eq.s32.totalorder %v5892_v43, %v10027_v63  ;;  %vm767_vm15 = vcmp.eq.s32.totalorder %v5902_v46, %v10027_v63 }
 0x217   : > { %v2162_v60 = vadd.f32 %v4555_v10, %v8618_v21  ;;  %v2163_v50 = vadd.f32 %v4556_v56, %v8621_v11  ;;  %v2164_v19 = vadd.f32 %v4557_v25, %v8624_v58  ;;  %v2165_v38 = vadd.f32 %v4558_v9, %v8643_v3  ;;  %v1310_v10 = vpop.permute.xlu1 %1309 }
 0x218   : > { %vm462_vm2 = vcmp.eq.s32.totalorder %v5892_v43, %v10028_v17  ;;  %vm768_vm3 = vcmp.eq.s32.totalorder %v5905_v47, %v10027_v63  ;;  %v1258_v33 = vadd.f32 %v4371_v22, %v954_v30  ;;  %v1259_v55 = vadd.f32 %v4372_v62, %v955_v36  ;;  %v1918_v30 = vpop.permute.xlu0 %1917 }
 0x219   : > { %v1260_v26 = vadd.f32 %v4373_v4, %v956_v59  ;;  %v1261_v8 = vadd.f32 %v4374_v2, %v957_v24  ;;  %vm463_vm6 = vcmp.eq.s32.totalorder %v5902_v46, %v10028_v17  ;;  %vm464_vm11 = vcmp.eq.s32.totalorder %v5905_v47, %v10028_v17 }
 0x21a   : > { %vm465_vm12 = vcmp.eq.s32.totalorder %v5908_v49, %v10028_v17  ;;  %vm769_vm5 = vcmp.eq.s32.totalorder %v5908_v49, %v10027_v63  ;;  %v4619_v21 = vsel %vm2274_vm10, 1.0, %v9840_v28  ;;  %v4620_v11 = vsel %vm2275_vm13, 1.0, %v9840_v28 }
 0x21b   : > { %v4621_v58 = vsel %vm2276_vm4, 1.0, %v9840_v28  ;;  %v4622_v3 = vsel %vm2277_vm14, 1.0, %v9840_v28  ;;  %vm1370_vm7 = vcmp.eq.s32.totalorder %v5892_v43, %v1310_v10  ;;  %vm1371_vm9 = vcmp.eq.s32.totalorder %v5902_v46, %v1310_v10  ;;  %v2520_v0 = vpop.permute.xlu1 %2519 }
 0x21c   : > { %vm1372_vm8 = vcmp.eq.s32.totalorder %v5905_v47, %v1310_v10  ;;  %vm1373_vm0 = vcmp.eq.s32.totalorder %v5908_v49, %v1310_v10  ;;  %v4435_v23 = vsel %vm1370_vm7, 1.0, %v9840_v28  ;;  %v4436_v41 = vsel %vm1371_vm9, 1.0, %v9840_v28 }
 0x21d   : > { %v4437_v12 = vsel %vm1372_vm8, 1.0, %v9840_v28  ;;  %v4438_v57 = vsel %vm1373_vm0, 1.0, %v9840_v28  ;;  %v1562_v56 = vadd.f32 %v4435_v23, %v1258_v33  ;;  %v1563_v14 = vadd.f32 %v4436_v41, %v1259_v55 }
 0x21e   : > { %v1564_v54 = vadd.f32 %v4437_v12, %v1260_v26  ;;  %v1565_v39 = vadd.f32 %v4438_v57, %v1261_v8  ;;  %v2467_v31 = vadd.f32 %v4620_v11, %v2163_v50  ;;  %v2469_v27 = vadd.f32 %v4622_v3, %v2165_v38 }
 0x21f   : > { %v2466_v37 = vadd.f32 %v4619_v21, %v2162_v60  ;;  %v2468_v35 = vadd.f32 %v4621_v58, %v2164_v19  ;;  %v8874_v45 = vadd.f32 %v8714_v61, %v1562_v56  ;;  %v8877_v51 = vadd.f32 %v8728_v6, %v1563_v14  ;;  %v8913_v5 = vpop.permute.xlu1 %1008  ;;  %v2222_v60 = vpop.permute.xlu0 %2221 }
 0x220   : > { %v8880_v25 = vadd.f32 %v8755_v15, %v1564_v54  ;;  %v8883_v9 = vadd.f32 %v8769_v48, %v1565_v39  ;;  %vm2578_vm10 = vcmp.eq.s32.totalorder %v5892_v43, %v2520_v0  ;;  %vm2579_vm13 = vcmp.eq.s32.totalorder %v5902_v46, %v2520_v0 }
 0x221   : > { %vm2580_vm4 = vcmp.eq.s32.totalorder %v5905_v47, %v2520_v0  ;;  %vm2581_vm14 = vcmp.eq.s32.totalorder %v5908_v49, %v2520_v0  ;;  %v4684_v61 = vsel %vm2579_vm13, 1.0, %v9840_v28  ;;  %v4683_v53 = vsel %vm2578_vm10, 1.0, %v9840_v28 }
 0x222   : > { %v4686_v6 = vsel %vm2581_vm14, 1.0, %v9840_v28  ;;  %v4685_v15 = vsel %vm2580_vm4, 1.0, %v9840_v28  ;;  %v2771_v48 = vadd.f32 %v4684_v61, %v2467_v31  ;;  %v2770_v52 = vadd.f32 %v4683_v53, %v2466_v37 }
 0x223   : > { %v2773_v42 = vadd.f32 %v4686_v6, %v2469_v27  ;;  %v2772_v7 = vadd.f32 %v4685_v15, %v2468_v35  ;;  %v4311_v36 = vsel %vm766_vm1, 1.0, %v9840_v28  ;;  %v4312_v34 = vsel %vm767_vm15, 1.0, %v9840_v28  ;;  %v2219_v55 = vpop.permute.xlu1 %2218  ;;  %v8975_v58 = vpop.permute.xlu0 %2224 }
 0x224   : > { %vm1974_vm7 = vcmp.eq.s32.totalorder %v5892_v43, %v1915_v16  ;;  %vm1975_vm9 = vcmp.eq.s32.totalorder %v5902_v46, %v1915_v16  ;;  %v4247_v29 = vsel %vm462_vm2, 1.0, %v9840_v28  ;;  %v4313_v59 = vsel %vm768_vm3, 1.0, %v9840_v28  ;;  %2974 = vmatprep.mubr.f32.mxu0 %v2771_v48 }
 0x225   : > { %vm1976_vm1 = vcmp.eq.s32.totalorder %v5905_v47, %v1915_v16  ;;  %vm1977_vm8 = vcmp.eq.s32.totalorder %v5908_v49, %v1915_v16  ;;  %3119 = vmatprep.mubr.f32.mxu1 %v2773_v42  ;;  %v4248_v32 = vsel %vm463_vm6, 1.0, %v9840_v28  ;;  %v4249_v24 = vsel %vm464_vm11, 1.0, %v9840_v28  ;;  %2975 = vmatmul.mubr.f32.gmra.mrb[24].mxu0 %v2770_v52 }
 0x226   : > { %v4250_v20 = vsel %vm465_vm12, 1.0, %v9840_v28  ;;  %v4314_v40 = vsel %vm769_vm5, 1.0, %v9840_v28  ;;  %v8931_v22 = vadd.f32 %v4311_v36, %v4247_v29  ;;  %v8933_v62 = vadd.f32 %v4312_v34, %v4248_v32  ;;  %3120 = vmatmul.mubr.f32.gmra.mrb[24].mxu1 %v2772_v7 }
 0x227   : > { %v4559_v4 = vsel %vm1974_vm7, 1.0, %v9840_v28  ;;  %v4560_v2 = vsel %vm1975_vm9, 1.0, %v9840_v28  ;;  %v8941_v50 = vadd.f32 %v4313_v59, %v4249_v24  ;;  %v4561_v63 = vsel %vm1976_vm1, 1.0, %v9840_v28  ;;  %v4837_v41 = vpop.f32.mrb[0].mxu1 }
 0x228   : > { %v4562_v19 = vsel %vm1977_vm8, 1.0, %v9840_v28  ;;  %vm1978_vm15 = vcmp.eq.s32.totalorder %v5892_v43, %v1918_v30  ;;  %v8950_v38 = vadd.f32 %v4314_v40, %v4250_v20  ;;  %vm1979_vm2 = vcmp.eq.s32.totalorder %v5902_v46, %v1918_v30  ;;  %v8993_v56 = vpop.permute.xlu1 %1312  ;;  %v4838_v14 = vpop.f32.mrb[1].mxu1 }
 0x229   : > { %vm1980_vm3 = vcmp.eq.s32.totalorder %v5905_v47, %v1918_v30  ;;  %vm1981_vm6 = vcmp.eq.s32.totalorder %v5908_v49, %v1918_v30  ;;  %v2166_v17 = vadd.f32 %v4559_v4, %v8743_v13  ;;  %v2167_v33 = vadd.f32 %v4560_v2, %v8746_v18 }
 0x22a   : > { %vm2282_vm11 = vcmp.eq.s32.totalorder %v5892_v43, %v2222_v60  ;;  %vm2283_vm12 = vcmp.eq.s32.totalorder %v5902_v46, %v2222_v60  ;;  %v2168_v26 = vadd.f32 %v4561_v63, %v8749_v1  ;;  %v2169_v8 = vadd.f32 %v4562_v19, %v8763_v44  ;;  %v4757_v1 = vpop.f32.mrb[0].mxu0 }
 0x22b   : > { %v8962_v21 = vsel %vm1978_vm15, 1.0, %v9840_v28  ;;  %vm2284_vm5 = vcmp.eq.s32.totalorder %v5905_v47, %v2222_v60  ;;  %v8966_v11 = vsel %vm1979_vm2, 1.0, %v9840_v28  ;;  %v8969_v13 = vsel %vm1980_vm3, 1.0, %v9840_v28  ;;  %v4758_v10 = vpop.f32.mrb[1].mxu0 }
 0x22c   : > { %v8972_v18 = vsel %vm1981_vm6, 1.0, %v9840_v28  ;;  %vm2285_vm0 = vcmp.eq.s32.totalorder %v5908_v49, %v2222_v60  ;;  %vm3156_vm10 = vcmask 261120   ;;  %v8978_v44 = vsel %vm2282_vm11, 1.0, %v9840_v28 }
 0x22d   : > { %v8981_v3 = vsel %vm2283_vm12, 1.0, %v9840_v28  ;;  %vm2278_vm13 = vcmp.eq.s32.totalorder %v5892_v43, %v2219_v55  ;;  %v8985_v23 = vsel %vm2284_vm5, 1.0, %v9840_v28  ;;  %vm2279_vm4 = vcmp.eq.s32.totalorder %v5902_v46, %v2219_v55 }
 0x22e   : > { %vm2280_vm14 = vcmp.eq.s32.totalorder %v5905_v47, %v2219_v55  ;;  %vm2281_vm7 = vcmp.eq.s32.totalorder %v5908_v49, %v2219_v55  ;;  %v4759_v12 = vadd.f32 %v4758_v10, %v4757_v1  ;;  %v8991_v57 = vsel %vm2285_vm0, 1.0, %v9840_v28 }
 0x22f   : > { %vm2286_vm9 = vcmp.eq.s32.totalorder %v5892_v43, %v8975_v58  ;;  %vm2287_vm1 = vcmp.eq.s32.totalorder %v5902_v46, %v8975_v58  ;;  %vm1070_vm8 = vcmp.eq.s32.totalorder %v5892_v43, %v8913_v5  ;;  %vm1071_vm15 = vcmp.eq.s32.totalorder %v5902_v46, %v8913_v5  ;;  %v2523_v7 = vpop.permute.xlu1 %2522 }
 0x230   : > { %vm1072_vm2 = vcmp.eq.s32.totalorder %v5905_v47, %v8913_v5  ;;  %v4623_v54 = vsel %vm2278_vm13, 1.0, %v9840_v28  ;;  %v4839_v39 = vadd.f32 %v4838_v14, %v4837_v41  ;;  %v4624_v16 = vsel %vm2279_vm4, 1.0, %v9840_v28 }
 0x231   : > { %v4625_v31 = vsel %vm2280_vm14, 1.0, %v9840_v28  ;;  %v4626_v27 = vsel %vm2281_vm7, 1.0, %v9840_v28  ;;  %vm1073_vm3 = vcmp.eq.s32.totalorder %v5908_v49, %v8913_v5  ;;  %vm2288_vm6 = vcmp.eq.s32.totalorder %v5905_v47, %v8975_v58 }
 0x232   : > { %v9016_v37 = vsel %vm2286_vm9, 1.0, %v9840_v28  ;;  %v9019_v35 = vsel %vm2287_vm1, 1.0, %v9840_v28  ;;  %v3062_v0 = vadd.f32 %v4839_v39, %v4759_v12  ;;  %v4375_v61 = vsel %vm1070_vm8, 1.0, %v9840_v28 }
 0x233   : > { %v4376_v6 = vsel %vm1071_vm15, 1.0, %v9840_v28  ;;  %v4377_v53 = vsel %vm1072_vm2, 1.0, %v9840_v28  ;;  %v2471_v15 = vadd.f32 %v4624_v16, %v2167_v33  ;;  %v2473_v30 = vadd.f32 %v4626_v27, %v2169_v8 }
 0x234   : > { %v2470_v48 = vadd.f32 %v4623_v54, %v2166_v17  ;;  %v2472_v42 = vadd.f32 %v4625_v31, %v2168_v26  ;;  %v3140_v52 = vmul.f32 0.125, %v3062_v0  ;;  %vm1374_vm11 = vcmp.eq.s32.totalorder %v5892_v43, %v8993_v56 }
 0x235   : > { %vm1375_vm12 = vcmp.eq.s32.totalorder %v5902_v46, %v8993_v56  ;;  %vm1376_vm5 = vcmp.eq.s32.totalorder %v5905_v47, %v8993_v56  ;;  %vm2582_vm0 = vcmp.eq.s32.totalorder %v5892_v43, %v2523_v7  ;;  %vm2583_vm13 = vcmp.eq.s32.totalorder %v5902_v46, %v2523_v7 }
 0x236   : > { %vm2584_vm4 = vcmp.eq.s32.totalorder %v5905_v47, %v2523_v7  ;;  %vm2585_vm14 = vcmp.eq.s32.totalorder %v5908_v49, %v2523_v7  ;;  %3157 = vst.msk [vmem:[#allocation2] sm:$0xff] %vm3156_vm10, %v3140_v52  ;;  %v4688_v36 = vsel %vm2583_vm13, 1.0, %v9840_v28  ;;  %v4687_v29 = vsel %vm2582_vm0, 1.0, %v9840_v28  ;;  %v1617_v33 = vpop.permute.xlu1 %1616 }
 0x237   : > { %v4690_v34 = vsel %vm2585_vm14, 1.0, %v9840_v28  ;;  %v4689_v59 = vsel %vm2584_vm4, 1.0, %v9840_v28  ;;  %v2775_v32 = vadd.f32 %v4688_v36, %v2471_v15  ;;  %v2774_v20 = vadd.f32 %v4687_v29, %v2470_v48 }
 0x238   : > { %v2777_v24 = vadd.f32 %v4690_v34, %v2473_v30  ;;  %v2776_v40 = vadd.f32 %v4689_v59, %v2472_v42  ;;  %vm2289_vm7 = vcmp.eq.s32.totalorder %v5908_v49, %v8975_v58  ;;  %v4378_v4 = vsel %vm1073_vm3, 1.0, %v9840_v28 }
 0x239   : > { %v1262_v2 = vadd.f32 %v4375_v61, %v8931_v22  ;;  %v9050_v60 = vsel %vm2288_vm6, 1.0, %v9840_v28  ;;  %v2171_v63 = vadd.f32 %v8966_v11, %v8877_v51  ;;  %v1263_v19 = vadd.f32 %v4376_v6, %v8933_v62  ;;  %2979 = vmatprep.mubr.f32.mxu0 %v2775_v32  ;;  %v4760_v16 = vpop.f32.mrb[2].mxu0 }
 0x23a   : > { %v1264_v17 = vadd.f32 %v4377_v53, %v8941_v50  ;;  %v4439_v5 = vsel %vm1374_vm11, 1.0, %v9840_v28  ;;  %v4440_v22 = vsel %vm1375_vm12, 1.0, %v9840_v28  ;;  %3124 = vmatprep.mubr.f32.mxu1 %v2777_v24  ;;  %vm1377_vm9 = vcmp.eq.s32.totalorder %v5908_v49, %v8993_v56  ;;  %2980 = vmatmul.mubr.f32.gmra.mrb[26].mxu0 %v2774_v20 }
 0x23b   : > { %v4441_v51 = vsel %vm1376_vm5, 1.0, %v9840_v28  ;;  %vm1678_vm1 = vcmp.eq.s32.totalorder %v5892_v43, %v1617_v33  ;;  %vm1679_vm8 = vcmp.eq.s32.totalorder %v5902_v46, %v1617_v33  ;;  %vm1680_vm15 = vcmp.eq.s32.totalorder %v5905_v47, %v1617_v33  ;;  %3125 = vmatmul.mubr.f32.gmra.mrb[26].mxu1 %v2776_v40  ;;  %v1921_v39 = vpop.permute.xlu1 %1920 }
 0x23c   : > { %vm1681_vm2 = vcmp.eq.s32.totalorder %v5908_v49, %v1617_v33  ;;  %v4503_v62 = vsel %vm1678_vm1, 1.0, %v9840_v28  ;;  %v4504_v50 = vsel %vm1679_vm8, 1.0, %v9840_v28  ;;  %v1265_v55 = vadd.f32 %v4378_v4, %v8950_v38 }
 0x23d   : > { %v1566_v26 = vadd.f32 %v4439_v5, %v1262_v2  ;;  %v1567_v8 = vadd.f32 %v4440_v22, %v1263_v19  ;;  %v2173_v11 = vadd.f32 %v8972_v18, %v8883_v9  ;;  %v4442_v1 = vsel %vm1377_vm9, 1.0, %v9840_v28  ;;  %v4840_v18 = vpop.f32.mrb[2].mxu1 }
 0x23e   : > { %v1568_v10 = vadd.f32 %v4441_v51, %v1264_v17  ;;  %v2170_v41 = vadd.f32 %v8962_v21, %v8874_v45  ;;  %v2172_v12 = vadd.f32 %v8969_v13, %v8880_v25  ;;  %v4505_v56 = vsel %vm1680_vm15, 1.0, %v9840_v28  ;;  %v4761_v45 = vpop.f32.mrb[3].mxu0  ;;  %v4841_v6 = vpop.f32.mrb[3].mxu1 }
 0x23f   : > { %v4506_v14 = vsel %vm1681_vm2, 1.0, %v9840_v28  ;;  %v1870_v54 = vadd.f32 %v4503_v62, %v1566_v26  ;;  %v1871_v38 = vadd.f32 %v4504_v50, %v1567_v8  ;;  %vm1982_vm3 = vcmp.eq.s32.totalorder %v5892_v43, %v1921_v39 }
 0x240   : > { %vm1983_vm6 = vcmp.eq.s32.totalorder %v5902_v46, %v1921_v39  ;;  %vm1984_vm11 = vcmp.eq.s32.totalorder %v5905_v47, %v1921_v39  ;;  %vm1985_vm12 = vcmp.eq.s32.totalorder %v5908_v49, %v1921_v39  ;;  %v1569_v9 = vadd.f32 %v4442_v1, %v1265_v55  ;;  %v2526_v24 = vpop.permute.xlu1 %2525 }
 0x241   : > { %v4567_v25 = vsel %vm1982_vm3, 1.0, %v9840_v28  ;;  %v4568_v21 = vsel %vm1983_vm6, 1.0, %v9840_v28  ;;  %v4569_v13 = vsel %vm1984_vm11, 1.0, %v9840_v28  ;;  %v4762_v31 = vadd.f32 %v4761_v45, %v4760_v16 }
 0x242   : > { %v4570_v27 = vsel %vm1985_vm12, 1.0, %v9840_v28  ;;  %v2174_v0 = vadd.f32 %v4567_v25, %v1870_v54  ;;  %v2175_v61 = vadd.f32 %v4568_v21, %v1871_v38  ;;  %v1872_v53 = vadd.f32 %v4505_v56, %v1568_v10 }
 0x243   : > { %v1873_v15 = vadd.f32 %v4506_v14, %v1569_v9  ;;  %v4634_v30 = vsel %vm2289_vm7, 1.0, %v9840_v28  ;;  %v2475_v48 = vadd.f32 %v8981_v3, %v2171_v63  ;;  %v4842_v42 = vadd.f32 %v4841_v6, %v4840_v18 }
 0x244   : > { %v2477_v52 = vadd.f32 %v8991_v57, %v2173_v11  ;;  %v2474_v7 = vadd.f32 %v8978_v44, %v2170_v41  ;;  %v2476_v36 = vadd.f32 %v8985_v23, %v2172_v12  ;;  %v2176_v34 = vadd.f32 %v4569_v13, %v1872_v53  ;;  %v2529_v2 = vpop.permute.xlu1 %2528  ;;  %v4763_v17 = vpop.f32.mrb[4].mxu0 }
 0x245   : > { %v2177_v29 = vadd.f32 %v4570_v27, %v1873_v15  ;;  %v2478_v59 = vadd.f32 %v9016_v37, %v2174_v0  ;;  %v2479_v32 = vadd.f32 %v9019_v35, %v2175_v61  ;;  %v3067_v20 = vadd.f32 %v4842_v42, %v4762_v31  ;;  %v4843_v5 = vpop.f32.mrb[4].mxu1 }
 0x246   : > { %vm2586_vm5 = vcmp.eq.s32.totalorder %v5892_v43, %v2526_v24  ;;  %vm2587_vm0 = vcmp.eq.s32.totalorder %v5902_v46, %v2526_v24  ;;  %vm2588_vm13 = vcmp.eq.s32.totalorder %v5905_v47, %v2526_v24  ;;  %vm2589_vm4 = vcmp.eq.s32.totalorder %v5908_v49, %v2526_v24  ;;  %v4844_v62 = vpop.f32.mrb[5].mxu1 }
 0x247   : > { %v4692_v58 = vsel %vm2587_vm0, 1.0, %v9840_v28  ;;  %v4691_v44 = vsel %vm2586_vm5, 1.0, %v9840_v28  ;;  %v4693_v3 = vsel %vm2588_vm13, 1.0, %v9840_v28  ;;  %v3141_v23 = vmul.f32 0.125, %v3067_v20 }
 0x248   : > { %v2779_v57 = vadd.f32 %v4692_v58, %v2475_v48  ;;  %v4694_v37 = vsel %vm2589_vm4, 1.0, %v9840_v28  ;;  %v2778_v35 = vadd.f32 %v4691_v44, %v2474_v7  ;;  %v2480_v40 = vadd.f32 %v9050_v60, %v2176_v34 }
 0x249   : > { %v2481_v4 = vadd.f32 %v4634_v30, %v2177_v29  ;;  %v2781_v63 = vadd.f32 %v4694_v37, %v2477_v52  ;;  %v2780_v19 = vadd.f32 %v4693_v3, %v2476_v36  ;;  %3158 = vst.msk [vmem:[#allocation2 + $0x8] sm:$0xff] %vm3156_vm10, %v3141_v23  ;;  %vm2590_vm14 = vcmp.eq.s32.totalorder %v5892_v43, %v2529_v2  ;;  %v4764_v43 = vpop.f32.mrb[5].mxu0 }
 0x24a   : > { %vm2591_vm7 = vcmp.eq.s32.totalorder %v5902_v46, %v2529_v2  ;;  %vm2592_vm9 = vcmp.eq.s32.totalorder %v5905_v47, %v2529_v2  ;;  %vm2593_vm1 = vcmp.eq.s32.totalorder %v5908_v49, %v2529_v2  ;;  %2984 = vmatprep.mubr.f32.mxu0 %v2779_v57  ;;  %v4695_v22 = vsel %vm2590_vm14, 1.0, %v9840_v28 }
 0x24b   : > { %v4696_v60 = vsel %vm2591_vm7, 1.0, %v9840_v28  ;;  %v4697_v33 = vsel %vm2592_vm9, 1.0, %v9840_v28  ;;  %v4698_v51 = vsel %vm2593_vm1, 1.0, %v9840_v28  ;;  %3129 = vmatprep.mubr.f32.mxu1 %v2781_v63  ;;  %2985 = vmatmul.mubr.f32.gmra.mrb[28].mxu0 %v2778_v35  ;;  %v2782_v50 = vadd.f32 %v4695_v22, %v2478_v59 }
 0x24c   : > { %3130 = vmatmul.mubr.f32.gmra.mrb[28].mxu1 %v2780_v19  ;;  %v2783_v46 = vadd.f32 %v4696_v60, %v2479_v32  ;;  %v2785_v47 = vadd.f32 %v4698_v51, %v2481_v4  ;;  %v2784_v49 = vadd.f32 %v4697_v33, %v2480_v40  ;;  %v4765_v55 = vadd.f32 %v4764_v43, %v4763_v17 }
 0x24d   : > { %v4845_v26 = vadd.f32 %v4844_v62, %v4843_v5  ;;  %vm3173_vm8 = vcmask 7168   ;;  %v5397_v57 = vmov -inf  }
 0x24e   : > { %2989 = vmatprep.mubr.f32.mxu0 %v2783_v46  ;;  %3134 = vmatprep.mubr.f32.mxu1 %v2785_v47  ;;  %3174 = vst.msk [vmem:[#allocation3] sm:$0xff] %vm3173_vm8, %v5397_v57  ;;  %3175 = vst.msk [vmem:[#allocation3 + $0x8] sm:$0xff] %vm3173_vm8, %v5397_v57 }
 0x24f   : > { %v3072_v8 = vadd.f32 %v4845_v26, %v4765_v55  ;;  %2990 = vmatmul.mubr.f32.gmra.mrb[30].mxu0 %v2782_v50  ;;  %3176 = vst.msk [vmem:[#allocation3 + $0x10] sm:$0xff] %vm3173_vm8, %v5397_v57  ;;  %3177 = vst.msk [vmem:[#allocation3 + $0x18] sm:$0xff] %vm3173_vm8, %v5397_v57 }
 0x250   : > { %3135 = vmatmul.mubr.f32.gmra.mrb[30].mxu1 %v2784_v49  ;;  %3178 = vst.msk [vmem:[#allocation3 + $0x20] sm:$0xff] %vm3173_vm8, %v5397_v57  ;;  %3179 = vst.msk [vmem:[#allocation3 + $0x28] sm:$0xff] %vm3173_vm8, %v5397_v57 }
 0x251   : > { %v3142_v11 = vmul.f32 0.125, %v3072_v8  ;;  %3180 = vst.msk [vmem:[#allocation3 + $0x30] sm:$0xff] %vm3173_vm8, %v5397_v57  ;;  %3181 = vst.msk [vmem:[#allocation3 + $0x38] sm:$0xff] %vm3173_vm8, %v5397_v57 }
 0x252   : > { %3182 = vst.msk [vmem:[#allocation3 + $0x40] sm:$0xff] %vm3173_vm8, %v5397_v57  ;;  %3183 = vst.msk [vmem:[#allocation3 + $0x48] sm:$0xff] %vm3173_vm8, %v5397_v57 }
 0x253   : > { %3159 = vst.msk [vmem:[#allocation2 + $0x10] sm:$0xff] %vm3156_vm10, %v3142_v11 }
 0x254   : > { %3184 = vst.msk [vmem:[#allocation3 + $0x50] sm:$0xff] %vm3173_vm8, %v5397_v57  ;;  %3185 = vst.msk [vmem:[#allocation3 + $0x58] sm:$0xff] %vm3173_vm8, %v5397_v57 }
 0x255   : > { %3186 = vst.msk [vmem:[#allocation3 + $0x60] sm:$0xff] %vm3173_vm8, %v5397_v57  ;;  %3187 = vst.msk [vmem:[#allocation3 + $0x68] sm:$0xff] %vm3173_vm8, %v5397_v57 }
 0x256   : > { %3188 = vst.msk [vmem:[#allocation3 + $0x70] sm:$0xff] %vm3173_vm8, %v5397_v57  ;;  %3189 = vst.msk [vmem:[#allocation3 + $0x78] sm:$0xff] %vm3173_vm8, %v5397_v57 }
 0x257   : > { %3190 = vst.msk [vmem:[#allocation4] sm:$0xff] %vm3173_vm8, %v9840_v28  ;;  %3191 = vst.msk [vmem:[#allocation4 + $0x8] sm:$0xff] %vm3173_vm8, %v9840_v28 }
 0x258   : > { %3192 = vst.msk [vmem:[#allocation4 + $0x10] sm:$0xff] %vm3173_vm8, %v9840_v28  ;;  %3193 = vst.msk [vmem:[#allocation4 + $0x18] sm:$0xff] %vm3173_vm8, %v9840_v28 }
 0x259   : > { %3194 = vst.msk [vmem:[#allocation4 + $0x20] sm:$0xff] %vm3173_vm8, %v9840_v28  ;;  %3195 = vst.msk [vmem:[#allocation4 + $0x28] sm:$0xff] %vm3173_vm8, %v9840_v28 }
 0x25a   : > { %3196 = vst.msk [vmem:[#allocation4 + $0x30] sm:$0xff] %vm3173_vm8, %v9840_v28  ;;  %3197 = vst.msk [vmem:[#allocation4 + $0x38] sm:$0xff] %vm3173_vm8, %v9840_v28 }
 0x25b   : > { %3198 = vst.msk [vmem:[#allocation4 + $0x40] sm:$0xff] %vm3173_vm8, %v9840_v28  ;;  %3199 = vst.msk [vmem:[#allocation4 + $0x48] sm:$0xff] %vm3173_vm8, %v9840_v28 }
 0x25c   : > { %3200 = vst.msk [vmem:[#allocation4 + $0x50] sm:$0xff] %vm3173_vm8, %v9840_v28  ;;  %3201 = vst.msk [vmem:[#allocation4 + $0x58] sm:$0xff] %vm3173_vm8, %v9840_v28 }
 0x25d   : > { %3202 = vst.msk [vmem:[#allocation4 + $0x60] sm:$0xff] %vm3173_vm8, %v9840_v28  ;;  %3203 = vst.msk [vmem:[#allocation4 + $0x68] sm:$0xff] %vm3173_vm8, %v9840_v28 }
 0x25e   : > { %3204 = vst.msk [vmem:[#allocation4 + $0x70] sm:$0xff] %vm3173_vm8, %v9840_v28  ;;  %3205 = vst.msk [vmem:[#allocation4 + $0x78] sm:$0xff] %vm3173_vm8, %v9840_v28 }
 0x262   : > { %v4766_v1 = vpop.f32.mrb[6].mxu0  ;;  %v4846_v10 = vpop.f32.mrb[6].mxu1 }
 0x263   : > { %v4767_v41 = vpop.f32.mrb[7].mxu0  ;;  %v4847_v12 = vpop.f32.mrb[7].mxu1 }
 0x264   : > { %v4768_v56 = vadd.f32 %v4767_v41, %v4766_v1  ;;  %v4848_v14 = vadd.f32 %v4847_v12, %v4846_v10 }
 0x266   : > { %v3077_v54 = vadd.f32 %v4848_v14, %v4768_v56 }
 0x268   : > { %v3143_v38 = vmul.f32 0.125, %v3077_v54 }
 0x26a   : > { %3160 = vst.msk [vmem:[#allocation2 + $0x18] sm:$0xff] %vm3156_vm10, %v3143_v38 }
 0x270   : > { %v4769_v39 = vpop.f32.mrb[8].mxu0  ;;  %v4849_v16 = vpop.f32.mrb[8].mxu1 }
 0x271   : > { %v4770_v45 = vpop.f32.mrb[9].mxu0  ;;  %v4850_v9 = vpop.f32.mrb[9].mxu1 }
 0x272   : > { %v4771_v25 = vadd.f32 %v4770_v45, %v4769_v39  ;;  %v4851_v21 = vadd.f32 %v4850_v9, %v4849_v16 }
 0x274   : > { %v3082_v13 = vadd.f32 %v4851_v21, %v4771_v25 }
 0x276   : > { %v3144_v18 = vmul.f32 0.125, %v3082_v13 }
 0x278   : > { %3161 = vst.msk [vmem:[#allocation2 + $0x20] sm:$0xff] %vm3156_vm10, %v3144_v18 }
 0x281   : > { %v4772_v31 = vpop.f32.mrb[10].mxu0  ;;  %v4852_v27 = vpop.f32.mrb[10].mxu1 }
 0x282   : > { %v4773_v0 = vpop.f32.mrb[11].mxu0  ;;  %v4853_v61 = vpop.f32.mrb[11].mxu1 }
 0x283   : > { %v4774_v6 = vadd.f32 %v4773_v0, %v4772_v31  ;;  %v4854_v53 = vadd.f32 %v4853_v61, %v4852_v27 }
 0x285   : > { %v3087_v15 = vadd.f32 %v4854_v53, %v4774_v6 }
 0x287   : > { %v3145_v30 = vmul.f32 0.125, %v3087_v15 }
 0x289   : > { %3162 = vst.msk [vmem:[#allocation2 + $0x28] sm:$0xff] %vm3156_vm10, %v3145_v30 }
 0x292   : > { %v4775_v48 = vpop.f32.mrb[12].mxu0  ;;  %v4855_v42 = vpop.f32.mrb[12].mxu1 }
 0x293   : > { %v4776_v52 = vpop.f32.mrb[13].mxu0  ;;  %v4856_v7 = vpop.f32.mrb[13].mxu1 }
 0x294   : > { %v4777_v36 = vadd.f32 %v4776_v52, %v4775_v48  ;;  %v4857_v34 = vadd.f32 %v4856_v7, %v4855_v42 }
 0x296   : > { %v3092_v29 = vadd.f32 %v4857_v34, %v4777_v36 }
 0x298   : > { %v3146_v59 = vmul.f32 0.125, %v3092_v29 }
 0x29a   : > { %3163 = vst.msk [vmem:[#allocation2 + $0x30] sm:$0xff] %vm3156_vm10, %v3146_v59 }
 0x2a3   : > { %v4778_v32 = vpop.f32.mrb[14].mxu0 }
 0x2a4   : > { %v4858_v24 = vpop.f32.mrb[14].mxu1  ;;  %v4779_v20 = vpop.f32.mrb[15].mxu0 }
 0x2a5   : > { %v4859_v58 = vpop.f32.mrb[15].mxu1  ;;  %v4780_v44 = vadd.f32 %v4779_v20, %v4778_v32 }
 0x2a6   : > { %v4860_v3 = vadd.f32 %v4859_v58, %v4858_v24 }
 0x2a8   : > { %v3097_v23 = vadd.f32 %v4860_v3, %v4780_v44 }
 0x2aa   : > { %v3147_v37 = vmul.f32 0.125, %v3097_v23 }
 0x2ac   : > { %3164 = vst.msk [vmem:[#allocation2 + $0x38] sm:$0xff] %vm3156_vm10, %v3147_v37 }
 0x2b3   : > { %v4781_v35 = vpop.f32.mrb[16].mxu0 }
 0x2b4   : > { %v4861_v40 = vpop.f32.mrb[16].mxu1  ;;  %v4782_v4 = vpop.f32.mrb[17].mxu0 }
 0x2b5   : > { %v4862_v2 = vpop.f32.mrb[17].mxu1  ;;  %v4783_v63 = vadd.f32 %v4782_v4, %v4781_v35 }
 0x2b6   : > { %v4863_v19 = vadd.f32 %v4862_v2, %v4861_v40 }
 0x2b8   : > { %v3102_v17 = vadd.f32 %v4863_v19, %v4783_v63 }
 0x2ba   : > { %v3148_v5 = vmul.f32 0.125, %v3102_v17 }
 0x2bc   : > { %3165 = vst.msk [vmem:[#allocation2 + $0x40] sm:$0xff] %vm3156_vm10, %v3148_v5 }
 0x2c5   : > { %v4784_v22 = vpop.f32.mrb[18].mxu0  ;;  %v4864_v60 = vpop.f32.mrb[18].mxu1 }
 0x2c6   : > { %v4785_v33 = vpop.f32.mrb[19].mxu0  ;;  %v4865_v51 = vpop.f32.mrb[19].mxu1 }
 0x2c7   : > { %v4786_v43 = vadd.f32 %v4785_v33, %v4784_v22  ;;  %v4866_v62 = vadd.f32 %v4865_v51, %v4864_v60 }
 0x2c9   : > { %v3107_v28 = vadd.f32 %v4866_v62, %v4786_v43 }
 0x2cb   : > { %v3149_v46 = vmul.f32 0.125, %v3107_v28 }
 0x2cd   : > { %3166 = vst.msk [vmem:[#allocation2 + $0x48] sm:$0xff] %vm3156_vm10, %v3149_v46 }
 0x2d7   : > { %v4787_v47 = vpop.f32.mrb[20].mxu0  ;;  %v4867_v50 = vpop.f32.mrb[20].mxu1 }
 0x2d8   : > { %v4788_v49 = vpop.f32.mrb[21].mxu0  ;;  %v4868_v55 = vpop.f32.mrb[21].mxu1 }
 0x2d9   : > { %v4789_v26 = vadd.f32 %v4788_v49, %v4787_v47  ;;  %v4869_v8 = vadd.f32 %v4868_v55, %v4867_v50 }
 0x2db   : > { %v3112_v11 = vadd.f32 %v4869_v8, %v4789_v26 }
 0x2dd   : > { %v3150_v1 = vmul.f32 0.125, %v3112_v11 }
 0x2df   : > { %3167 = vst.msk [vmem:[#allocation2 + $0x50] sm:$0xff] %vm3156_vm10, %v3150_v1 }
 0x2e8   : > { %v4790_v10 = vpop.f32.mrb[22].mxu0 }
 0x2e9   : > { %v4870_v41 = vpop.f32.mrb[22].mxu1  ;;  %v4791_v12 = vpop.f32.mrb[23].mxu0 }
 0x2ea   : > { %v4792_v56 = vadd.f32 %v4791_v12, %v4790_v10  ;;  %v4871_v14 = vpop.f32.mrb[23].mxu1 }
 0x2eb   : > { %v4872_v54 = vadd.f32 %v4871_v14, %v4870_v41 }
 0x2ed   : > { %v3117_v38 = vadd.f32 %v4872_v54, %v4792_v56 }
 0x2ef   : > { %v3151_v39 = vmul.f32 0.125, %v3117_v38 }
 0x2f1   : > { %3168 = vst.msk [vmem:[#allocation2 + $0x58] sm:$0xff] %vm3156_vm10, %v3151_v39 }
 0x2f8   : > { %v4793_v16 = vpop.f32.mrb[24].mxu0 }
 0x2f9   : > { %v4873_v45 = vpop.f32.mrb[24].mxu1  ;;  %v4794_v9 = vpop.f32.mrb[25].mxu0 }
 0x2fa   : > { %v4795_v25 = vadd.f32 %v4794_v9, %v4793_v16  ;;  %v4874_v21 = vpop.f32.mrb[25].mxu1 }
 0x2fb   : > { %v4875_v13 = vadd.f32 %v4874_v21, %v4873_v45 }
 0x2fd   : > { %v3122_v18 = vadd.f32 %v4875_v13, %v4795_v25 }
 0x2ff   : > { %v3152_v31 = vmul.f32 0.125, %v3122_v18 }
 0x301   : > { %3169 = vst.msk [vmem:[#allocation2 + $0x60] sm:$0xff] %vm3156_vm10, %v3152_v31 }
 0x30d   : > { %v4796_v27 = vpop.f32.mrb[26].mxu0 }
 0x30e   : > { %v4876_v0 = vpop.f32.mrb[26].mxu1  ;;  %v4797_v61 = vpop.f32.mrb[27].mxu0 }
 0x30f   : > { %v4798_v6 = vadd.f32 %v4797_v61, %v4796_v27  ;;  %v4877_v53 = vpop.f32.mrb[27].mxu1 }
 0x310   : > { %v4878_v15 = vadd.f32 %v4877_v53, %v4876_v0 }
 0x312   : > { %v3127_v30 = vadd.f32 %v4878_v15, %v4798_v6 }
 0x314   : > { %v3153_v48 = vmul.f32 0.125, %v3127_v30 }
 0x316   : > { %3170 = vst.msk [vmem:[#allocation2 + $0x68] sm:$0xff] %vm3156_vm10, %v3153_v48 }
 0x31e   : > { %v4799_v42 = vpop.f32.mrb[28].mxu0 }
 0x31f   : > { %v4879_v52 = vpop.f32.mrb[28].mxu1  ;;  %v4800_v7 = vpop.f32.mrb[29].mxu0 }
 0x320   : > { %v4801_v36 = vadd.f32 %v4800_v7, %v4799_v42  ;;  %v4880_v34 = vpop.f32.mrb[29].mxu1 }
 0x321   : > { %v4881_v29 = vadd.f32 %v4880_v34, %v4879_v52 }
 0x322   : > { %v4802_v59 = vpop.f32.mrb[30].mxu0 }
 0x323   : > { %v3132_v32 = vadd.f32 %v4881_v29, %v4801_v36  ;;  %v4882_v24 = vpop.f32.mrb[30].mxu1  ;;  %v4803_v20 = vpop.f32.mrb[31].mxu0 }
 0x324   : > { %v4804_v58 = vadd.f32 %v4803_v20, %v4802_v59  ;;  %v4883_v44 = vpop.f32.mrb[31].mxu1 }
 0x325   : > { %v3154_v3 = vmul.f32 0.125, %v3132_v32  ;;  %v4884_v23 = vadd.f32 %v4883_v44, %v4882_v24 }
 0x327   : > { %3171 = vst.msk [vmem:[#allocation2 + $0x70] sm:$0xff] %vm3156_vm10, %v3154_v3  ;;  %v3137_v57 = vadd.f32 %v4884_v23, %v4804_v58 }
 0x329   : > { %v3155_v37 = vmul.f32 0.125, %v3137_v57 }
 0x32b   : > { %3172 = vst.msk [vmem:[#allocation2 + $0x78] sm:$0xff] %vm3156_vm10, %v3155_v37 }
 0x32c PF: > { %v3223_v35 = vld [vmem:[%s5560_s11 + $0x8] sm:$0xff]  ;;  %v3225_v40 = vld [vmem:[%s5560_s11 + $0x18] sm:$0xff]  ;;  %v3222_v4 = vld [vmem:[%s5560_s11] sm:$0xff]  ;;  %v5398_v5 = vmov 0.0   ;;  %vm3242_vm10 = vcmask 261120   ;;  %v3232_v54 = vlaneseq  ;;  %vm3884_vm15 = vcmask 7168  }
 0x32d   : > { %v4949_v2 = vpack.c.bf16 %v3225_v40, %v3223_v35  ;;  %v3224_v63 = vld [vmem:[%s5560_s11 + $0x10] sm:$0xff]  ;;  %v3227_v19 = vld [vmem:[%s5560_s11 + $0x28] sm:$0xff]  ;;  %v3229_v17 = vld [vmem:[%s5560_s11 + $0x38] sm:$0xff]  ;;  %3355 = vmatprep.mubr.f32.mxu0 %v5398_v5  ;;  %3403 = vmatprep.mubr.f32.mxu1 %v5398_v5  ;;  %p4715_p6 = scmp.ne.s32.totalorder %s5370_s23, 1 }
 0x32e   : > { %v4951_v22 = vpack.c.bf16 %v3224_v63, %v3222_v4  ;;  %v4953_v60 = vpack.c.bf16 %v3229_v17, %v3227_v19  ;;  %v3226_v33 = vld [vmem:[%s5560_s11 + $0x20] sm:$0xff]  ;;  %v3228_v51 = vld [vmem:[%s5560_s11 + $0x30] sm:$0xff]  ;;  %v3207_v46 = vld [vmem:[#allocation2 + $0x8] sm:$0xff]  ;;  %v3233_v38 = vshrl.u32 %v3232_v54, 7 }
 0x32f   : > { %4950 = vmatprep.subr.bf16.mxu0 %v4949_v2  ;;  %4957 = vmatprep.subr.bf16.mxu1 %v4949_v2  ;;  %v4955_v43 = vpack.c.bf16 %v3228_v51, %v3226_v33  ;;  %v3206_v62 = vld [vmem:[#allocation2] sm:$0xff]  ;;  %v3215_v47 = vld [vmem:[#allocation2 + $0x48] sm:$0xff]  ;;  %v3208_v50 = vld [vmem:[#allocation2 + $0x10] sm:$0xff] }
 0x330   : > { %4952 = vmatpush1.bf16.msra.mxu0 %v4951_v22  ;;  %4959 = vmatpush1.bf16.msra.mxu1 %v4951_v22  ;;  %v3214_v28 = vld [vmem:[#allocation2 + $0x40] sm:$0xff]  ;;  %v3216_v49 = vld [vmem:[#allocation2 + $0x50] sm:$0xff]  ;;  %v3209_v55 = vld [vmem:[#allocation2 + $0x18] sm:$0xff]  ;;  %v3234_v39 = vsub.s32 0, %v3233_v38  ;;  %v3238_v45 = vsub.s32 1, %v3233_v38 }
 0x331   : > { %4954 = vmatprep.subr.bf16.mxu0 %v4953_v60  ;;  %4958 = vmatprep.subr.bf16.mxu1 %v4953_v60  ;;  %v3217_v26 = vld [vmem:[#allocation2 + $0x58] sm:$0xff]  ;;  %v3210_v8 = vld [vmem:[#allocation2 + $0x20] sm:$0xff]  ;;  %v3211_v1 = vld [vmem:[#allocation2 + $0x28] sm:$0xff] }
 0x332   : > { %v3218_v11 = vld [vmem:[#allocation2 + $0x60] sm:$0xff]  ;;  %v3219_v10 = vld [vmem:[#allocation2 + $0x68] sm:$0xff]  ;;  %v3212_v41 = vld [vmem:[#allocation2 + $0x30] sm:$0xff] }
 0x333   : > { %v3220_v12 = vld [vmem:[#allocation2 + $0x70] sm:$0xff]  ;;  %v3213_v56 = vld [vmem:[#allocation2 + $0x38] sm:$0xff]  ;;  %v3230_v16 = vld [vmem:[%s319_s13] sm:$0x3] }
 0x334   : > { %4956 = vmatpush1.bf16.msra.mxu0 %v4955_v43  ;;  %4960 = vmatpush1.bf16.msra.mxu1 %v4955_v43  ;;  %v3221_v14 = vld [vmem:[#allocation2 + $0x78] sm:$0xff]  ;;  %v9213_v9 = vrot.slane %v3230_v16, %v3234_v39  ;;  %v9215_v25 = vrot.slane %v3230_v16, %v3238_v45 }
 0x337   : > { %4699 = vmatmul.mubr.msk.f32.vlgmr.msra.gmra.mrb[0].mxu0 %vm3242_vm10, %v3206_v62  ;;  %4707 = vmatmul.mubr.msk.f32.vlgmr.msra.gmra.mrb[0].mxu1 %vm3242_vm10, %v3214_v28 }
 0x338   : > { %3361 = vmatprep.mubr.f32.mxu0 %v5398_v5  ;;  %3409 = vmatprep.mubr.f32.mxu1 %v5398_v5 }
 0x33b   : > { %4700 = vmatmul.mubr.msk.f32.gmra.mrb[2].mxu0 %vm3242_vm10, %v3207_v46  ;;  %4708 = vmatmul.mubr.msk.f32.gmra.mrb[2].mxu1 %vm3242_vm10, %v3215_v47 }
 0x33c   : > { %3367 = vmatprep.mubr.f32.mxu0 %v5398_v5  ;;  %3415 = vmatprep.mubr.f32.mxu1 %v5398_v5 }
 0x33f   : > { %4701 = vmatmul.mubr.msk.f32.gmra.mrb[4].mxu0 %vm3242_vm10, %v3208_v50  ;;  %4709 = vmatmul.mubr.msk.f32.gmra.mrb[4].mxu1 %vm3242_vm10, %v3216_v49 }
 0x340   : > { %3373 = vmatprep.mubr.f32.mxu0 %v5398_v5  ;;  %3421 = vmatprep.mubr.f32.mxu1 %v5398_v5 }
 0x343   : > { %4702 = vmatmul.mubr.msk.f32.gmra.mrb[6].mxu0 %vm3242_vm10, %v3209_v55  ;;  %4710 = vmatmul.mubr.msk.f32.gmra.mrb[6].mxu1 %vm3242_vm10, %v3217_v26 }
 0x344   : > { %3379 = vmatprep.mubr.f32.mxu0 %v5398_v5  ;;  %3427 = vmatprep.mubr.f32.mxu1 %v5398_v5 }
 0x347   : > { %4703 = vmatmul.mubr.msk.f32.gmra.mrb[8].mxu0 %vm3242_vm10, %v3210_v8  ;;  %4711 = vmatmul.mubr.msk.f32.gmra.mrb[8].mxu1 %vm3242_vm10, %v3218_v11 }
 0x348   : > { %3385 = vmatprep.mubr.f32.mxu0 %v5398_v5  ;;  %3433 = vmatprep.mubr.f32.mxu1 %v5398_v5 }
 0x34b   : > { %4704 = vmatmul.mubr.msk.f32.gmra.mrb[10].mxu0 %vm3242_vm10, %v3211_v1  ;;  %4712 = vmatmul.mubr.msk.f32.gmra.mrb[10].mxu1 %vm3242_vm10, %v3219_v10 }
 0x34c   : > { %3391 = vmatprep.mubr.f32.mxu0 %v5398_v5  ;;  %3439 = vmatprep.mubr.f32.mxu1 %v5398_v5 }
 0x34f   : > { %4705 = vmatmul.mubr.msk.f32.gmra.mrb[12].mxu0 %vm3242_vm10, %v3212_v41  ;;  %4713 = vmatmul.mubr.msk.f32.gmra.mrb[12].mxu1 %vm3242_vm10, %v3220_v12 }
 0x350   : > { %3397 = vmatprep.mubr.f32.mxu0 %v5398_v5  ;;  %3445 = vmatprep.mubr.f32.mxu1 %v5398_v5 }
 0x353   : > { %4706 = vmatmul.mubr.msk.f32.gmra.mrb[14].mxu0 %vm3242_vm10, %v3213_v56  ;;  %4714 = vmatmul.mubr.msk.f32.gmra.mrb[14].mxu1 %vm3242_vm10, %v3221_v14  ;;  %v5399_v56 = vmov 0  }
 0x354   : > { %5146 = vset.pattern.permute.xlu0 %v5399_v56  ;;  %5147 = vset.pattern.permute.xlu1 %v5399_v56 }
 0x40a   : > { %v3357_v21 = vpop.f32.mrb[0].mxu0  ;;  %v3405_v13 = vpop.f32.mrb[0].mxu1 }
 0x40b   : > { %v9218_v18 = vadd.f32 %v3357_v21, %v9213_v9  ;;  %v3359_v31 = vpop.f32.mrb[1].mxu0  ;;  %v9221_v27 = vadd.f32 %v3405_v13, %v9213_v9  ;;  %v3407_v0 = vpop.f32.mrb[1].mxu1 }
 0x40c   : > { %v9224_v61 = vadd.f32 %v3359_v31, %v9215_v25  ;;  %v9227_v6 = vadd.f32 %v3407_v0, %v9215_v25 }
 0x40d   : > { %3452 = vst [vmem:[%s5562_s22] sm:$0xff] %v9218_v18  ;;  %3468 = vst [vmem:[%s5562_s22 + $0x80] sm:$0xff] %v9221_v27 }
 0x40e   : > { %3453 = vst [vmem:[%s5562_s22 + $0x8] sm:$0xff] %v9224_v61  ;;  %3469 = vst [vmem:[%s5562_s22 + $0x88] sm:$0xff] %v9227_v6  ;;  %v3411_v53 = vpop.f32.mrb[2].mxu1  ;;  %v3363_v15 = vpop.f32.mrb[2].mxu0  ;;  %v3500_v30 = vmax.f32 %v9218_v18, %v9224_v61  ;;  %v3524_v29 = vmax.f32 %v9221_v27, %v9227_v6 }
 0x40f   : > { %v9240_v48 = vadd.f32 %v3411_v53, %v9213_v9  ;;  %v3413_v42 = vpop.f32.mrb[3].mxu1  ;;  %v9243_v52 = vadd.f32 %v3363_v15, %v9213_v9  ;;  %v3365_v7 = vpop.f32.mrb[3].mxu0 }
 0x410   : > { %v9246_v36 = vadd.f32 %v3413_v42, %v9215_v25  ;;  %3501 = vmax.xlane.f32.xlu0 %v3500_v30  ;;  %v9249_v34 = vadd.f32 %v3365_v7, %v9215_v25 }
 0x411   : > { %3470 = vst [vmem:[%s5562_s22 + $0x90] sm:$0xff] %v9240_v48  ;;  %3454 = vst [vmem:[%s5562_s22 + $0x10] sm:$0xff] %v9243_v52 }
 0x412   : > { %3471 = vst [vmem:[%s5562_s22 + $0x98] sm:$0xff] %v9246_v36  ;;  %3455 = vst [vmem:[%s5562_s22 + $0x18] sm:$0xff] %v9249_v34  ;;  %v3369_v59 = vpop.f32.mrb[4].mxu0  ;;  %v3527_v32 = vmax.f32 %v9240_v48, %v9246_v36  ;;  %v3417_v24 = vpop.f32.mrb[4].mxu1  ;;  %v3503_v57 = vmax.f32 %v9243_v52, %v9249_v34 }
 0x413   : > { %v9264_v20 = vadd.f32 %v3369_v59, %v9213_v9  ;;  %v3371_v58 = vpop.f32.mrb[5].mxu0  ;;  %v9267_v44 = vadd.f32 %v3417_v24, %v9213_v9  ;;  %v3419_v3 = vpop.f32.mrb[5].mxu1 }
 0x414   : > { %v9270_v23 = vadd.f32 %v3371_v58, %v9215_v25  ;;  %3528 = vmax.xlane.f32.xlu1 %v3527_v32  ;;  %3525 = vmax.xlane.f32.xlu0 %v3524_v29  ;;  %v9275_v37 = vadd.f32 %v3419_v3, %v9215_v25 }
 0x415   : > { %3456 = vst [vmem:[%s5562_s22 + $0x20] sm:$0xff] %v9264_v20  ;;  %3472 = vst [vmem:[%s5562_s22 + $0xa0] sm:$0xff] %v9267_v44 }
 0x416   : > { %3457 = vst [vmem:[%s5562_s22 + $0x28] sm:$0xff] %v9270_v23  ;;  %v3375_v35 = vpop.f32.mrb[6].mxu0  ;;  %v3506_v40 = vmax.f32 %v9264_v20, %v9270_v23  ;;  %3473 = vst [vmem:[%s5562_s22 + $0xa8] sm:$0xff] %v9275_v37  ;;  %v3423_v4 = vpop.f32.mrb[6].mxu1  ;;  %v3530_v60 = vmax.f32 %v9267_v44, %v9275_v37 }
 0x417   : > { %v9288_v2 = vadd.f32 %v3375_v35, %v9213_v9  ;;  %v3377_v63 = vpop.f32.mrb[7].mxu0  ;;  %v9291_v19 = vadd.f32 %v3423_v4, %v9213_v9  ;;  %v3425_v17 = vpop.f32.mrb[7].mxu1 }
 0x418   : > { %v9294_v5 = vadd.f32 %v3377_v63, %v9215_v25  ;;  %3507 = vmax.xlane.f32.xlu1 %v3506_v40  ;;  %3504 = vmax.xlane.f32.xlu0 %v3503_v57  ;;  %v9297_v22 = vadd.f32 %v3425_v17, %v9215_v25  ;;  %v9409_v40 = vld [vmem:[#allocation3] sm:$0xff]  ;;  %v9414_v17 = vld [vmem:[#allocation3 + $0x48] sm:$0xff] }
 0x419   : > { %3458 = vst [vmem:[%s5562_s22 + $0x30] sm:$0xff] %v9288_v2  ;;  %3474 = vst [vmem:[%s5562_s22 + $0xb0] sm:$0xff] %v9291_v19 }
 0x41a   : > { %3459 = vst [vmem:[%s5562_s22 + $0x38] sm:$0xff] %v9294_v5  ;;  %3475 = vst [vmem:[%s5562_s22 + $0xb8] sm:$0xff] %v9297_v22  ;;  %v3381_v33 = vpop.f32.mrb[8].mxu0  ;;  %v3509_v51 = vmax.f32 %v9288_v2, %v9294_v5  ;;  %v3429_v43 = vpop.f32.mrb[8].mxu1  ;;  %v3533_v49 = vmax.f32 %v9291_v19, %v9297_v22 }
 0x41b   : > { %v9312_v62 = vadd.f32 %v3381_v33, %v9213_v9  ;;  %v3383_v28 = vpop.f32.mrb[9].mxu0  ;;  %v9315_v46 = vadd.f32 %v3429_v43, %v9213_v9  ;;  %v3431_v47 = vpop.f32.mrb[9].mxu1 }
 0x41c   : > { %3510 = vmax.xlane.f32.xlu1 %v3509_v51  ;;  %v9318_v50 = vadd.f32 %v3383_v28, %v9215_v25  ;;  %3531 = vmax.xlane.f32.xlu0 %v3530_v60  ;;  %v9323_v55 = vadd.f32 %v3431_v47, %v9215_v25  ;;  %v9416_v60 = vld [vmem:[#allocation3 + $0x40] sm:$0xff] }
 0x41d   : > { %3460 = vst [vmem:[%s5562_s22 + $0x40] sm:$0xff] %v9312_v62  ;;  %3476 = vst [vmem:[%s5562_s22 + $0xc0] sm:$0xff] %v9315_v46 }
 0x41e   : > { %3461 = vst [vmem:[%s5562_s22 + $0x48] sm:$0xff] %v9318_v50  ;;  %v3387_v26 = vpop.f32.mrb[10].mxu0  ;;  %3477 = vst [vmem:[%s5562_s22 + $0xc8] sm:$0xff] %v9323_v55  ;;  %v3435_v8 = vpop.f32.mrb[10].mxu1  ;;  %v3512_v11 = vmax.f32 %v9312_v62, %v9318_v50  ;;  %v3536_v38 = vmax.f32 %v9315_v46, %v9323_v55 }
 0x41f   : > { %v9336_v1 = vadd.f32 %v3387_v26, %v9213_v9  ;;  %v3389_v10 = vpop.f32.mrb[11].mxu0  ;;  %v9339_v41 = vadd.f32 %v3435_v8, %v9213_v9  ;;  %v3437_v12 = vpop.f32.mrb[11].mxu1  ;;  %v9431_v26 = vld [vmem:[#allocation3 + $0x8] sm:$0xff] }
 0x420   : > { %v9342_v14 = vadd.f32 %v3389_v10, %v9215_v25  ;;  %3534 = vmax.xlane.f32.xlu1 %v3533_v49  ;;  %v9345_v54 = vadd.f32 %v3437_v12, %v9215_v25  ;;  %3513 = vmax.xlane.f32.xlu0 %v3512_v11  ;;  %v9429_v49 = vld [vmem:[#allocation3 + $0x10] sm:$0xff] }
 0x421   : > { %3462 = vst [vmem:[%s5562_s22 + $0x50] sm:$0xff] %v9336_v1  ;;  %3478 = vst [vmem:[%s5562_s22 + $0xd0] sm:$0xff] %v9339_v41  ;;  %v9528_v11 = vld [vmem:[#allocation3 + $0x70] sm:$0xff] }
 0x422   : > { %3463 = vst [vmem:[%s5562_s22 + $0x58] sm:$0xff] %v9342_v14  ;;  %3479 = vst [vmem:[%s5562_s22 + $0xd8] sm:$0xff] %v9345_v54  ;;  %v3393_v39 = vpop.f32.mrb[12].mxu0  ;;  %v3515_v16 = vmax.f32 %v9336_v1, %v9342_v14  ;;  %v3441_v45 = vpop.f32.mrb[12].mxu1  ;;  %v3539_v15 = vmax.f32 %v9339_v41, %v9345_v54 }
 0x423   : > { %v9360_v21 = vadd.f32 %v3393_v39, %v9213_v9  ;;  %v3395_v13 = vpop.f32.mrb[13].mxu0  ;;  %v9363_v31 = vadd.f32 %v3441_v45, %v9213_v9  ;;  %v3443_v0 = vpop.f32.mrb[13].mxu1  ;;  %v9449_v39 = vld [vmem:[#allocation3 + $0x18] sm:$0xff]  ;;  %10039 = vst [vmem:[#allocation92_spill] sm:$0xff] %v9528_v11 }
 0x424   : > { %3516 = vmax.xlane.f32.xlu1 %v3515_v16  ;;  %v9366_v53 = vadd.f32 %v3395_v13, %v9215_v25  ;;  %v9371_v30 = vadd.f32 %v3443_v0, %v9215_v25  ;;  %3537 = vmax.xlane.f32.xlu0 %v3536_v38  ;;  %v9451_v16 = vld [vmem:[#allocation3 + $0x50] sm:$0xff]  ;;  %v9526_v45 = vld [vmem:[#allocation3 + $0x38] sm:$0xff] }
 0x425   : > { %3464 = vst [vmem:[%s5562_s22 + $0x60] sm:$0xff] %v9360_v21  ;;  %3480 = vst [vmem:[%s5562_s22 + $0xe0] sm:$0xff] %v9363_v31 }
 0x426   : > { %3465 = vst [vmem:[%s5562_s22 + $0x68] sm:$0xff] %v9366_v53  ;;  %v3399_v42 = vpop.f32.mrb[14].mxu0  ;;  %3481 = vst [vmem:[%s5562_s22 + $0xe8] sm:$0xff] %v9371_v30  ;;  %v3447_v7 = vpop.f32.mrb[14].mxu1  ;;  %v3518_v29 = vmax.f32 %v9360_v21, %v9366_v53  ;;  %v3542_v35 = vmax.f32 %v9363_v31, %v9371_v30 }
 0x427   : > { %v9384_v59 = vadd.f32 %v3399_v42, %v9213_v9  ;;  %v3401_v32 = vpop.f32.mrb[15].mxu0  ;;  %v9387_v24 = vadd.f32 %v3447_v7, %v9213_v9  ;;  %v3449_v58 = vpop.f32.mrb[15].mxu1  ;;  %10038 = vst [vmem:[#allocation91_spill] sm:$0xff] %v9526_v45 }
 0x428   : > { %v9390_v3 = vadd.f32 %v3401_v32, %v9215_v25  ;;  %3540 = vmax.xlane.f32.xlu1 %v3539_v15  ;;  %v9393_v57 = vadd.f32 %v3449_v58, %v9215_v25  ;;  %3519 = vmax.xlane.f32.xlu0 %v3518_v29  ;;  %v9468_v29 = vld [vmem:[#allocation3 + $0x58] sm:$0xff]  ;;  %v9470_v32 = vld [vmem:[#allocation3 + $0x20] sm:$0xff]  ;;  %v9507_v58 = vld [vmem:[#allocation3 + $0x68] sm:$0xff] }
 0x429   : > { %3466 = vst [vmem:[%s5562_s22 + $0x70] sm:$0xff] %v9384_v59  ;;  %3482 = vst [vmem:[%s5562_s22 + $0xf0] sm:$0xff] %v9387_v24 }
 0x42a   : > { %3467 = vst [vmem:[%s5562_s22 + $0x78] sm:$0xff] %v9390_v3  ;;  %3483 = vst [vmem:[%s5562_s22 + $0xf8] sm:$0xff] %v9393_v57  ;;  %v3521_v9 = vmax.f32 %v9384_v59, %v9390_v3  ;;  %v3545_v25 = vmax.f32 %v9387_v24, %v9393_v57 }
 0x42b   : > { %10034 = vst [vmem:[#allocation87_spill] sm:$0xff] %v9507_v58 }
 0x42c   : > { %3522 = vmax.xlane.f32.xlu1 %v3521_v9  ;;  %3543 = vmax.xlane.f32.xlu0 %v3542_v35  ;;  %v9509_v35 = vld [vmem:[#allocation3 + $0x30] sm:$0xff] }
 0x42d   : > { %10035 = vst [vmem:[#allocation88_spill] sm:$0xff] %v9509_v35 }
 0x430   : > { %3546 = vmax.xlane.f32.xlu1 %v3545_v25 }
 0x49d   : > { %v3502_v4 = vpop.xlane.xlu0 %3501 }
 0x49e   : > { %v9412_v63 = vmax.f32 %v9409_v40, %v3502_v4 }
 0x4a0   : > { %3901 = vst.msk [vmem:[#allocation3] sm:$0xff] %vm3884_vm15, %v9412_v63  ;;  %3646 = vperm.xlu0 %5146, %v9412_v63  }
 0x4a1   : > { %v3529_v51 = vpop.xlane.xlu1 %3528  ;;  %v3526_v43 = vpop.xlane.xlu0 %3525 }
 0x4a2   : > { %v9424_v28 = vmax.f32 %v9414_v17, %v3529_v51  ;;  %v9427_v47 = vmax.f32 %v9416_v60, %v3526_v43  ;;  %v9487_v43 = vld [vmem:[#allocation3 + $0x28] sm:$0xff] }
 0x4a3   : > { %10030 = vst [vmem:[#allocation83_spill] sm:$0xff] %v9487_v43 }
 0x4a4   : > { %3910 = vst.msk [vmem:[#allocation3 + $0x48] sm:$0xff] %vm3884_vm15, %v9424_v28  ;;  %3909 = vst.msk [vmem:[#allocation3 + $0x40] sm:$0xff] %vm3884_vm15, %v9427_v47  ;;  %3691 = vperm.xlu0 %5146, %v9424_v28   ;;  %3686 = vperm.xlu1 %5147, %v9427_v47  }
 0x4a5   : > { %v3508_v10 = vpop.xlane.xlu1 %3507  ;;  %v3505_v12 = vpop.xlane.xlu0 %3504 }
 0x4a6   : > { %v9444_v56 = vmax.f32 %v9429_v49, %v3508_v10  ;;  %v9447_v38 = vmax.f32 %v9431_v26, %v3505_v12  ;;  %v9489_v10 = vld [vmem:[#allocation3 + $0x60] sm:$0xff] }
 0x4a7   : > { %10031 = vst [vmem:[#allocation84_spill] sm:$0xff] %v9489_v10 }
 0x4a8   : > { %3903 = vst.msk [vmem:[#allocation3 + $0x10] sm:$0xff] %vm3884_vm15, %v9444_v56  ;;  %3902 = vst.msk [vmem:[#allocation3 + $0x8] sm:$0xff] %vm3884_vm15, %v9447_v38  ;;  %3651 = vperm.xlu1 %5147, %v9447_v38  }
 0x4a9   : > { %v3511_v0 = vpop.xlane.xlu1 %3510  ;;  %v3532_v15 = vpop.xlane.xlu0 %3531 }
 0x4aa   : > { %v9463_v42 = vmax.f32 %v9449_v39, %v3511_v0  ;;  %v9466_v7 = vmax.f32 %v9451_v16, %v3532_v15 }
 0x4ac   : > { %3904 = vst.msk [vmem:[#allocation3 + $0x18] sm:$0xff] %vm3884_vm15, %v9463_v42  ;;  %3656 = vperm.xlu1 %5147, %v9444_v56   ;;  %3911 = vst.msk [vmem:[#allocation3 + $0x50] sm:$0xff] %vm3884_vm15, %v9466_v7 }
 0x4ad   : > { %v3535_v9 = vpop.xlane.xlu1 %3534  ;;  %v3514_v25 = vpop.xlane.xlu0 %3513 }
 0x4ae   : > { %v9482_v4 = vmax.f32 %v9468_v29, %v3535_v9  ;;  %v9485_v51 = vmax.f32 %v9470_v32, %v3514_v25 }
 0x4b0   : > { %10029 = vst [vmem:[#allocation82_spill] sm:$0xff] %v9485_v51  ;;  %3912 = vst.msk [vmem:[#allocation3 + $0x58] sm:$0xff] %vm3884_vm15, %v9482_v4  ;;  %3701 = vperm.xlu0 %5146, %v9482_v4   ;;  %3696 = vperm.xlu1 %5147, %v9466_v7  }
 0x4b1   : > { %3905 = vst.msk [vmem:[#allocation3 + $0x20] sm:$0xff] %vm3884_vm15, %v9485_v51  ;;  %v3517_v15 = vpop.xlane.xlu1 %3516  ;;  %v3538_v9 = vpop.xlane.xlu0 %3537 }
 0x4b2   : > { %v9502_v25 = vmax.f32 %v9487_v43, %v3517_v15  ;;  %v9505_v12 = vmax.f32 %v9489_v10, %v3538_v9 }
 0x4b4   : > { %10032 = vst [vmem:[#allocation85_spill] sm:$0xff] %v9502_v25  ;;  %10033 = vst [vmem:[#allocation86_spill] sm:$0xff] %v9505_v12  ;;  %3661 = vperm.xlu1 %5147, %v9463_v42  }
 0x4b5   : > { %3906 = vst.msk [vmem:[#allocation3 + $0x28] sm:$0xff] %vm3884_vm15, %v9502_v25  ;;  %3913 = vst.msk [vmem:[#allocation3 + $0x60] sm:$0xff] %vm3884_vm15, %v9505_v12  ;;  %v3541_v15 = vpop.xlane.xlu1 %3540  ;;  %v3520_v9 = vpop.xlane.xlu0 %3519 }
 0x4b6   : > { %v9521_v13 = vmax.f32 %v9507_v58, %v3541_v15  ;;  %v9524_v8 = vmax.f32 %v9509_v35, %v3520_v9  ;;  %v9546_v58 = vld [vmem:[#allocation3 + $0x78] sm:$0xff] }
 0x4b7   : > { %10042 = vst [vmem:[#allocation95_spill] sm:$0xff] %v9546_v58 }
 0x4b8   : > { %10036 = vst [vmem:[#allocation89_spill] sm:$0xff] %v9521_v13  ;;  %10037 = vst [vmem:[#allocation90_spill] sm:$0xff] %v9524_v8  ;;  %3711 = vperm.xlu0 %5146, %v9521_v13   ;;  %3666 = vperm.xlu1 %5147, %v9485_v51  }
 0x4b9   : > { %3914 = vst.msk [vmem:[#allocation3 + $0x68] sm:$0xff] %vm3884_vm15, %v9521_v13  ;;  %3907 = vst.msk [vmem:[#allocation3 + $0x30] sm:$0xff] %vm3884_vm15, %v9524_v8  ;;  %v3523_v9 = vpop.xlane.xlu1 %3522  ;;  %v3544_v0 = vpop.xlane.xlu0 %3543 }
 0x4ba   : > { %v9541_v43 = vmax.f32 %v9526_v45, %v3523_v9  ;;  %v9544_v33 = vmax.f32 %v9528_v11, %v3544_v0 }
 0x4bc   : > { %10040 = vst [vmem:[#allocation93_spill] sm:$0xff] %v9541_v43  ;;  %10041 = vst [vmem:[#allocation94_spill] sm:$0xff] %v9544_v33  ;;  %3706 = vperm.xlu1 %5147, %v9505_v12  }
 0x4bd   : > { %3908 = vst.msk [vmem:[#allocation3 + $0x38] sm:$0xff] %vm3884_vm15, %v9541_v43  ;;  %3915 = vst.msk [vmem:[#allocation3 + $0x70] sm:$0xff] %vm3884_vm15, %v9544_v33  ;;  %v3547_v9 = vpop.xlane.xlu1 %3546 }
 0x4be   : > { %v9558_v0 = vmax.f32 %v9546_v58, %v3547_v9 }
 0x4c0   : > { %10043 = vst [vmem:[#allocation96_spill] sm:$0xff] %v9558_v0  ;;  %3916 = vst.msk [vmem:[#allocation3 + $0x78] sm:$0xff] %vm3884_vm15, %v9558_v0  ;;  %3721 = vperm.xlu0 %5146, %v9558_v0   ;;  %3671 = vperm.xlu1 %5147, %v9502_v25  }
 0x4c4   : > { %3676 = vperm.xlu1 %5147, %v9524_v8  }
 0x4c8   : > { %3681 = vperm.xlu1 %5147, %v9541_v43  }
 0x4cc   : > { %3716 = vperm.xlu1 %5147, %v9544_v33  }
 0x51f   : > { %v3647_v15 = vpop.permute.xlu0 %3646 }
 0x520   : > { %v3724_v9 = vsub.f32 %v9218_v18, %v3647_v15  ;;  %v3725_v13 = vsub.f32 %v9224_v61, %v3647_v15 }
 0x522   : > { %v3756_v11 = vmul.f32 1.442695, %v3724_v9  ;;  %v3758_v35 = vmul.f32 1.442695, %v3725_v13 }
 0x523   : > { %v3687_v58 = vpop.permute.xlu1 %3686  ;;  %v3692_v45 = vpop.permute.xlu0 %3691 }
 0x524   : > { %5148 = vpow2.f32 %v3756_v11  ;;  %v3740_v0 = vsub.f32 %v9221_v27, %v3687_v58  ;;  %v3741_v25 = vsub.f32 %v9227_v6, %v3687_v58  ;;  %v3742_v8 = vsub.f32 %v9240_v48, %v3692_v45 }
 0x525   : > { %5150 = vpow2.f32 %v3758_v35  ;;  %v3743_v43 = vsub.f32 %v9246_v36, %v3692_v45 }
 0x526   : > { %v3788_v33 = vmul.f32 1.442695, %v3740_v0  ;;  %v3790_v12 = vmul.f32 1.442695, %v3741_v25  ;;  %v3792_v10 = vmul.f32 1.442695, %v3742_v8 }
 0x527   : > { %v3794_v18 = vmul.f32 1.442695, %v3743_v43  ;;  %v3652_v51 = vpop.permute.xlu1 %3651 }
 0x528   : > { %5152 = vpow2.f32 %v3788_v33  ;;  %v3726_v61 = vsub.f32 %v9243_v52, %v3652_v51  ;;  %v3727_v13 = vsub.f32 %v9249_v34, %v3652_v51 }
 0x529   : > { %5154 = vpow2.f32 %v3790_v12 }
 0x52a   : > { %5156 = vpow2.f32 %v3792_v10  ;;  %v3760_v27 = vmul.f32 1.442695, %v3726_v61  ;;  %v3762_v11 = vmul.f32 1.442695, %v3727_v13 }
 0x52b   : > { %5158 = vpow2.f32 %v3794_v18  ;;  %v3657_v6 = vpop.permute.xlu1 %3656 }
 0x52c   : > { %5160 = vpow2.f32 %v3760_v27  ;;  %v3728_v48 = vsub.f32 %v9264_v20, %v3657_v6  ;;  %v3729_v36 = vsub.f32 %v9270_v23, %v3657_v6 }
 0x52d   : > { %5162 = vpow2.f32 %v3762_v11 }
 0x52e   : > { %v5149_v8 = vpop.eup %5148  ;;  %v3764_v45 = vmul.f32 1.442695, %v3728_v48  ;;  %v3766_v58 = vmul.f32 1.442695, %v3729_v36 }
 0x52f   : > { %v5151_v33 = vpop.eup %5150  ;;  %v3697_v35 = vpop.permute.xlu1 %3696 }
 0x530   : > { %v3702_v52 = vpop.permute.xlu0 %3701  ;;  %5164 = vpow2.f32 %v3764_v45  ;;  %v3744_v34 = vsub.f32 %v9267_v44, %v3697_v35  ;;  %v3745_v51 = vsub.f32 %v9275_v37, %v3697_v35  ;;  %v3820_v10 = vadd.f32 %v5151_v33, %v5149_v8 }
 0x531   : > { %v3746_v43 = vsub.f32 %v9291_v19, %v3702_v52  ;;  %5166 = vpow2.f32 %v3766_v58  ;;  %v3747_v23 = vsub.f32 %v9297_v22, %v3702_v52 }
 0x532   : > { %v5153_v12 = vpop.eup %5152  ;;  %v3796_v20 = vmul.f32 1.442695, %v3744_v34  ;;  %v3798_v25 = vmul.f32 1.442695, %v3745_v51  ;;  %3821 = vadd.xlane.f32.xlu1 %v3820_v10 }
 0x533   : > { %v5155_v15 = vpop.eup %5154  ;;  %v3800_v0 = vmul.f32 1.442695, %v3746_v43  ;;  %v3662_v9 = vpop.permute.xlu1 %3661  ;;  %v3802_v27 = vmul.f32 1.442695, %v3747_v23 }
 0x534   : > { %v5157_v18 = vpop.eup %5156  ;;  %5168 = vpow2.f32 %v3796_v20  ;;  %v3730_v61 = vsub.f32 %v9288_v2, %v3662_v9  ;;  %v3731_v44 = vsub.f32 %v9294_v5, %v3662_v9  ;;  %v3844_v37 = vadd.f32 %v5155_v15, %v5153_v12 }
 0x535   : > { %v5159_v13 = vpop.eup %5158  ;;  %5170 = vpow2.f32 %v3798_v25 }
 0x536   : > { %v5161_v19 = vpop.eup %5160  ;;  %v3768_v11 = vmul.f32 1.442695, %v3730_v61  ;;  %v3770_v6 = vmul.f32 1.442695, %v3731_v44  ;;  %3845 = vadd.xlane.f32.xlu0 %v3844_v37  ;;  %v3847_v48 = vadd.f32 %v5159_v13, %v5157_v18  ;;  %5172 = vpow2.f32 %v3800_v0 }
 0x537   : > { %v5163_v22 = vpop.eup %5162  ;;  %v3667_v36 = vpop.permute.xlu1 %3666 }
 0x538   : > { %5174 = vpow2.f32 %v3768_v11  ;;  %3848 = vadd.xlane.f32.xlu1 %v3847_v48  ;;  %v3732_v8 = vsub.f32 %v9312_v62, %v3667_v36  ;;  %v3733_v2 = vsub.f32 %v9318_v50, %v3667_v36  ;;  %v3823_v5 = vadd.f32 %v5163_v22, %v5161_v19  ;;  %v3712_v52 = vpop.permute.xlu0 %3711 }
 0x539   : > { %5176 = vpow2.f32 %v3770_v6  ;;  %v3750_v50 = vsub.f32 %v9339_v41, %v3712_v52  ;;  %v3751_v23 = vsub.f32 %v9345_v54, %v3712_v52 }
 0x53a   : > { %v5165_v45 = vpop.eup %5164  ;;  %5178 = vpow2.f32 %v3802_v27  ;;  %v3772_v58 = vmul.f32 1.442695, %v3732_v8  ;;  %v3774_v33 = vmul.f32 1.442695, %v3733_v2  ;;  %3824 = vadd.xlane.f32.xlu0 %v3823_v5 }
 0x53b   : > { %v5167_v35 = vpop.eup %5166  ;;  %v3707_v34 = vpop.permute.xlu1 %3706  ;;  %v3808_v61 = vmul.f32 1.442695, %v3750_v50  ;;  %v3810_v13 = vmul.f32 1.442695, %v3751_v23 }
 0x53c   : > { %5180 = vpow2.f32 %v3772_v58  ;;  %v3748_v51 = vsub.f32 %v9315_v46, %v3707_v34  ;;  %v3749_v43 = vsub.f32 %v9323_v55, %v3707_v34  ;;  %v3826_v10 = vadd.f32 %v5167_v35, %v5165_v45 }
 0x53d   : > { %5182 = vpow2.f32 %v3774_v33 }
 0x53e   : > { %v5169_v62 = vpop.eup %5168  ;;  %v3804_v12 = vmul.f32 1.442695, %v3748_v51  ;;  %v3806_v20 = vmul.f32 1.442695, %v3749_v43  ;;  %3827 = vadd.xlane.f32.xlu0 %v3826_v10 }
 0x53f   : > { %v5171_v25 = vpop.eup %5170  ;;  %v3672_v15 = vpop.permute.xlu1 %3671 }
 0x540   : > { %5184 = vpow2.f32 %v3804_v12  ;;  %v3734_v0 = vsub.f32 %v9336_v1, %v3672_v15  ;;  %v3735_v9 = vsub.f32 %v9342_v14, %v3672_v15  ;;  %v5173_v46 = vpop.eup %5172  ;;  %v3850_v55 = vadd.f32 %v5171_v25, %v5169_v62  ;;  %v3722_v19 = vpop.permute.xlu0 %3721 }
 0x541   : > { %5186 = vpow2.f32 %v3806_v20  ;;  %v3754_v48 = vsub.f32 %v9387_v24, %v3722_v19  ;;  %v3755_v2 = vsub.f32 %v9393_v57, %v3722_v19  ;;  %v10044_v19 = vsub.f32 %v9409_v40, %v9412_v63 }
 0x542   : > { %v5175_v18 = vpop.eup %5174  ;;  %v3776_v44 = vmul.f32 1.442695, %v3734_v0  ;;  %v3778_v37 = vmul.f32 1.442695, %v3735_v9  ;;  %3851 = vadd.xlane.f32.xlu0 %v3850_v55 }
 0x543   : > { %v5177_v41 = vpop.eup %5176  ;;  %v3677_v27 = vpop.permute.xlu1 %3676  ;;  %v3816_v35 = vmul.f32 1.442695, %v3754_v48  ;;  %v3818_v51 = vmul.f32 1.442695, %v3755_v2 }
 0x544   : > { %v5179_v54 = vpop.eup %5178  ;;  %5188 = vpow2.f32 %v3776_v44  ;;  %v3736_v11 = vsub.f32 %v9360_v21, %v3677_v27  ;;  %v3737_v1 = vsub.f32 %v9366_v53, %v3677_v27  ;;  %v3829_v6 = vadd.f32 %v5177_v41, %v5175_v18 }
 0x545   : > { %5190 = vpow2.f32 %v3778_v37  ;;  %v3853_v45 = vadd.f32 %v5179_v54, %v5173_v46  ;;  %v3596_v27 = vmul.f32 1.442695, %v10044_v19  ;;  %v10045_v54 = vsub.f32 %v9416_v60, %v9427_v47 }
 0x546   : > { %v5181_v14 = vpop.eup %5180  ;;  %5192 = vpow2.f32 %v3808_v61  ;;  %v3780_v22 = vmul.f32 1.442695, %v3736_v11  ;;  %v3782_v36 = vmul.f32 1.442695, %v3737_v1  ;;  %3830 = vadd.xlane.f32.xlu1 %v3829_v6  ;;  %v10046_v1 = vsub.f32 %v9414_v17, %v9424_v28 }
 0x547   : > { %v5183_v8 = vpop.eup %5182  ;;  %5194 = vpow2.f32 %v3810_v13  ;;  %v3682_v5 = vpop.permute.xlu1 %3681  ;;  %v3612_v11 = vmul.f32 1.442695, %v10045_v54  ;;  %v10049_v60 = vsub.f32 %v9451_v16, %v9466_v7  ;;  %v10051_v16 = vsub.f32 %v9468_v29, %v9482_v4  ;;  %v3566_v29 = vld [vmem:[#allocation4 + $0x10] sm:$0xff] }
 0x548   : > { %5196 = vpow2.f32 %v3780_v22  ;;  %v3738_v21 = vsub.f32 %v9384_v59, %v3682_v5  ;;  %v3739_v53 = vsub.f32 %v9390_v3, %v3682_v5  ;;  %v3832_v58 = vadd.f32 %v5183_v8, %v5181_v14  ;;  %v3572_v8 = vld [vmem:[#allocation4 + $0x40] sm:$0xff]  ;;  %v10054_v4 = vld [vmem:[#allocation84_spill] sm:$0xff] }
 0x549   : > { %5198 = vpow2.f32 %v3782_v36  ;;  %v3614_v6 = vmul.f32 1.442695, %v10046_v1  ;;  %v10047_v14 = vsub.f32 %v9431_v26, %v9447_v38  ;;  %v10048_v22 = vsub.f32 %v9429_v49, %v9444_v56  ;;  %v3564_v36 = vld [vmem:[#allocation4] sm:$0xff]  ;;  %v3573_v49 = vld [vmem:[#allocation4 + $0x48] sm:$0xff] }
 0x54a   : > { %v5185_v33 = vpop.eup %5184  ;;  %v3784_v52 = vmul.f32 1.442695, %v3738_v21  ;;  %v3786_v24 = vmul.f32 1.442695, %v3739_v53  ;;  %3833 = vadd.xlane.f32.xlu0 %v3832_v58  ;;  %3854 = vadd.xlane.f32.xlu1 %v3853_v45  ;;  %v3616_v47 = vmul.f32 1.442695, %v10049_v60  ;;  %v10050_v26 = vsub.f32 %v9449_v39, %v9463_v42 }
 0x54b   : > { %v5187_v34 = vpop.eup %5186  ;;  %v3717_v43 = vpop.permute.xlu1 %3716  ;;  %v3598_v48 = vmul.f32 1.442695, %v10047_v14  ;;  %v3600_v40 = vmul.f32 1.442695, %v10048_v22  ;;  %v3618_v7 = vmul.f32 1.442695, %v10051_v16 }
 0x54c   : > { %5200 = vpow2.f32 %v3784_v52  ;;  %v3752_v57 = vsub.f32 %v9363_v31, %v3717_v43  ;;  %v3753_v10 = vsub.f32 %v9371_v30, %v3717_v43  ;;  %v3856_v62 = vadd.f32 %v5187_v34, %v5185_v33  ;;  %v10052_v52 = vld [vmem:[#allocation82_spill] sm:$0xff]  ;;  %v10072_v16 = vld [vmem:[#allocation95_spill] sm:$0xff] }
 0x54d   : > { %5202 = vpow2.f32 %v3786_v24  ;;  %v3602_v38 = vmul.f32 1.442695, %v10050_v26  ;;  %v10053_v39 = vsub.f32 %v9470_v32, %v10052_v52  ;;  %v3568_v22 = vld [vmem:[#allocation4 + $0x20] sm:$0xff] }
 0x54e   : > { %v5189_v59 = vpop.eup %5188  ;;  %5204 = vpow2.f32 %v3816_v35  ;;  %v3812_v3 = vmul.f32 1.442695, %v3752_v57  ;;  %v3814_v50 = vmul.f32 1.442695, %v3753_v10  ;;  %3857 = vadd.xlane.f32.xlu0 %v3856_v62  ;;  %v3565_v35 = vld [vmem:[#allocation4 + $0x8] sm:$0xff]  ;;  %v10055_v10 = vld [vmem:[#allocation86_spill] sm:$0xff] }
 0x54f   : > { %v5191_v12 = vpop.eup %5190  ;;  %5206 = vpow2.f32 %v3818_v51  ;;  %v3604_v42 = vmul.f32 1.442695, %v10053_v39  ;;  %v10056_v62 = vsub.f32 %v10054_v4, %v10055_v10  ;;  %v3576_v26 = vld [vmem:[#allocation4 + $0x60] sm:$0xff]  ;;  %v3570_v4 = vld [vmem:[#allocation4 + $0x30] sm:$0xff] }
 0x550   : > { %v5193_v20 = vpop.eup %5192  ;;  %5208 = vpow2.f32 %v3812_v3  ;;  %v3835_v25 = vadd.f32 %v5191_v12, %v5189_v59 }
 0x551   : > { %v5195_v23 = vpop.eup %5194  ;;  %5210 = vpow2.f32 %v3814_v50  ;;  %v3620_v59 = vmul.f32 1.442695, %v10056_v62 }
 0x552   : > { %v5197_v15 = vpop.eup %5196  ;;  %3836 = vadd.xlane.f32.xlu1 %v3835_v25  ;;  %v3859_v9 = vadd.f32 %v5195_v23, %v5193_v20  ;;  %5212 = vpow2.f32 %v3596_v27  ;;  %v3574_v20 = vld [vmem:[#allocation4 + $0x50] sm:$0xff]  ;;  %v10057_v25 = vld [vmem:[#allocation83_spill] sm:$0xff]  ;;  %v10058_v23 = vld [vmem:[#allocation85_spill] sm:$0xff] }
 0x553   : > { %v5199_v0 = vpop.eup %5198  ;;  %5214 = vpow2.f32 %v3612_v11 }
 0x554   : > { %v3838_v31 = vadd.f32 %v5199_v0, %v5197_v15  ;;  %5216 = vpow2.f32 %v3614_v6  ;;  %v10059_v15 = vsub.f32 %v10057_v25, %v10058_v23 }
 0x555   : > { %5218 = vpow2.f32 %v3598_v48  ;;  %v3575_v48 = vld [vmem:[#allocation4 + $0x58] sm:$0xff] }
 0x556   : > { %v5201_v30 = vpop.eup %5200  ;;  %3839 = vadd.xlane.f32.xlu0 %v3838_v31  ;;  %3860 = vadd.xlane.f32.xlu1 %v3859_v9  ;;  %5220 = vpow2.f32 %v3600_v40  ;;  %v3606_v0 = vmul.f32 1.442695, %v10059_v15 }
 0x557   : > { %v5203_v46 = vpop.eup %5202  ;;  %5222 = vpow2.f32 %v3616_v47 }
 0x558   : > { %v5205_v55 = vpop.eup %5204  ;;  %v3841_v18 = vadd.f32 %v5203_v46, %v5201_v30  ;;  %5224 = vpow2.f32 %v3602_v38  ;;  %v3567_v46 = vld [vmem:[#allocation4 + $0x18] sm:$0xff]  ;;  %v10069_v38 = vld [vmem:[#allocation92_spill] sm:$0xff] }
 0x559   : > { %v5207_v61 = vpop.eup %5206  ;;  %5226 = vpow2.f32 %v3618_v7  ;;  %v10073_v7 = vld [vmem:[#allocation96_spill] sm:$0xff] }
 0x55a   : > { %v5209_v44 = vpop.eup %5208  ;;  %3842 = vadd.xlane.f32.xlu1 %v3841_v18  ;;  %v3865_v13 = vadd.f32 %v5207_v61, %v5205_v55  ;;  %5228 = vpow2.f32 %v3604_v42  ;;  %v10060_v55 = vld [vmem:[#allocation87_spill] sm:$0xff]  ;;  %v10061_v18 = vld [vmem:[#allocation89_spill] sm:$0xff] }
 0x55b   : > { %v5211_v37 = vpop.eup %5210  ;;  %5230 = vpow2.f32 %v3620_v59  ;;  %v10062_v61 = vsub.f32 %v10060_v55, %v10061_v18  ;;  %v3569_v42 = vld [vmem:[#allocation4 + $0x28] sm:$0xff] }
 0x55c   : > { %v3862_v41 = vadd.f32 %v5211_v37, %v5209_v44  ;;  %v5213_v63 = vpop.eup %5212  ;;  %5232 = vpow2.f32 %v3606_v0 }
 0x55d   : > { %v5215_v17 = vpop.eup %5214  ;;  %v3628_v28 = vmul.f32 %v5213_v63, %v3564_v36  ;;  %v3622_v44 = vmul.f32 1.442695, %v10062_v61  ;;  %v10066_v63 = vld [vmem:[#allocation91_spill] sm:$0xff]  ;;  %v10067_v36 = vld [vmem:[#allocation93_spill] sm:$0xff] }
 0x55e   : > { %3863 = vadd.xlane.f32.xlu0 %v3862_v41  ;;  %3866 = vadd.xlane.f32.xlu1 %v3865_v13  ;;  %v5217_v5 = vpop.eup %5216  ;;  %v3636_v56 = vmul.f32 %v5215_v17, %v3572_v8  ;;  %v10063_v41 = vld [vmem:[#allocation88_spill] sm:$0xff]  ;;  %v10064_v13 = vld [vmem:[#allocation90_spill] sm:$0xff]  ;;  %v10068_v60 = vsub.f32 %v10066_v63, %v10067_v36 }
 0x55f   : > { %v5219_v53 = vpop.eup %5218  ;;  %v3637_v58 = vmul.f32 %v5217_v5, %v3573_v49  ;;  %v10065_v19 = vsub.f32 %v10063_v41, %v10064_v13  ;;  %5234 = vpow2.f32 %v3622_v44 }
 0x560   : > { %v3629_v51 = vmul.f32 %v5219_v53, %v3565_v35  ;;  %v5221_v43 = vpop.eup %5220  ;;  %v3610_v47 = vmul.f32 1.442695, %v10068_v60 }
 0x561   : > { %v3630_v32 = vmul.f32 %v5221_v43, %v3566_v29  ;;  %v5223_v50 = vpop.eup %5222  ;;  %v3608_v27 = vmul.f32 1.442695, %v10065_v19  ;;  %v3577_v29 = vld [vmem:[#allocation4 + $0x68] sm:$0xff] }
 0x562   : > { %v5225_v9 = vpop.eup %5224  ;;  %v3638_v30 = vmul.f32 %v5223_v50, %v3574_v20 }
 0x563   : > { %v5227_v11 = vpop.eup %5226  ;;  %v3631_v1 = vmul.f32 %v5225_v9, %v3567_v46  ;;  %5236 = vpow2.f32 %v3608_v27  ;;  %v3579_v9 = vld [vmem:[#allocation4 + $0x78] sm:$0xff] }
 0x564   : > { %v5229_v6 = vpop.eup %5228  ;;  %v3639_v17 = vmul.f32 %v5227_v11, %v3575_v48  ;;  %5238 = vpow2.f32 %v3610_v47  ;;  %v3921_v47 = vld [vmem:[#allocation3] sm:$0xff] (!%p4715_p6) }
 0x565   : > { %v5231_v8 = vpop.eup %5230 }
 0x566   : > { %v3640_v35 = vmul.f32 %v5231_v8, %v3576_v26  ;;  %v5233_v52 = vpop.eup %5232 }
 0x5bf   : > { %v3822_v2 = vpop.xlane.xlu1 %3821 }
 0x5c0   : > { %v3868_v45 = vadd.f32 %v3822_v2, %v3628_v28  ;;  %v3632_v28 = vmul.f32 %v5229_v6, %v3568_v22 }
 0x5c2   : > { %3885 = vst.msk [vmem:[#allocation4] sm:$0xff] %vm3884_vm15, %v3868_v45  ;;  %v10070_v45 = vld [vmem:[#allocation94_spill] sm:$0xff] }
 0x5c3   : > { %v3846_v21 = vpop.xlane.xlu0 %3845  ;;  %v10071_v49 = vsub.f32 %v10069_v38, %v10070_v45  ;;  %v3923_v45 = vld [vmem:[#allocation3 + $0x10] sm:$0xff] (!%p4715_p6) }
 0x5c4   : > { %v3876_v33 = vadd.f32 %v3846_v21, %v3636_v56 }
 0x5c5   : > { %v3849_v24 = vpop.xlane.xlu1 %3848  ;;  %v3624_v56 = vmul.f32 1.442695, %v10071_v49 }
 0x5c6   : > { %v3877_v34 = vadd.f32 %v3849_v24, %v3637_v58  ;;  %3893 = vst.msk [vmem:[#allocation4 + $0x40] sm:$0xff] %vm3884_vm15, %v3876_v33  ;;  %v10074_v58 = vsub.f32 %v10072_v16, %v10073_v7  ;;  %v3924_v16 = vld [vmem:[#allocation3 + $0x18] sm:$0xff] (!%p4715_p6) }
 0x5c7   : > { %v3825_v57 = vpop.xlane.xlu0 %3824  ;;  %5240 = vpow2.f32 %v3624_v56 }
 0x5c8   : > { %3894 = vst.msk [vmem:[#allocation4 + $0x48] sm:$0xff] %vm3884_vm15, %v3877_v34  ;;  %v3869_v3 = vadd.f32 %v3825_v57, %v3629_v51  ;;  %v3626_v33 = vmul.f32 1.442695, %v10074_v58  ;;  %v5235_v34 = vpop.eup %5234  ;;  %v3633_v51 = vmul.f32 %v5233_v52, %v3569_v42 }
 0x5c9   : > { %v5237_v43 = vpop.eup %5236  ;;  %v3641_v62 = vmul.f32 %v5235_v34, %v3577_v29  ;;  %v3937_v13 = vld [vmem:[#allocation4] sm:$0xff] (!%p4715_p6) }
 0x5ca   : > { %3886 = vst.msk [vmem:[#allocation4 + $0x8] sm:$0xff] %vm3884_vm15, %v3869_v3  ;;  %5242 = vpow2.f32 %v3626_v33  ;;  %v3634_v59 = vmul.f32 %v5237_v43, %v3570_v4  ;;  %v5239_v3 = vpop.eup %5238 }
 0x5cb   : > { %v3828_v12 = vpop.xlane.xlu0 %3827  ;;  %5244 = vlog2.f32 (!%p4715_p6), %v3937_v13 }
 0x5cc   : > { %v3870_v31 = vadd.f32 %v3828_v12, %v3630_v32  ;;  %v3571_v12 = vld [vmem:[#allocation4 + $0x38] sm:$0xff] }
 0x5cd   : > { %v3635_v15 = vmul.f32 %v5239_v3, %v3571_v12  ;;  %v3945_v48 = vld [vmem:[#allocation4 + $0x40] sm:$0xff] (!%p4715_p6) }
 0x5ce   : > { %3887 = vst.msk [vmem:[#allocation4 + $0x10] sm:$0xff] %vm3884_vm15, %v3870_v31 }
 0x5cf   : > { %v3852_v37 = vpop.xlane.xlu0 %3851  ;;  %v3946_v22 = vld [vmem:[#allocation4 + $0x48] sm:$0xff] (!%p4715_p6) }
 0x5d0   : > { %v3878_v54 = vadd.f32 %v3852_v37, %v3638_v30  ;;  %v3578_v30 = vld [vmem:[#allocation4 + $0x70] sm:$0xff] }
 0x5d1   : > { %v5241_v23 = vpop.eup %5240  ;;  %v3938_v19 = vld [vmem:[#allocation4 + $0x8] sm:$0xff] (!%p4715_p6) }
 0x5d2   : > { %3895 = vst.msk [vmem:[#allocation4 + $0x50] sm:$0xff] %vm3884_vm15, %v3878_v54  ;;  %v3642_v18 = vmul.f32 %v5241_v23, %v3578_v30  ;;  %5246 = vlog2.f32 (!%p4715_p6), %v3938_v19  ;;  %v3930_v23 = vld [vmem:[#allocation3 + $0x48] sm:$0xff] (!%p4715_p6) }
 0x5d3   : > { %v3831_v14 = vpop.xlane.xlu1 %3830 }
 0x5d4   : > { %v3871_v40 = vadd.f32 %v3831_v14, %v3631_v1  ;;  %v5243_v0 = vpop.eup %5242 }
 0x5d5   : > { %v3643_v55 = vmul.f32 %v5243_v0, %v3579_v9  ;;  %v3939_v27 = vld [vmem:[#allocation4 + $0x10] sm:$0xff] (!%p4715_p6)  ;;  %v5245_v60 = vpop.eup (!%p4715_p6), %5244 }
 0x5d6   : > { %3888 = vst.msk [vmem:[#allocation4 + $0x18] sm:$0xff] %vm3884_vm15, %v3871_v40  ;;  %5248 = vlog2.f32 (!%p4715_p6), %v3939_v27  ;;  %v3954_v8 = vmul.f32 (!%p4715_p6), 0.6931472, %v5245_v60  ;;  %v3931_v9 = vld [vmem:[#allocation3 + $0x50] sm:$0xff] (!%p4715_p6) }
 0x5d7   : > { %v3855_v2 = vpop.xlane.xlu1 %3854  ;;  %v3834_v5 = vpop.xlane.xlu0 %3833 }
 0x5d8   : > { %v3879_v21 = vadd.f32 %v3855_v2, %v3639_v17  ;;  %v3872_v53 = vadd.f32 %v3834_v5, %v3632_v28  ;;  %v3922_v2 = vld [vmem:[#allocation3 + $0x8] sm:$0xff] (!%p4715_p6) }
 0x5d9   : > { %v3947_v40 = vld [vmem:[#allocation4 + $0x50] sm:$0xff] (!%p4715_p6) }
 0x5da   : > { %3896 = vst.msk [vmem:[#allocation4 + $0x58] sm:$0xff] %vm3884_vm15, %v3879_v21  ;;  %3889 = vst.msk [vmem:[#allocation4 + $0x20] sm:$0xff] %vm3884_vm15, %v3872_v53  ;;  %v3985_v21 = vadd.f32 (!%p4715_p6), %v3954_v8, %v3921_v47 }
 0x5db   : > { %v3858_v39 = vpop.xlane.xlu0 %3857 }
 0x5dc   : > { %v3880_v24 = vadd.f32 %v3858_v39, %v3640_v35  ;;  %v5247_v28 = vpop.eup (!%p4715_p6), %5246  ;;  %v3925_v35 = vld [vmem:[#allocation3 + $0x20] sm:$0xff] (!%p4715_p6)  ;;  %4001 = vst.msk [vmem:[%s5558_s25] sm:$0xff] (!%p4715_p6), %vm3884_vm15, %v3985_v21 }
 0x5dd   : > { %v3940_v54 = vld [vmem:[#allocation4 + $0x18] sm:$0xff] (!%p4715_p6)  ;;  %v3956_v38 = vmul.f32 (!%p4715_p6), 0.6931472, %v5247_v28 }
 0x5de   : > { %3897 = vst.msk [vmem:[#allocation4 + $0x60] sm:$0xff] %vm3884_vm15, %v3880_v24  ;;  %5250 = vlog2.f32 (!%p4715_p6), %v3940_v54  ;;  %v3926_v24 = vld [vmem:[#allocation3 + $0x28] sm:$0xff] (!%p4715_p6) }
 0x5df   : > { %v3837_v57 = vpop.xlane.xlu1 %3836  ;;  %v3986_v58 = vadd.f32 (!%p4715_p6), %v3956_v38, %v3922_v2  ;;  %v3934_v54 = vld [vmem:[#allocation3 + $0x68] sm:$0xff] (!%p4715_p6) }
 0x5e0   : > { %v3873_v10 = vadd.f32 %v3837_v57, %v3633_v51  ;;  %v5249_v26 = vpop.eup (!%p4715_p6), %5248  ;;  %v3927_v57 = vld [vmem:[#allocation3 + $0x30] sm:$0xff] (!%p4715_p6) }
 0x5e1   : > { %v3941_v11 = vld [vmem:[#allocation4 + $0x20] sm:$0xff] (!%p4715_p6)  ;;  %v3948_v63 = vld [vmem:[#allocation4 + $0x58] sm:$0xff] (!%p4715_p6)  ;;  %v3958_v53 = vmul.f32 (!%p4715_p6), 0.6931472, %v5249_v26  ;;  %4002 = vst.msk [vmem:[%s5558_s25 + $0x8] sm:$0xff] (!%p4715_p6), %vm3884_vm15, %v3986_v58 }
 0x5e2   : > { %3890 = vst.msk [vmem:[#allocation4 + $0x28] sm:$0xff] %vm3884_vm15, %v3873_v10  ;;  %5252 = vlog2.f32 (!%p4715_p6), %v3941_v11 }
 0x5e3   : > { %v3861_v32 = vpop.xlane.xlu1 %3860  ;;  %v3840_v50 = vpop.xlane.xlu0 %3839  ;;  %v3987_v39 = vadd.f32 (!%p4715_p6), %v3958_v53, %v3923_v45 }
 0x5e4   : > { %v3881_v20 = vadd.f32 %v3861_v32, %v3641_v62  ;;  %v3874_v25 = vadd.f32 %v3840_v50, %v3634_v59  ;;  %v3928_v62 = vld [vmem:[#allocation3 + $0x38] sm:$0xff] (!%p4715_p6)  ;;  %v3929_v50 = vld [vmem:[#allocation3 + $0x40] sm:$0xff] (!%p4715_p6) }
 0x5e5   : > { %v3949_v36 = vld [vmem:[#allocation4 + $0x60] sm:$0xff] (!%p4715_p6)  ;;  %4003 = vst.msk [vmem:[%s5558_s25 + $0x10] sm:$0xff] (!%p4715_p6), %vm3884_vm15, %v3987_v39 }
 0x5e6   : > { %3898 = vst.msk [vmem:[#allocation4 + $0x68] sm:$0xff] %vm3884_vm15, %v3881_v20  ;;  %3891 = vst.msk [vmem:[#allocation4 + $0x30] sm:$0xff] %vm3884_vm15, %v3874_v25 }
 0x5e7   : > { %v3843_v31 = vpop.xlane.xlu1 %3842 }
 0x5e8   : > { %v3875_v46 = vadd.f32 %v3843_v31, %v3635_v15  ;;  %3920 = sbr.rel (%p4715_p6) target bundleno = 1546 (0x60a), region = 67  ;;  %v5251_v56 = vpop.eup (!%p4715_p6), %5250 }
 0x5e9   : > { %v3942_v1 = vld [vmem:[#allocation4 + $0x28] sm:$0xff] (!%p4715_p6)  ;;  %v3960_v33 = vmul.f32 (!%p4715_p6), 0.6931472, %v5251_v56 }
 0x5ea   : > { %3892 = vst.msk [vmem:[#allocation4 + $0x38] sm:$0xff] %vm3884_vm15, %v3875_v46  ;;  %5254 = vlog2.f32 (!%p4715_p6), %v3942_v1 }
 0x5eb   : > { %v3867_v61 = vpop.xlane.xlu1 %3866  ;;  %v3864_v44 = vpop.xlane.xlu0 %3863  ;;  %v3988_v51 = vadd.f32 (!%p4715_p6), %v3960_v33, %v3924_v16 }
 0x5ec   : > { %v3883_v37 = vadd.f32 %v3867_v61, %v3643_v55  ;;  %v3882_v41 = vadd.f32 %v3864_v44, %v3642_v18  ;;  %v5253_v7 = vpop.eup (!%p4715_p6), %5252  ;;  %v3932_v18 = vld [vmem:[#allocation3 + $0x58] sm:$0xff] (!%p4715_p6) }
 0x5ed   : > { %v3943_v6 = vld [vmem:[#allocation4 + $0x30] sm:$0xff] (!%p4715_p6)  ;;  %v3950_v17 = vld [vmem:[#allocation4 + $0x68] sm:$0xff] (!%p4715_p6)  ;;  %v3962_v42 = vmul.f32 (!%p4715_p6), 0.6931472, %v5253_v7  ;;  %4004 = vst.msk [vmem:[%s5558_s25 + $0x18] sm:$0xff] (!%p4715_p6), %vm3884_vm15, %v3988_v51 }
 0x5ee   : > { %3900 = vst.msk [vmem:[#allocation4 + $0x78] sm:$0xff] %vm3884_vm15, %v3883_v37  ;;  %3899 = vst.msk [vmem:[#allocation4 + $0x70] sm:$0xff] %vm3884_vm15, %v3882_v41  ;;  %5256 = vlog2.f32 (!%p4715_p6), %v3943_v6  ;;  %v3933_v41 = vld [vmem:[#allocation3 + $0x60] sm:$0xff] (!%p4715_p6) }
 0x5ef   : > { %v3989_v4 = vadd.f32 %v3962_v42, %v3925_v35 }
 0x5f1   : > { %v3944_v14 = vld [vmem:[#allocation4 + $0x38] sm:$0xff]  ;;  %4005 = vst.msk [vmem:[%s5558_s25 + $0x20] sm:$0xff] %vm3884_vm15, %v3989_v4 }
 0x5f2   : > { %5258 = vlog2.f32 %v3944_v14  ;;  %v3935_v14 = vld [vmem:[#allocation3 + $0x70] sm:$0xff] }
 0x5f3   : > { %5260 = vlog2.f32 %v3945_v48 }
 0x5f4   : > { %5262 = vlog2.f32 %v3946_v22  ;;  %v5255_v52 = vpop.eup %5254 }
 0x5f5   : > { %5264 = vlog2.f32 %v3947_v40  ;;  %v3951_v5 = vld [vmem:[#allocation4 + $0x70] sm:$0xff]  ;;  %v3952_v49 = vld [vmem:[#allocation4 + $0x78] sm:$0xff]  ;;  %v3964_v43 = vmul.f32 0.6931472, %v5255_v52 }
 0x5f6   : > { %5266 = vlog2.f32 %v3948_v63  ;;  %v3936_v63 = vld [vmem:[#allocation3 + $0x78] sm:$0xff] }
 0x5f7   : > { %5268 = vlog2.f32 %v3949_v36  ;;  %v3990_v3 = vadd.f32 %v3964_v43, %v3926_v24 }
 0x5f8   : > { %5270 = vlog2.f32 %v3950_v17  ;;  %v5257_v34 = vpop.eup %5256 }
 0x5f9   : > { %5272 = vlog2.f32 %v3951_v5  ;;  %v3966_v10 = vmul.f32 0.6931472, %v5257_v34  ;;  %4006 = vst.msk [vmem:[%s5558_s25 + $0x28] sm:$0xff] %vm3884_vm15, %v3990_v3 }
 0x5fa   : > { %5274 = vlog2.f32 %v3952_v49 }
 0x5fb   : > { %v3991_v20 = vadd.f32 %v3966_v10, %v3927_v57 }
 0x5fc   : > { %v5259_v29 = vpop.eup %5258 }
 0x5fd   : > { %v5261_v59 = vpop.eup %5260  ;;  %v3968_v32 = vmul.f32 0.6931472, %v5259_v29  ;;  %4007 = vst.msk [vmem:[%s5558_s25 + $0x30] sm:$0xff] %vm3884_vm15, %v3991_v20 }
 0x5fe   : > { %v5263_v12 = vpop.eup %5262  ;;  %v3970_v25 = vmul.f32 0.6931472, %v5261_v59 }
 0x5ff   : > { %v5265_v15 = vpop.eup %5264  ;;  %v3992_v0 = vadd.f32 %v3968_v32, %v3928_v62  ;;  %v3972_v31 = vmul.f32 0.6931472, %v5263_v12 }
 0x600   : > { %v5267_v30 = vpop.eup %5266  ;;  %v3993_v46 = vadd.f32 %v3970_v25, %v3929_v50  ;;  %v3974_v55 = vmul.f32 0.6931472, %v5265_v15 }
 0x601   : > { %v5269_v61 = vpop.eup %5268  ;;  %4008 = vst.msk [vmem:[%s5558_s25 + $0x38] sm:$0xff] %vm3884_vm15, %v3992_v0  ;;  %v3994_v44 = vadd.f32 %v3972_v31, %v3930_v23  ;;  %v3976_v37 = vmul.f32 0.6931472, %v5267_v30 }
 0x602   : > { %v5271_v13 = vpop.eup %5270  ;;  %4009 = vst.msk [vmem:[%s5558_s25 + $0x40] sm:$0xff] %vm3884_vm15, %v3993_v46  ;;  %v3995_v19 = vadd.f32 %v3974_v55, %v3931_v9  ;;  %v3978_v27 = vmul.f32 0.6931472, %v5269_v61 }
 0x603   : > { %v5273_v11 = vpop.eup %5272  ;;  %4010 = vst.msk [vmem:[%s5558_s25 + $0x48] sm:$0xff] %vm3884_vm15, %v3994_v44  ;;  %v3996_v1 = vadd.f32 %v3976_v37, %v3932_v18  ;;  %v3980_v6 = vmul.f32 0.6931472, %v5271_v13 }
 0x604   : > { %v5275_v48 = vpop.eup %5274  ;;  %4011 = vst.msk [vmem:[%s5558_s25 + $0x50] sm:$0xff] %vm3884_vm15, %v3995_v19  ;;  %v3997_v22 = vadd.f32 %v3978_v27, %v3933_v41  ;;  %v3982_v40 = vmul.f32 0.6931472, %v5273_v11 }
 0x605   : > { %4012 = vst.msk [vmem:[%s5558_s25 + $0x58] sm:$0xff] %vm3884_vm15, %v3996_v1  ;;  %v3998_v36 = vadd.f32 %v3980_v6, %v3934_v54  ;;  %v3984_v60 = vmul.f32 0.6931472, %v5275_v48 }
 0x606   : > { %4013 = vst.msk [vmem:[%s5558_s25 + $0x60] sm:$0xff] %vm3884_vm15, %v3997_v22  ;;  %v3999_v47 = vadd.f32 %v3982_v40, %v3935_v14 }
 0x607   : > { %4014 = vst.msk [vmem:[%s5558_s25 + $0x68] sm:$0xff] %vm3884_vm15, %v3998_v36  ;;  %v4000_v17 = vadd.f32 %v3984_v60, %v3936_v63 }
 0x608   : > { %4015 = vst.msk [vmem:[%s5558_s25 + $0x70] sm:$0xff] %vm3884_vm15, %v3999_v47 }
 0x609   : > { %4016 = vst.msk [vmem:[%s5558_s25 + $0x78] sm:$0xff] %vm3884_vm15, %v4000_v17 }
 0x60a PF: > { %s4724_s23 = sshll.u32 %s5374_s24, 6  ;;  %s4039_s12 = sshll.u32 %s5562_s22, 4  ;;  %s9701_s12 = int_to_ptr.vmem [resolvable:$true] %s4039_s12 }
 0x60b   : > { %s4036_s13 = sadd.s32 %s4724_s23, %s5540_s8  ;;  %s10075_s25 = sand.u32 1, %s5354_s19  }
 0x60c   : > { %s4720_s10 = sshll.u32 %s4036_s13, 7  ;;  %s9710_s30 = scalar_lea.sflag [#allocation7], %s10075_s25 }
 0x60d   : > { %s9706_s26 = scalar_lea.hbm %s9772_s4, %s4720_s10  ;;  %s5276_s6 = scalar_lea.vmem %s9701_s12, 4096 }
 0x60e   : > { %p5277_p7 = scmp.ne.s32.totalorder %s9701_s12, %s5276_s6  ;;  %s5400_s22 = smov [#allocation6]  }
 0x60f   : > { %s5280_s24 = sshll.u32 %s5400_s22, 4  ;;  %s5281_s24 = int_to_ptr.vmem [resolvable:$false] %s5280_s24 }
 0x610   : > { %p5278_p8 = pnand %p5277_p7, %p5513_p10  ;;  %s5282_s8 = scalar_lea.vmem %s5281_s24, 8192 }
 0x611   : > { %p5283_p11 = scmp.lt.s32.totalorder %s9701_s12, %s5281_s24  ;;  %p5284_p13 = scmp.lt.s32.totalorder %s5282_s8, %s5276_s6 }
 0x612   : > { %p5279_p9 = pneg %p5278_p8 }
 0x613   : > { %p5285_p0 = por %p5284_p13, %p5283_p11 }
 0x615   : > { %p5286_p1 = pnand %p5285_p0, %p5279_p9 }
 0x617   : > { %5289 = shalt.err (!%p5286_p1)
}
 0x618   : > { %s5290_s17 = scalar_lea.hbm %s9706_s26, 4096  ;;  %s5294_s29 = scalar_lea.hbm %s9772_s4, 16384 }
 0x619   : > { %p5291_p2 = scmp.ne.s32.totalorder %s9706_s26, %s5290_s17  ;;  %p5295_p5 = scmp.lt.u32.totalorder %s9706_s26, %s9772_s4 }
 0x61a   : > { %p5296_p6 = scmp.lt.u32.totalorder %s5294_s29, %s5290_s17  ;;  %p5298_p8 = scmp.lt.u32.totalorder %s5290_s17, %s9706_s26 }
 0x61b   : > { %p5292_p3 = pnand %p5291_p2, %p5513_p10 }
 0x61c   : > { %p5297_p7 = por %p5296_p6, %p5295_p5 }
 0x61d   : > { %p5293_p4 = pneg %p5292_p3 }
 0x61e   : > { %p5299_p9 = por %p5298_p8, %p5297_p7 }
 0x620   : > { %p5300_p11 = pnand %p5299_p9, %p5293_p4 }
 0x622   : > { %5303 = shalt.err (!%p5300_p11)
}
 0x623   : > { %s5401_s23 = smov 256   ;;  %s5402_s13 = smov 512  }
 0x624   : > { %s5403_s10 = smov 16  }
 0x625   : > { %4961 = dma.vmem_to_hbm [thread:$0]  (%p5513_p10), %s9701_s12, 4096, %s9706_s26, %s9710_s30, %s5401_s23, %s5402_s13, %s5403_s10  }
 0x626 PF: > { %p4967_p13 = scmp.ge.s32.totalorder %s5386_s27, 2  ;;  %s4058_s9 = sand.u32 1, %s5350_s18  }
 0x627   : > { %s4059_s2 = scalar_lea.sflag [#allocation7], %s4058_s9 }
 0x628   : > { %p4964_p0 = pnand %p4967_p13, %p5520_p12 }
 0x62a   : > { %5345 = dma.done.wait (!%p4964_p0), %s4059_s2, 4096  }
 0x62b   : > { %5347 = vsyncadd (!%p4964_p0), %s4059_s2, 4294963200  ;;  %s19_s27 = sadd.s32 1, %s5386_s27   ;;  %s10076_s21 = sld [smem:[#allocation9_spill]] }
 0x62c   : > { %p16_p1 = scmp.ge.s32.totalorder %s19_s27, 6   ;;  %s10077_s22 = sld [smem:[#allocation14_spill]] }
 0x62d   : > { %s10078_s23 = sld [smem:[#allocation10_spill]]  ;;  %s10079_s24 = sld [smem:[#allocation11_spill]] }
 0x62e   : > { %s10080_s25 = sld [smem:[#allocation12_spill]]  ;;  %s10081_s26 = sld [smem:[#allocation13_spill]] }
 0x62f   : > { %s10082_s18 = smov %s5354_s19  ;;  %s10083_s19 = smov %s5358_s20 }
 0x630   : > { %s10084_s20 = smov %s5518_s15  ;;  %18 = sbr.rel (!%p16_p1) target bundleno = 8 (0x8), region = 125 }
 0x637   :  { %4072 = vsyncpa [#allocation7], 1 }
 0x638   :  { %4074 = vsyncpa [#allocation7 + $0x1], 1 }

</bundles_post_ra>
